<compile_context>
chip_gen: v5e
topology: v5e:2x2
jax: 0.10.0
libtpu: 0.0.40
codegen_flags: <defaults>
</compile_context>

<pallas_src>
import functools

import jax
import jax.numpy as jnp
from jax.experimental import pallas as pl
from jax.experimental.pallas import tpu as pltpu


def _round_up(x, m):
    return (x + m - 1) // m * m


# ------------------------- fused conv (im2col in-kernel) ------------------------- #

def _conv3x3s2_kernel(x_ref, w_ref, b_ref, o_ref, *, Ho, Wo, C, relu):
    """One image per grid step.

    x_ref: (1, Ho+1, 2, Wo+1, 2*C) f32   parity-packed, spatially padded NHWC input
    w_ref: (3, 3, C, Cout)         bf16  per-tap weights
    b_ref: (1, Cout)               f32
    o_ref: (1, Ho*Wo, Cout)        f32   rows are oh*Wo + ow
    """
    Cout = o_ref.shape[-1]
    bias = b_ref[...]                                   # (1, Cout) f32

    def finish(acc):
        acc = acc + bias
        if relu:
            acc = jnp.maximum(acc, 0.0)
        return acc.astype(o_ref.dtype)

    if Wo % 8 == 0:
        # Patch rows flatten for free (Wo is a multiple of the sublane count).
        acc = jnp.zeros((Ho * Wo, Cout), jnp.float32)
        for kh in range(3):
            for kw in range(3):
                hs, ph = kh // 2, kh % 2
                ws, c0 = kw // 2, (kw % 2) * C
                patch = x_ref[0, hs:hs + Ho, ph, ws:ws + Wo, c0:c0 + C]   # (Ho, Wo, C)
                patch = patch.reshape(Ho * Wo, C).astype(jnp.bfloat16)
                acc = acc + jnp.dot(patch, w_ref[kh, kw],
                                    preferred_element_type=jnp.float32)
        o_ref[0] = finish(acc)
    else:
        # Small spatial output (e.g. 4x4): process one output row at a time so that
        # no layout-changing reshape is needed.
        for oh in range(Ho):
            acc = jnp.zeros((Wo, Cout), jnp.float32)
            for kh in range(3):
                for kw in range(3):
                    hs, ph = kh // 2, kh % 2
                    ws, c0 = kw // 2, (kw % 2) * C
                    row = x_ref[0, hs + oh, ph, ws:ws + Wo, c0:c0 + C]    # (Wo, C)
                    acc = acc + jnp.dot(row.astype(jnp.bfloat16), w_ref[kh, kw],
                                        preferred_element_type=jnp.float32)
            o_ref[0, oh * Wo:(oh + 1) * Wo, :] = finish(acc)


def conv2d_s2_relu(x, w_taps, b, *, relu=True):
    """x: (B, H, W, C) NHWC f32, w_taps: (3,3,C,Cout) bf16, b: (1,Cout) f32
    3x3 conv, stride 2, padding 1  ->  (B, H//2, W//2, Cout) f32 (+ReLU)."""
    B, H, W, C = x.shape
    assert H % 2 == 0 and W % 2 == 0
    Ho, Wo = H // 2, W // 2
    Cout = w_taps.shape[-1]

    # Spatial zero-pad (PyTorch padding=1), then a *free* reshape into the
    # parity-packed layout: element (b, h2, p, w2, c2) == xpad(b, 2*h2+p, 2*w2+c2//C, c2%C).
    xp = jnp.pad(x, ((0, 0), (1, 1), (1, 1), (0, 0)))            # (B, 2*(Ho+1), 2*(Wo+1), C)
    xr = xp.reshape(B, Ho + 1, 2, Wo + 1, 2 * C)

    out = pl.pallas_call(
        functools.partial(_conv3x3s2_kernel, Ho=Ho, Wo=Wo, C=C, relu=relu),
        out_shape=jax.ShapeDtypeStruct((B, Ho * Wo, Cout), jnp.float32),
        grid=(B,),
        in_specs=[
            pl.BlockSpec((1, Ho + 1, 2, Wo + 1, 2 * C), lambda i: (i, 0, 0, 0, 0)),
            pl.BlockSpec((3, 3, C, Cout), lambda i: (0, 0, 0, 0)),
            pl.BlockSpec((1, Cout), lambda i: (0, 0)),
        ],
        out_specs=pl.BlockSpec((1, Ho * Wo, Cout), lambda i: (i, 0, 0)),
        compiler_params=pltpu.CompilerParams(dimension_semantics=("parallel",)),
    )(xr, w_taps, b)
    return out.reshape(B, Ho, Wo, Cout)


# ------------------------------ fused fc1 + fc2 ------------------------------ #

def _mlp_kernel(x_ref, w1_ref, b1_ref, w2_ref, b2_ref, o_ref):
    h = jnp.dot(x_ref[...].astype(jnp.bfloat16), w1_ref[...],
                preferred_element_type=jnp.float32)
    h = jnp.maximum(h + b1_ref[...], 0.0)
    o = jnp.dot(h.astype(jnp.bfloat16), w2_ref[...],
                preferred_element_type=jnp.float32)
    o_ref[...] = (o + b2_ref[...]).astype(o_ref.dtype)


def mlp_head(x, w1, b1, w2, b2, *, num_classes):
    """x: (B, 2048) f32; w1: (2048,128) bf16; w2: (128,128) bf16 (padded); -> (B, num_classes)."""
    B, K = x.shape
    N1, N2 = w1.shape[1], w2.shape[1]
    tm = min(_round_up(B, 8), 256)          # M tile: <= ~2 MiB of activations per step
    Mp = _round_up(B, tm)
    if Mp != B:
        x = jnp.zeros((Mp, K), x.dtype).at[:B].set(x)

    out = pl.pallas_call(
        _mlp_kernel,
        out_shape=jax.ShapeDtypeStruct((Mp, N2), jnp.float32),
        grid=(Mp // tm,),
        in_specs=[
            pl.BlockSpec((tm, K), lambda i: (i, 0)),
            pl.BlockSpec((K, N1), lambda i: (0, 0)),
            pl.BlockSpec((1, N1), lambda i: (0, 0)),
            pl.BlockSpec((N1, N2), lambda i: (0, 0)),
            pl.BlockSpec((1, N2), lambda i: (0, 0)),
        ],
        out_specs=pl.BlockSpec((tm, N2), lambda i: (i, 0)),
        compiler_params=pltpu.CompilerParams(dimension_semantics=("parallel",)),
    )(x, w1, b1, w2, b2)
    return out[:B, :num_classes]


# ----------------------------- params (PyTorch layout) ----------------------------- #

def init_params(key):
    ks = jax.random.split(key, 10)

    def u(key, shape, fan_in):
        bound = 1.0 / jnp.sqrt(fan_in)
        return jax.random.uniform(key, shape, jnp.float32, -bound, bound)

    p = {}
    p["conv1_w"] = u(ks[0], (32, 3, 3, 3), 3 * 9)
    p["conv1_b"] = u(ks[1], (32,), 3 * 9)
    p["conv2_w"] = u(ks[2], (64, 32, 3, 3), 32 * 9)
    p["conv2_b"] = u(ks[3], (64,), 32 * 9)
    p["conv3_w"] = u(ks[4], (128, 64, 3, 3), 64 * 9)
    p["conv3_b"] = u(ks[5], (128,), 64 * 9)
    p["fc1_w"] = u(ks[6], (2048, 128), 2048)   # (in, out)
    p["fc1_b"] = u(ks[7], (128,), 2048)
    p["fc2_w"] = u(ks[8], (128, 10), 128)
    p["fc2_b"] = u(ks[9], (10,), 128)
    return p


def prepare_params(p):
    """One-time (outside jit) conversion into kernel-friendly layouts."""
    def conv_pack(w, b):
        # (Cout, Cin, kh, kw) -> (kh, kw, Cin, Cout), bf16 for the MXU.
        return (jnp.transpose(w, (2, 3, 1, 0)).astype(jnp.bfloat16),
                b.reshape(1, -1).astype(jnp.float32))

    q = {}
    q["c1_w"], q["c1_b"] = conv_pack(p["conv1_w"], p["conv1_b"])
    q["c2_w"], q["c2_b"] = conv_pack(p["conv2_w"], p["conv2_b"])
    q["c3_w"], q["c3_b"] = conv_pack(p["conv3_w"], p["conv3_b"])

    # fc1: fold PyTorch's NCHW flatten (row index = c*16 + s) into a row permutation
    # so the kernel consumes the NHWC flatten (row index = s*128 + c) directly.
    C3, S = 128, 16
    w1 = p["fc1_w"].reshape(C3, S, -1).transpose(1, 0, 2).reshape(C3 * S, -1)
    q["fc1_w"] = w1.astype(jnp.bfloat16)
    q["fc1_b"] = p["fc1_b"].reshape(1, -1).astype(jnp.float32)

    # fc2: pad 10 output classes up to a lane-dense 128 columns (sliced in the wrapper).
    n_cls = p["fc2_w"].shape[1]
    w2 = jnp.zeros((p["fc2_w"].shape[0], 128), jnp.float32).at[:, :n_cls].set(p["fc2_w"])
    b2 = jnp.zeros((1, 128), jnp.float32).at[0, :n_cls].set(p["fc2_b"])
    q["fc2_w"] = w2.astype(jnp.bfloat16)
    q["fc2_b"] = b2
    return q


# ------------------------------------- model ------------------------------------- #

def net_forward(qp, x):
    """x: (B, 3, 32, 32) NCHW f32 -> logits (B, 10)."""
    x = jnp.transpose(x, (0, 2, 3, 1))                       # one-time NCHW -> NHWC
    x = conv2d_s2_relu(x, qp["c1_w"], qp["c1_b"])            # (B, 16, 16, 32)
    x = conv2d_s2_relu(x, qp["c2_w"], qp["c2_b"])            # (B,  8,  8, 64)
    x = conv2d_s2_relu(x, qp["c3_w"], qp["c3_b"])            # (B,  4,  4, 128)
    x = x.reshape(x.shape[0], -1)                            # (B, 2048), NHWC flatten
    return mlp_head(x, qp["fc1_w"], qp["fc1_b"], qp["fc2_w"], qp["fc2_b"],
                    num_classes=10)


# --------------------------------- reference check --------------------------------- #

def net_forward_ref(params, x):
    dn = jax.lax.conv_dimension_numbers(x.shape, params["conv1_w"].shape,
                                        ("NCHW", "OIHW", "NCHW"))

    def conv(x, w, b):
        y = jax.lax.conv_general_dilated(x, w, (2, 2), ((1, 1), (1, 1)),
                                         dimension_numbers=dn)
        return jnp.maximum(y + b[None, :, None, None], 0.0)

    x = conv(x, params["conv1_w"], params["conv1_b"])
    x = conv(x, params["conv2_w"], params["conv2_b"])
    x = conv(x, params["conv3_w"], params["conv3_b"])
    x = x.reshape(x.shape[0], -1)
    x = jnp.maximum(x @ params["fc1_w"] + params["fc1_b"], 0.0)
    return x @ params["fc2_w"] + params["fc2_b"]


# -------------------------------------- main -------------------------------------- #

if __name__ == "__main__":
    key = jax.random.PRNGKey(0)
    pkey, xkey = jax.random.split(key)
    params = init_params(pkey)
    qparams = prepare_params(params)                         # one-time weight packing

    # Input implied by the module (fc1 expects 128*4*4 = 2048): NCHW (B, 3, 32, 32).
    x = jax.random.normal(xkey, (2, 3, 32, 32), jnp.float32)

    logits = jax.jit(net_forward)(qparams, x)
    jax.block_until_ready(logits)

    ref = net_forward_ref(params, x)
    assert logits.shape == (2, 10)
    # bf16 MXU operands (f32 accumulation) -> loosened tolerance vs f32 reference.
    max_err = jnp.max(jnp.abs(logits - ref))
    assert jnp.allclose(logits, ref, atol=5e-2, rtol=5e-2), f"max abs err {max_err}"

    print("KERNEL_OK")
</pallas_src>

<mosaic_0001>
module attributes {stable_mosaic.version = 11 : i64} {
  func.func @_conv3x3s2_kernel(%arg0: i32, %arg1: memref<1x17x2x17x6xf32, #tpu.memory_space<vmem>>, %arg2: memref<3x3x3x32xbf16, #tpu.memory_space<vmem>>, %arg3: memref<1x32xf32, #tpu.memory_space<vmem>>, %arg4: memref<1x256x32xf32, #tpu.memory_space<vmem>>) attributes {dimension_semantics = [#tpu.dimension_semantics<parallel>], iteration_bounds = array<i64: 2>, scalar_prefetch = 0 : i64, scratch_operands = 0 : i64, tpu.core_type = #tpu.core_type<tc>, window_params = [{transform_indices = @transform_0, window_bounds = array<i64: 1, 17, 2, 17, 6>}, {pipeline_mode = #tpu.pipeline_mode<synchronous>, transform_indices = @transform_1, window_bounds = array<i64: 3, 3, 3, 32>}, {pipeline_mode = #tpu.pipeline_mode<synchronous>, transform_indices = @transform_2, window_bounds = array<i64: 1, 32>}, {transform_indices = @transform_3, window_bounds = array<i64: 1, 256, 32>}]} {
    %c0 = arith.constant 0 : index
    %c0_0 = arith.constant 0 : index
    %0 = vector.load %arg3[%c0, %c0_0] : memref<1x32xf32, #tpu.memory_space<vmem>>, vector<1x32xf32>
    %cst = arith.constant 0.000000e+00 : f32
    %1 = vector.broadcast %cst : f32 to vector<256x32xf32>
    %c0_1 = arith.constant 0 : index
    %c0_2 = arith.constant 0 : index
    %c0_3 = arith.constant 0 : index
    %c0_4 = arith.constant 0 : index
    %c0_5 = arith.constant 0 : index
    %2 = vector.load %arg1[%c0_1, %c0_2, %c0_3, %c0_4, %c0_5] : memref<1x17x2x17x6xf32, #tpu.memory_space<vmem>>, vector<1x16x1x16x3xf32>
    %3 = vector.shape_cast %2 : vector<1x16x1x16x3xf32> to vector<16x16x3xf32>
    %4 = vector.shape_cast %3 : vector<16x16x3xf32> to vector<256x3xf32>
    %5 = arith.truncf %4 : vector<256x3xf32> to vector<256x3xbf16>
    %c0_6 = arith.constant 0 : index
    %c0_7 = arith.constant 0 : index
    %c0_8 = arith.constant 0 : index
    %c0_9 = arith.constant 0 : index
    %6 = vector.load %arg2[%c0_6, %c0_7, %c0_8, %c0_9] : memref<3x3x3x32xbf16, #tpu.memory_space<vmem>>, vector<1x1x3x32xbf16>
    %7 = vector.shape_cast %6 : vector<1x1x3x32xbf16> to vector<3x32xbf16>
    %cst_10 = arith.constant dense<0.000000e+00> : vector<256x32xf32>
    %8 = tpu.matmul %5, %7, %cst_10 {dimension_numbers = #tpu.dot_dimension_numbers<[1], [0], [0], [1], [0, 0, 1, 1], [], []>} : vector<256x3xbf16>, vector<3x32xbf16>, vector<256x32xf32> -> vector<256x32xf32>
    %9 = arith.addf %1, %8 : vector<256x32xf32>
    %c0_11 = arith.constant 0 : index
    %c0_12 = arith.constant 0 : index
    %c0_13 = arith.constant 0 : index
    %c0_14 = arith.constant 0 : index
    %c3 = arith.constant 3 : index
    %10 = vector.load %arg1[%c0_11, %c0_12, %c0_13, %c0_14, %c3] : memref<1x17x2x17x6xf32, #tpu.memory_space<vmem>>, vector<1x16x1x16x3xf32>
    %11 = vector.shape_cast %10 : vector<1x16x1x16x3xf32> to vector<16x16x3xf32>
    %12 = vector.shape_cast %11 : vector<16x16x3xf32> to vector<256x3xf32>
    %13 = arith.truncf %12 : vector<256x3xf32> to vector<256x3xbf16>
    %c0_15 = arith.constant 0 : index
    %c1 = arith.constant 1 : index
    %c0_16 = arith.constant 0 : index
    %c0_17 = arith.constant 0 : index
    %14 = vector.load %arg2[%c0_15, %c1, %c0_16, %c0_17] : memref<3x3x3x32xbf16, #tpu.memory_space<vmem>>, vector<1x1x3x32xbf16>
    %15 = vector.shape_cast %14 : vector<1x1x3x32xbf16> to vector<3x32xbf16>
    %cst_18 = arith.constant dense<0.000000e+00> : vector<256x32xf32>
    %16 = tpu.matmul %13, %15, %cst_18 {dimension_numbers = #tpu.dot_dimension_numbers<[1], [0], [0], [1], [0, 0, 1, 1], [], []>} : vector<256x3xbf16>, vector<3x32xbf16>, vector<256x32xf32> -> vector<256x32xf32>
    %17 = arith.addf %9, %16 : vector<256x32xf32>
    %c0_19 = arith.constant 0 : index
    %c0_20 = arith.constant 0 : index
    %c0_21 = arith.constant 0 : index
    %c1_22 = arith.constant 1 : index
    %c0_23 = arith.constant 0 : index
    %18 = vector.load %arg1[%c0_19, %c0_20, %c0_21, %c1_22, %c0_23] : memref<1x17x2x17x6xf32, #tpu.memory_space<vmem>>, vector<1x16x1x16x3xf32>
    %19 = vector.shape_cast %18 : vector<1x16x1x16x3xf32> to vector<16x16x3xf32>
    %20 = vector.shape_cast %19 : vector<16x16x3xf32> to vector<256x3xf32>
    %21 = arith.truncf %20 : vector<256x3xf32> to vector<256x3xbf16>
    %c0_24 = arith.constant 0 : index
    %c2 = arith.constant 2 : index
    %c0_25 = arith.constant 0 : index
    %c0_26 = arith.constant 0 : index
    %22 = vector.load %arg2[%c0_24, %c2, %c0_25, %c0_26] : memref<3x3x3x32xbf16, #tpu.memory_space<vmem>>, vector<1x1x3x32xbf16>
    %23 = vector.shape_cast %22 : vector<1x1x3x32xbf16> to vector<3x32xbf16>
    %cst_27 = arith.constant dense<0.000000e+00> : vector<256x32xf32>
    %24 = tpu.matmul %21, %23, %cst_27 {dimension_numbers = #tpu.dot_dimension_numbers<[1], [0], [0], [1], [0, 0, 1, 1], [], []>} : vector<256x3xbf16>, vector<3x32xbf16>, vector<256x32xf32> -> vector<256x32xf32>
    %25 = arith.addf %17, %24 : vector<256x32xf32>
    %c0_28 = arith.constant 0 : index
    %c0_29 = arith.constant 0 : index
    %c1_30 = arith.constant 1 : index
    %c0_31 = arith.constant 0 : index
    %c0_32 = arith.constant 0 : index
    %26 = vector.load %arg1[%c0_28, %c0_29, %c1_30, %c0_31, %c0_32] : memref<1x17x2x17x6xf32, #tpu.memory_space<vmem>>, vector<1x16x1x16x3xf32>
    %27 = vector.shape_cast %26 : vector<1x16x1x16x3xf32> to vector<16x16x3xf32>
    %28 = vector.shape_cast %27 : vector<16x16x3xf32> to vector<256x3xf32>
    %29 = arith.truncf %28 : vector<256x3xf32> to vector<256x3xbf16>
    %c1_33 = arith.constant 1 : index
    %c0_34 = arith.constant 0 : index
    %c0_35 = arith.constant 0 : index
    %c0_36 = arith.constant 0 : index
    %30 = vector.load %arg2[%c1_33, %c0_34, %c0_35, %c0_36] : memref<3x3x3x32xbf16, #tpu.memory_space<vmem>>, vector<1x1x3x32xbf16>
    %31 = vector.shape_cast %30 : vector<1x1x3x32xbf16> to vector<3x32xbf16>
    %cst_37 = arith.constant dense<0.000000e+00> : vector<256x32xf32>
    %32 = tpu.matmul %29, %31, %cst_37 {dimension_numbers = #tpu.dot_dimension_numbers<[1], [0], [0], [1], [0, 0, 1, 1], [], []>} : vector<256x3xbf16>, vector<3x32xbf16>, vector<256x32xf32> -> vector<256x32xf32>
    %33 = arith.addf %25, %32 : vector<256x32xf32>
    %c0_38 = arith.constant 0 : index
    %c0_39 = arith.constant 0 : index
    %c1_40 = arith.constant 1 : index
    %c0_41 = arith.constant 0 : index
    %c3_42 = arith.constant 3 : index
    %34 = vector.load %arg1[%c0_38, %c0_39, %c1_40, %c0_41, %c3_42] : memref<1x17x2x17x6xf32, #tpu.memory_space<vmem>>, vector<1x16x1x16x3xf32>
    %35 = vector.shape_cast %34 : vector<1x16x1x16x3xf32> to vector<16x16x3xf32>
    %36 = vector.shape_cast %35 : vector<16x16x3xf32> to vector<256x3xf32>
    %37 = arith.truncf %36 : vector<256x3xf32> to vector<256x3xbf16>
    %c1_43 = arith.constant 1 : index
    %c1_44 = arith.constant 1 : index
    %c0_45 = arith.constant 0 : index
    %c0_46 = arith.constant 0 : index
    %38 = vector.load %arg2[%c1_43, %c1_44, %c0_45, %c0_46] : memref<3x3x3x32xbf16, #tpu.memory_space<vmem>>, vector<1x1x3x32xbf16>
    %39 = vector.shape_cast %38 : vector<1x1x3x32xbf16> to vector<3x32xbf16>
    %cst_47 = arith.constant dense<0.000000e+00> : vector<256x32xf32>
    %40 = tpu.matmul %37, %39, %cst_47 {dimension_numbers = #tpu.dot_dimension_numbers<[1], [0], [0], [1], [0, 0, 1, 1], [], []>} : vector<256x3xbf16>, vector<3x32xbf16>, vector<256x32xf32> -> vector<256x32xf32>
    %41 = arith.addf %33, %40 : vector<256x32xf32>
    %c0_48 = arith.constant 0 : index
    %c0_49 = arith.constant 0 : index
    %c1_50 = arith.constant 1 : index
    %c1_51 = arith.constant 1 : index
    %c0_52 = arith.constant 0 : index
    %42 = vector.load %arg1[%c0_48, %c0_49, %c1_50, %c1_51, %c0_52] : memref<1x17x2x17x6xf32, #tpu.memory_space<vmem>>, vector<1x16x1x16x3xf32>
    %43 = vector.shape_cast %42 : vector<1x16x1x16x3xf32> to vector<16x16x3xf32>
    %44 = vector.shape_cast %43 : vector<16x16x3xf32> to vector<256x3xf32>
    %45 = arith.truncf %44 : vector<256x3xf32> to vector<256x3xbf16>
    %c1_53 = arith.constant 1 : index
    %c2_54 = arith.constant 2 : index
    %c0_55 = arith.constant 0 : index
    %c0_56 = arith.constant 0 : index
    %46 = vector.load %arg2[%c1_53, %c2_54, %c0_55, %c0_56] : memref<3x3x3x32xbf16, #tpu.memory_space<vmem>>, vector<1x1x3x32xbf16>
    %47 = vector.shape_cast %46 : vector<1x1x3x32xbf16> to vector<3x32xbf16>
    %cst_57 = arith.constant dense<0.000000e+00> : vector<256x32xf32>
    %48 = tpu.matmul %45, %47, %cst_57 {dimension_numbers = #tpu.dot_dimension_numbers<[1], [0], [0], [1], [0, 0, 1, 1], [], []>} : vector<256x3xbf16>, vector<3x32xbf16>, vector<256x32xf32> -> vector<256x32xf32>
    %49 = arith.addf %41, %48 : vector<256x32xf32>
    %c0_58 = arith.constant 0 : index
    %c1_59 = arith.constant 1 : index
    %c0_60 = arith.constant 0 : index
    %c0_61 = arith.constant 0 : index
    %c0_62 = arith.constant 0 : index
    %50 = vector.load %arg1[%c0_58, %c1_59, %c0_60, %c0_61, %c0_62] : memref<1x17x2x17x6xf32, #tpu.memory_space<vmem>>, vector<1x16x1x16x3xf32>
    %51 = vector.shape_cast %50 : vector<1x16x1x16x3xf32> to vector<16x16x3xf32>
    %52 = vector.shape_cast %51 : vector<16x16x3xf32> to vector<256x3xf32>
    %53 = arith.truncf %52 : vector<256x3xf32> to vector<256x3xbf16>
    %c2_63 = arith.constant 2 : index
    %c0_64 = arith.constant 0 : index
    %c0_65 = arith.constant 0 : index
    %c0_66 = arith.constant 0 : index
    %54 = vector.load %arg2[%c2_63, %c0_64, %c0_65, %c0_66] : memref<3x3x3x32xbf16, #tpu.memory_space<vmem>>, vector<1x1x3x32xbf16>
    %55 = vector.shape_cast %54 : vector<1x1x3x32xbf16> to vector<3x32xbf16>
    %cst_67 = arith.constant dense<0.000000e+00> : vector<256x32xf32>
    %56 = tpu.matmul %53, %55, %cst_67 {dimension_numbers = #tpu.dot_dimension_numbers<[1], [0], [0], [1], [0, 0, 1, 1], [], []>} : vector<256x3xbf16>, vector<3x32xbf16>, vector<256x32xf32> -> vector<256x32xf32>
    %57 = arith.addf %49, %56 : vector<256x32xf32>
    %c0_68 = arith.constant 0 : index
    %c1_69 = arith.constant 1 : index
    %c0_70 = arith.constant 0 : index
    %c0_71 = arith.constant 0 : index
    %c3_72 = arith.constant 3 : index
    %58 = vector.load %arg1[%c0_68, %c1_69, %c0_70, %c0_71, %c3_72] : memref<1x17x2x17x6xf32, #tpu.memory_space<vmem>>, vector<1x16x1x16x3xf32>
    %59 = vector.shape_cast %58 : vector<1x16x1x16x3xf32> to vector<16x16x3xf32>
    %60 = vector.shape_cast %59 : vector<16x16x3xf32> to vector<256x3xf32>
    %61 = arith.truncf %60 : vector<256x3xf32> to vector<256x3xbf16>
    %c2_73 = arith.constant 2 : index
    %c1_74 = arith.constant 1 : index
    %c0_75 = arith.constant 0 : index
    %c0_76 = arith.constant 0 : index
    %62 = vector.load %arg2[%c2_73, %c1_74, %c0_75, %c0_76] : memref<3x3x3x32xbf16, #tpu.memory_space<vmem>>, vector<1x1x3x32xbf16>
    %63 = vector.shape_cast %62 : vector<1x1x3x32xbf16> to vector<3x32xbf16>
    %cst_77 = arith.constant dense<0.000000e+00> : vector<256x32xf32>
    %64 = tpu.matmul %61, %63, %cst_77 {dimension_numbers = #tpu.dot_dimension_numbers<[1], [0], [0], [1], [0, 0, 1, 1], [], []>} : vector<256x3xbf16>, vector<3x32xbf16>, vector<256x32xf32> -> vector<256x32xf32>
    %65 = arith.addf %57, %64 : vector<256x32xf32>
    %c0_78 = arith.constant 0 : index
    %c1_79 = arith.constant 1 : index
    %c0_80 = arith.constant 0 : index
    %c1_81 = arith.constant 1 : index
    %c0_82 = arith.constant 0 : index
    %66 = vector.load %arg1[%c0_78, %c1_79, %c0_80, %c1_81, %c0_82] : memref<1x17x2x17x6xf32, #tpu.memory_space<vmem>>, vector<1x16x1x16x3xf32>
    %67 = vector.shape_cast %66 : vector<1x16x1x16x3xf32> to vector<16x16x3xf32>
    %68 = vector.shape_cast %67 : vector<16x16x3xf32> to vector<256x3xf32>
    %69 = arith.truncf %68 : vector<256x3xf32> to vector<256x3xbf16>
    %c2_83 = arith.constant 2 : index
    %c2_84 = arith.constant 2 : index
    %c0_85 = arith.constant 0 : index
    %c0_86 = arith.constant 0 : index
    %70 = vector.load %arg2[%c2_83, %c2_84, %c0_85, %c0_86] : memref<3x3x3x32xbf16, #tpu.memory_space<vmem>>, vector<1x1x3x32xbf16>
    %71 = vector.shape_cast %70 : vector<1x1x3x32xbf16> to vector<3x32xbf16>
    %cst_87 = arith.constant dense<0.000000e+00> : vector<256x32xf32>
    %72 = tpu.matmul %69, %71, %cst_87 {dimension_numbers = #tpu.dot_dimension_numbers<[1], [0], [0], [1], [0, 0, 1, 1], [], []>} : vector<256x3xbf16>, vector<3x32xbf16>, vector<256x32xf32> -> vector<256x32xf32>
    %73 = arith.addf %65, %72 : vector<256x32xf32>
    %74 = vector.broadcast %0 : vector<1x32xf32> to vector<256x32xf32>
    %75 = arith.addf %73, %74 : vector<256x32xf32>
    %cst_88 = arith.constant 0.000000e+00 : f32
    %76 = vector.broadcast %cst_88 : f32 to vector<256x32xf32>
    %77 = arith.maximumf %75, %76 : vector<256x32xf32>
    %c0_89 = arith.constant 0 : index
    %c0_90 = arith.constant 0 : index
    %c0_91 = arith.constant 0 : index
    %78 = vector.load %arg4[%c0_89, %c0_90, %c0_91] : memref<1x256x32xf32, #tpu.memory_space<vmem>>, vector<1x256x32xf32>
    %79 = vector.shape_cast %78 : vector<1x256x32xf32> to vector<256x32xf32>
    %80 = vector.shape_cast %77 : vector<256x32xf32> to vector<1x256x32xf32>
    tpu.vector_store %arg4[%c0_89, %c0_90, %c0_91], %80 {strides = array<i32>} : memref<1x256x32xf32, #tpu.memory_space<vmem>>, vector<1x256x32xf32>,
    return
  }
  func.func @transform_0(%arg0: i32) -> (i32, i32, i32, i32, i32) {
    %c0_i32 = arith.constant 0 : i32
    %c0_i32_0 = arith.constant 0 : i32
    %c0_i32_1 = arith.constant 0 : i32
    %c0_i32_2 = arith.constant 0 : i32
    %c0_i32_3 = arith.constant 0 : i32
    return %arg0, %c0_i32, %c0_i32_0, %c0_i32_1, %c0_i32_2 : i32, i32, i32, i32, i32
  }
  func.func @transform_1(%arg0: i32) -> (i32, i32, i32, i32) {
    %c0_i32 = arith.constant 0 : i32
    %c0_i32_0 = arith.constant 0 : i32
    %c0_i32_1 = arith.constant 0 : i32
    %c0_i32_2 = arith.constant 0 : i32
    %c0_i32_3 = arith.constant 0 : i32
    return %c0_i32, %c0_i32_0, %c0_i32_1, %c0_i32_2 : i32, i32, i32, i32
  }
  func.func @transform_2(%arg0: i32) -> (i32, i32) {
    %c0_i32 = arith.constant 0 : i32
    %c0_i32_0 = arith.constant 0 : i32
    %c0_i32_1 = arith.constant 0 : i32
    return %c0_i32, %c0_i32_0 : i32, i32
  }
  func.func @transform_3(%arg0: i32) -> (i32, i32, i32) {
    %c0_i32 = arith.constant 0 : i32
    %c0_i32_0 = arith.constant 0 : i32
    %c0_i32_1 = arith.constant 0 : i32
    return %arg0, %c0_i32, %c0_i32_0 : i32, i32, i32
  }
}

module attributes {stable_mosaic.version = 11 : i64} {
  func.func @_conv3x3s2_kernel(%arg0: i32, %arg1: memref<1x9x2x9x64xf32, #tpu.memory_space<vmem>>, %arg2: memref<3x3x32x64xbf16, #tpu.memory_space<vmem>>, %arg3: memref<1x64xf32, #tpu.memory_space<vmem>>, %arg4: memref<1x64x64xf32, #tpu.memory_space<vmem>>) attributes {dimension_semantics = [#tpu.dimension_semantics<parallel>], iteration_bounds = array<i64: 2>, scalar_prefetch = 0 : i64, scratch_operands = 0 : i64, tpu.core_type = #tpu.core_type<tc>, window_params = [{transform_indices = @transform_0, window_bounds = array<i64: 1, 9, 2, 9, 64>}, {pipeline_mode = #tpu.pipeline_mode<synchronous>, transform_indices = @transform_1, window_bounds = array<i64: 3, 3, 32, 64>}, {pipeline_mode = #tpu.pipeline_mode<synchronous>, transform_indices = @transform_2, window_bounds = array<i64: 1, 64>}, {transform_indices = @transform_3, window_bounds = array<i64: 1, 64, 64>}]} {
    %c0 = arith.constant 0 : index
    %c0_0 = arith.constant 0 : index
    %0 = vector.load %arg3[%c0, %c0_0] : memref<1x64xf32, #tpu.memory_space<vmem>>, vector<1x64xf32>
    %cst = arith.constant 0.000000e+00 : f32
    %1 = vector.broadcast %cst : f32 to vector<64x64xf32>
    %c0_1 = arith.constant 0 : index
    %c0_2 = arith.constant 0 : index
    %c0_3 = arith.constant 0 : index
    %c0_4 = arith.constant 0 : index
    %c0_5 = arith.constant 0 : index
    %2 = vector.load %arg1[%c0_1, %c0_2, %c0_3, %c0_4, %c0_5] : memref<1x9x2x9x64xf32, #tpu.memory_space<vmem>>, vector<1x8x1x8x32xf32>
    %3 = vector.shape_cast %2 : vector<1x8x1x8x32xf32> to vector<8x8x32xf32>
    %4 = vector.shape_cast %3 : vector<8x8x32xf32> to vector<64x32xf32>
    %5 = arith.truncf %4 : vector<64x32xf32> to vector<64x32xbf16>
    %c0_6 = arith.constant 0 : index
    %c0_7 = arith.constant 0 : index
    %c0_8 = arith.constant 0 : index
    %c0_9 = arith.constant 0 : index
    %6 = vector.load %arg2[%c0_6, %c0_7, %c0_8, %c0_9] : memref<3x3x32x64xbf16, #tpu.memory_space<vmem>>, vector<1x1x32x64xbf16>
    %7 = vector.shape_cast %6 : vector<1x1x32x64xbf16> to vector<32x64xbf16>
    %cst_10 = arith.constant dense<0.000000e+00> : vector<64x64xf32>
    %8 = tpu.matmul %5, %7, %cst_10 {dimension_numbers = #tpu.dot_dimension_numbers<[1], [0], [0], [1], [0, 0, 1, 1], [], []>} : vector<64x32xbf16>, vector<32x64xbf16>, vector<64x64xf32> -> vector<64x64xf32>
    %9 = arith.addf %1, %8 : vector<64x64xf32>
    %c0_11 = arith.constant 0 : index
    %c0_12 = arith.constant 0 : index
    %c0_13 = arith.constant 0 : index
    %c0_14 = arith.constant 0 : index
    %c32 = arith.constant 32 : index
    %10 = vector.load %arg1[%c0_11, %c0_12, %c0_13, %c0_14, %c32] : memref<1x9x2x9x64xf32, #tpu.memory_space<vmem>>, vector<1x8x1x8x32xf32>
    %11 = vector.shape_cast %10 : vector<1x8x1x8x32xf32> to vector<8x8x32xf32>
    %12 = vector.shape_cast %11 : vector<8x8x32xf32> to vector<64x32xf32>
    %13 = arith.truncf %12 : vector<64x32xf32> to vector<64x32xbf16>
    %c0_15 = arith.constant 0 : index
    %c1 = arith.constant 1 : index
    %c0_16 = arith.constant 0 : index
    %c0_17 = arith.constant 0 : index
    %14 = vector.load %arg2[%c0_15, %c1, %c0_16, %c0_17] : memref<3x3x32x64xbf16, #tpu.memory_space<vmem>>, vector<1x1x32x64xbf16>
    %15 = vector.shape_cast %14 : vector<1x1x32x64xbf16> to vector<32x64xbf16>
    %cst_18 = arith.constant dense<0.000000e+00> : vector<64x64xf32>
    %16 = tpu.matmul %13, %15, %cst_18 {dimension_numbers = #tpu.dot_dimension_numbers<[1], [0], [0], [1], [0, 0, 1, 1], [], []>} : vector<64x32xbf16>, vector<32x64xbf16>, vector<64x64xf32> -> vector<64x64xf32>
    %17 = arith.addf %9, %16 : vector<64x64xf32>
    %c0_19 = arith.constant 0 : index
    %c0_20 = arith.constant 0 : index
    %c0_21 = arith.constant 0 : index
    %c1_22 = arith.constant 1 : index
    %c0_23 = arith.constant 0 : index
    %18 = vector.load %arg1[%c0_19, %c0_20, %c0_21, %c1_22, %c0_23] : memref<1x9x2x9x64xf32, #tpu.memory_space<vmem>>, vector<1x8x1x8x32xf32>
    %19 = vector.shape_cast %18 : vector<1x8x1x8x32xf32> to vector<8x8x32xf32>
    %20 = vector.shape_cast %19 : vector<8x8x32xf32> to vector<64x32xf32>
    %21 = arith.truncf %20 : vector<64x32xf32> to vector<64x32xbf16>
    %c0_24 = arith.constant 0 : index
    %c2 = arith.constant 2 : index
    %c0_25 = arith.constant 0 : index
    %c0_26 = arith.constant 0 : index
    %22 = vector.load %arg2[%c0_24, %c2, %c0_25, %c0_26] : memref<3x3x32x64xbf16, #tpu.memory_space<vmem>>, vector<1x1x32x64xbf16>
    %23 = vector.shape_cast %22 : vector<1x1x32x64xbf16> to vector<32x64xbf16>
    %cst_27 = arith.constant dense<0.000000e+00> : vector<64x64xf32>
    %24 = tpu.matmul %21, %23, %cst_27 {dimension_numbers = #tpu.dot_dimension_numbers<[1], [0], [0], [1], [0, 0, 1, 1], [], []>} : vector<64x32xbf16>, vector<32x64xbf16>, vector<64x64xf32> -> vector<64x64xf32>
    %25 = arith.addf %17, %24 : vector<64x64xf32>
    %c0_28 = arith.constant 0 : index
    %c0_29 = arith.constant 0 : index
    %c1_30 = arith.constant 1 : index
    %c0_31 = arith.constant 0 : index
    %c0_32 = arith.constant 0 : index
    %26 = vector.load %arg1[%c0_28, %c0_29, %c1_30, %c0_31, %c0_32] : memref<1x9x2x9x64xf32, #tpu.memory_space<vmem>>, vector<1x8x1x8x32xf32>
    %27 = vector.shape_cast %26 : vector<1x8x1x8x32xf32> to vector<8x8x32xf32>
    %28 = vector.shape_cast %27 : vector<8x8x32xf32> to vector<64x32xf32>
    %29 = arith.truncf %28 : vector<64x32xf32> to vector<64x32xbf16>
    %c1_33 = arith.constant 1 : index
    %c0_34 = arith.constant 0 : index
    %c0_35 = arith.constant 0 : index
    %c0_36 = arith.constant 0 : index
    %30 = vector.load %arg2[%c1_33, %c0_34, %c0_35, %c0_36] : memref<3x3x32x64xbf16, #tpu.memory_space<vmem>>, vector<1x1x32x64xbf16>
    %31 = vector.shape_cast %30 : vector<1x1x32x64xbf16> to vector<32x64xbf16>
    %cst_37 = arith.constant dense<0.000000e+00> : vector<64x64xf32>
    %32 = tpu.matmul %29, %31, %cst_37 {dimension_numbers = #tpu.dot_dimension_numbers<[1], [0], [0], [1], [0, 0, 1, 1], [], []>} : vector<64x32xbf16>, vector<32x64xbf16>, vector<64x64xf32> -> vector<64x64xf32>
    %33 = arith.addf %25, %32 : vector<64x64xf32>
    %c0_38 = arith.constant 0 : index
    %c0_39 = arith.constant 0 : index
    %c1_40 = arith.constant 1 : index
    %c0_41 = arith.constant 0 : index
    %c32_42 = arith.constant 32 : index
    %34 = vector.load %arg1[%c0_38, %c0_39, %c1_40, %c0_41, %c32_42] : memref<1x9x2x9x64xf32, #tpu.memory_space<vmem>>, vector<1x8x1x8x32xf32>
    %35 = vector.shape_cast %34 : vector<1x8x1x8x32xf32> to vector<8x8x32xf32>
    %36 = vector.shape_cast %35 : vector<8x8x32xf32> to vector<64x32xf32>
    %37 = arith.truncf %36 : vector<64x32xf32> to vector<64x32xbf16>
    %c1_43 = arith.constant 1 : index
    %c1_44 = arith.constant 1 : index
    %c0_45 = arith.constant 0 : index
    %c0_46 = arith.constant 0 : index
    %38 = vector.load %arg2[%c1_43, %c1_44, %c0_45, %c0_46] : memref<3x3x32x64xbf16, #tpu.memory_space<vmem>>, vector<1x1x32x64xbf16>
    %39 = vector.shape_cast %38 : vector<1x1x32x64xbf16> to vector<32x64xbf16>
    %cst_47 = arith.constant dense<0.000000e+00> : vector<64x64xf32>
    %40 = tpu.matmul %37, %39, %cst_47 {dimension_numbers = #tpu.dot_dimension_numbers<[1], [0], [0], [1], [0, 0, 1, 1], [], []>} : vector<64x32xbf16>, vector<32x64xbf16>, vector<64x64xf32> -> vector<64x64xf32>
    %41 = arith.addf %33, %40 : vector<64x64xf32>
    %c0_48 = arith.constant 0 : index
    %c0_49 = arith.constant 0 : index
    %c1_50 = arith.constant 1 : index
    %c1_51 = arith.constant 1 : index
    %c0_52 = arith.constant 0 : index
    %42 = vector.load %arg1[%c0_48, %c0_49, %c1_50, %c1_51, %c0_52] : memref<1x9x2x9x64xf32, #tpu.memory_space<vmem>>, vector<1x8x1x8x32xf32>
    %43 = vector.shape_cast %42 : vector<1x8x1x8x32xf32> to vector<8x8x32xf32>
    %44 = vector.shape_cast %43 : vector<8x8x32xf32> to vector<64x32xf32>
    %45 = arith.truncf %44 : vector<64x32xf32> to vector<64x32xbf16>
    %c1_53 = arith.constant 1 : index
    %c2_54 = arith.constant 2 : index
    %c0_55 = arith.constant 0 : index
    %c0_56 = arith.constant 0 : index
    %46 = vector.load %arg2[%c1_53, %c2_54, %c0_55, %c0_56] : memref<3x3x32x64xbf16, #tpu.memory_space<vmem>>, vector<1x1x32x64xbf16>
    %47 = vector.shape_cast %46 : vector<1x1x32x64xbf16> to vector<32x64xbf16>
    %cst_57 = arith.constant dense<0.000000e+00> : vector<64x64xf32>
    %48 = tpu.matmul %45, %47, %cst_57 {dimension_numbers = #tpu.dot_dimension_numbers<[1], [0], [0], [1], [0, 0, 1, 1], [], []>} : vector<64x32xbf16>, vector<32x64xbf16>, vector<64x64xf32> -> vector<64x64xf32>
    %49 = arith.addf %41, %48 : vector<64x64xf32>
    %c0_58 = arith.constant 0 : index
    %c1_59 = arith.constant 1 : index
    %c0_60 = arith.constant 0 : index
    %c0_61 = arith.constant 0 : index
    %c0_62 = arith.constant 0 : index
    %50 = vector.load %arg1[%c0_58, %c1_59, %c0_60, %c0_61, %c0_62] : memref<1x9x2x9x64xf32, #tpu.memory_space<vmem>>, vector<1x8x1x8x32xf32>
    %51 = vector.shape_cast %50 : vector<1x8x1x8x32xf32> to vector<8x8x32xf32>
    %52 = vector.shape_cast %51 : vector<8x8x32xf32> to vector<64x32xf32>
    %53 = arith.truncf %52 : vector<64x32xf32> to vector<64x32xbf16>
    %c2_63 = arith.constant 2 : index
    %c0_64 = arith.constant 0 : index
    %c0_65 = arith.constant 0 : index
    %c0_66 = arith.constant 0 : index
    %54 = vector.load %arg2[%c2_63, %c0_64, %c0_65, %c0_66] : memref<3x3x32x64xbf16, #tpu.memory_space<vmem>>, vector<1x1x32x64xbf16>
    %55 = vector.shape_cast %54 : vector<1x1x32x64xbf16> to vector<32x64xbf16>
    %cst_67 = arith.constant dense<0.000000e+00> : vector<64x64xf32>
    %56 = tpu.matmul %53, %55, %cst_67 {dimension_numbers = #tpu.dot_dimension_numbers<[1], [0], [0], [1], [0, 0, 1, 1], [], []>} : vector<64x32xbf16>, vector<32x64xbf16>, vector<64x64xf32> -> vector<64x64xf32>
    %57 = arith.addf %49, %56 : vector<64x64xf32>
    %c0_68 = arith.constant 0 : index
    %c1_69 = arith.constant 1 : index
    %c0_70 = arith.constant 0 : index
    %c0_71 = arith.constant 0 : index
    %c32_72 = arith.constant 32 : index
    %58 = vector.load %arg1[%c0_68, %c1_69, %c0_70, %c0_71, %c32_72] : memref<1x9x2x9x64xf32, #tpu.memory_space<vmem>>, vector<1x8x1x8x32xf32>
    %59 = vector.shape_cast %58 : vector<1x8x1x8x32xf32> to vector<8x8x32xf32>
    %60 = vector.shape_cast %59 : vector<8x8x32xf32> to vector<64x32xf32>
    %61 = arith.truncf %60 : vector<64x32xf32> to vector<64x32xbf16>
    %c2_73 = arith.constant 2 : index
    %c1_74 = arith.constant 1 : index
    %c0_75 = arith.constant 0 : index
    %c0_76 = arith.constant 0 : index
    %62 = vector.load %arg2[%c2_73, %c1_74, %c0_75, %c0_76] : memref<3x3x32x64xbf16, #tpu.memory_space<vmem>>, vector<1x1x32x64xbf16>
    %63 = vector.shape_cast %62 : vector<1x1x32x64xbf16> to vector<32x64xbf16>
    %cst_77 = arith.constant dense<0.000000e+00> : vector<64x64xf32>
    %64 = tpu.matmul %61, %63, %cst_77 {dimension_numbers = #tpu.dot_dimension_numbers<[1], [0], [0], [1], [0, 0, 1, 1], [], []>} : vector<64x32xbf16>, vector<32x64xbf16>, vector<64x64xf32> -> vector<64x64xf32>
    %65 = arith.addf %57, %64 : vector<64x64xf32>
    %c0_78 = arith.constant 0 : index
    %c1_79 = arith.constant 1 : index
    %c0_80 = arith.constant 0 : index
    %c1_81 = arith.constant 1 : index
    %c0_82 = arith.constant 0 : index
    %66 = vector.load %arg1[%c0_78, %c1_79, %c0_80, %c1_81, %c0_82] : memref<1x9x2x9x64xf32, #tpu.memory_space<vmem>>, vector<1x8x1x8x32xf32>
    %67 = vector.shape_cast %66 : vector<1x8x1x8x32xf32> to vector<8x8x32xf32>
    %68 = vector.shape_cast %67 : vector<8x8x32xf32> to vector<64x32xf32>
    %69 = arith.truncf %68 : vector<64x32xf32> to vector<64x32xbf16>
    %c2_83 = arith.constant 2 : index
    %c2_84 = arith.constant 2 : index
    %c0_85 = arith.constant 0 : index
    %c0_86 = arith.constant 0 : index
    %70 = vector.load %arg2[%c2_83, %c2_84, %c0_85, %c0_86] : memref<3x3x32x64xbf16, #tpu.memory_space<vmem>>, vector<1x1x32x64xbf16>
    %71 = vector.shape_cast %70 : vector<1x1x32x64xbf16> to vector<32x64xbf16>
    %cst_87 = arith.constant dense<0.000000e+00> : vector<64x64xf32>
    %72 = tpu.matmul %69, %71, %cst_87 {dimension_numbers = #tpu.dot_dimension_numbers<[1], [0], [0], [1], [0, 0, 1, 1], [], []>} : vector<64x32xbf16>, vector<32x64xbf16>, vector<64x64xf32> -> vector<64x64xf32>
    %73 = arith.addf %65, %72 : vector<64x64xf32>
    %74 = vector.broadcast %0 : vector<1x64xf32> to vector<64x64xf32>
    %75 = arith.addf %73, %74 : vector<64x64xf32>
    %cst_88 = arith.constant 0.000000e+00 : f32
    %76 = vector.broadcast %cst_88 : f32 to vector<64x64xf32>
    %77 = arith.maximumf %75, %76 : vector<64x64xf32>
    %c0_89 = arith.constant 0 : index
    %c0_90 = arith.constant 0 : index
    %c0_91 = arith.constant 0 : index
    %78 = vector.load %arg4[%c0_89, %c0_90, %c0_91] : memref<1x64x64xf32, #tpu.memory_space<vmem>>, vector<1x64x64xf32>
    %79 = vector.shape_cast %78 : vector<1x64x64xf32> to vector<64x64xf32>
    %80 = vector.shape_cast %77 : vector<64x64xf32> to vector<1x64x64xf32>
    tpu.vector_store %arg4[%c0_89, %c0_90, %c0_91], %80 {strides = array<i32>} : memref<1x64x64xf32, #tpu.memory_space<vmem>>, vector<1x64x64xf32>,
    return
  }
  func.func @transform_0(%arg0: i32) -> (i32, i32, i32, i32, i32) {
    %c0_i32 = arith.constant 0 : i32
    %c0_i32_0 = arith.constant 0 : i32
    %c0_i32_1 = arith.constant 0 : i32
    %c0_i32_2 = arith.constant 0 : i32
    %c0_i32_3 = arith.constant 0 : i32
    return %arg0, %c0_i32, %c0_i32_0, %c0_i32_1, %c0_i32_2 : i32, i32, i32, i32, i32
  }
  func.func @transform_1(%arg0: i32) -> (i32, i32, i32, i32) {
    %c0_i32 = arith.constant 0 : i32
    %c0_i32_0 = arith.constant 0 : i32
    %c0_i32_1 = arith.constant 0 : i32
    %c0_i32_2 = arith.constant 0 : i32
    %c0_i32_3 = arith.constant 0 : i32
    return %c0_i32, %c0_i32_0, %c0_i32_1, %c0_i32_2 : i32, i32, i32, i32
  }
  func.func @transform_2(%arg0: i32) -> (i32, i32) {
    %c0_i32 = arith.constant 0 : i32
    %c0_i32_0 = arith.constant 0 : i32
    %c0_i32_1 = arith.constant 0 : i32
    return %c0_i32, %c0_i32_0 : i32, i32
  }
  func.func @transform_3(%arg0: i32) -> (i32, i32, i32) {
    %c0_i32 = arith.constant 0 : i32
    %c0_i32_0 = arith.constant 0 : i32
    %c0_i32_1 = arith.constant 0 : i32
    return %arg0, %c0_i32, %c0_i32_0 : i32, i32, i32
  }
}

module attributes {stable_mosaic.version = 11 : i64} {
  func.func @_conv3x3s2_kernel(%arg0: i32, %arg1: memref<1x5x2x5x128xf32, #tpu.memory_space<vmem>>, %arg2: memref<3x3x64x128xbf16, #tpu.memory_space<vmem>>, %arg3: memref<1x128xf32, #tpu.memory_space<vmem>>, %arg4: memref<1x16x128xf32, #tpu.memory_space<vmem>>) attributes {dimension_semantics = [#tpu.dimension_semantics<parallel>], iteration_bounds = array<i64: 2>, scalar_prefetch = 0 : i64, scratch_operands = 0 : i64, tpu.core_type = #tpu.core_type<tc>, window_params = [{transform_indices = @transform_0, window_bounds = array<i64: 1, 5, 2, 5, 128>}, {pipeline_mode = #tpu.pipeline_mode<synchronous>, transform_indices = @transform_1, window_bounds = array<i64: 3, 3, 64, 128>}, {pipeline_mode = #tpu.pipeline_mode<synchronous>, transform_indices = @transform_2, window_bounds = array<i64: 1, 128>}, {transform_indices = @transform_3, window_bounds = array<i64: 1, 16, 128>}]} {
    %c0 = arith.constant 0 : index
    %c0_0 = arith.constant 0 : index
    %0 = vector.load %arg3[%c0, %c0_0] : memref<1x128xf32, #tpu.memory_space<vmem>>, vector<1x128xf32>
    %cst = arith.constant 0.000000e+00 : f32
    %1 = vector.broadcast %cst : f32 to vector<4x128xf32>
    %c0_1 = arith.constant 0 : index
    %c0_2 = arith.constant 0 : index
    %c0_3 = arith.constant 0 : index
    %c0_4 = arith.constant 0 : index
    %c0_5 = arith.constant 0 : index
    %2 = vector.load %arg1[%c0_1, %c0_2, %c0_3, %c0_4, %c0_5] : memref<1x5x2x5x128xf32, #tpu.memory_space<vmem>>, vector<1x1x1x4x64xf32>
    %3 = vector.shape_cast %2 : vector<1x1x1x4x64xf32> to vector<4x64xf32>
    %4 = arith.truncf %3 : vector<4x64xf32> to vector<4x64xbf16>
    %c0_6 = arith.constant 0 : index
    %c0_7 = arith.constant 0 : index
    %c0_8 = arith.constant 0 : index
    %c0_9 = arith.constant 0 : index
    %5 = vector.load %arg2[%c0_6, %c0_7, %c0_8, %c0_9] : memref<3x3x64x128xbf16, #tpu.memory_space<vmem>>, vector<1x1x64x128xbf16>
    %6 = vector.shape_cast %5 : vector<1x1x64x128xbf16> to vector<64x128xbf16>
    %cst_10 = arith.constant dense<0.000000e+00> : vector<4x128xf32>
    %7 = tpu.matmul %4, %6, %cst_10 {dimension_numbers = #tpu.dot_dimension_numbers<[1], [0], [0], [1], [0, 0, 1, 1], [], []>} : vector<4x64xbf16>, vector<64x128xbf16>, vector<4x128xf32> -> vector<4x128xf32>
    %8 = arith.addf %1, %7 : vector<4x128xf32>
    %c0_11 = arith.constant 0 : index
    %c0_12 = arith.constant 0 : index
    %c0_13 = arith.constant 0 : index
    %c0_14 = arith.constant 0 : index
    %c64 = arith.constant 64 : index
    %9 = vector.load %arg1[%c0_11, %c0_12, %c0_13, %c0_14, %c64] : memref<1x5x2x5x128xf32, #tpu.memory_space<vmem>>, vector<1x1x1x4x64xf32>
    %10 = vector.shape_cast %9 : vector<1x1x1x4x64xf32> to vector<4x64xf32>
    %11 = arith.truncf %10 : vector<4x64xf32> to vector<4x64xbf16>
    %c0_15 = arith.constant 0 : index
    %c1 = arith.constant 1 : index
    %c0_16 = arith.constant 0 : index
    %c0_17 = arith.constant 0 : index
    %12 = vector.load %arg2[%c0_15, %c1, %c0_16, %c0_17] : memref<3x3x64x128xbf16, #tpu.memory_space<vmem>>, vector<1x1x64x128xbf16>
    %13 = vector.shape_cast %12 : vector<1x1x64x128xbf16> to vector<64x128xbf16>
    %cst_18 = arith.constant dense<0.000000e+00> : vector<4x128xf32>
    %14 = tpu.matmul %11, %13, %cst_18 {dimension_numbers = #tpu.dot_dimension_numbers<[1], [0], [0], [1], [0, 0, 1, 1], [], []>} : vector<4x64xbf16>, vector<64x128xbf16>, vector<4x128xf32> -> vector<4x128xf32>
    %15 = arith.addf %8, %14 : vector<4x128xf32>
    %c0_19 = arith.constant 0 : index
    %c0_20 = arith.constant 0 : index
    %c0_21 = arith.constant 0 : index
    %c1_22 = arith.constant 1 : index
    %c0_23 = arith.constant 0 : index
    %16 = vector.load %arg1[%c0_19, %c0_20, %c0_21, %c1_22, %c0_23] : memref<1x5x2x5x128xf32, #tpu.memory_space<vmem>>, vector<1x1x1x4x64xf32>
    %17 = vector.shape_cast %16 : vector<1x1x1x4x64xf32> to vector<4x64xf32>
    %18 = arith.truncf %17 : vector<4x64xf32> to vector<4x64xbf16>
    %c0_24 = arith.constant 0 : index
    %c2 = arith.constant 2 : index
    %c0_25 = arith.constant 0 : index
    %c0_26 = arith.constant 0 : index
    %19 = vector.load %arg2[%c0_24, %c2, %c0_25, %c0_26] : memref<3x3x64x128xbf16, #tpu.memory_space<vmem>>, vector<1x1x64x128xbf16>
    %20 = vector.shape_cast %19 : vector<1x1x64x128xbf16> to vector<64x128xbf16>
    %cst_27 = arith.constant dense<0.000000e+00> : vector<4x128xf32>
    %21 = tpu.matmul %18, %20, %cst_27 {dimension_numbers = #tpu.dot_dimension_numbers<[1], [0], [0], [1], [0, 0, 1, 1], [], []>} : vector<4x64xbf16>, vector<64x128xbf16>, vector<4x128xf32> -> vector<4x128xf32>
    %22 = arith.addf %15, %21 : vector<4x128xf32>
    %c0_28 = arith.constant 0 : index
    %c0_29 = arith.constant 0 : index
    %c1_30 = arith.constant 1 : index
    %c0_31 = arith.constant 0 : index
    %c0_32 = arith.constant 0 : index
    %23 = vector.load %arg1[%c0_28, %c0_29, %c1_30, %c0_31, %c0_32] : memref<1x5x2x5x128xf32, #tpu.memory_space<vmem>>, vector<1x1x1x4x64xf32>
    %24 = vector.shape_cast %23 : vector<1x1x1x4x64xf32> to vector<4x64xf32>
    %25 = arith.truncf %24 : vector<4x64xf32> to vector<4x64xbf16>
    %c1_33 = arith.constant 1 : index
    %c0_34 = arith.constant 0 : index
    %c0_35 = arith.constant 0 : index
    %c0_36 = arith.constant 0 : index
    %26 = vector.load %arg2[%c1_33, %c0_34, %c0_35, %c0_36] : memref<3x3x64x128xbf16, #tpu.memory_space<vmem>>, vector<1x1x64x128xbf16>
    %27 = vector.shape_cast %26 : vector<1x1x64x128xbf16> to vector<64x128xbf16>
    %cst_37 = arith.constant dense<0.000000e+00> : vector<4x128xf32>
    %28 = tpu.matmul %25, %27, %cst_37 {dimension_numbers = #tpu.dot_dimension_numbers<[1], [0], [0], [1], [0, 0, 1, 1], [], []>} : vector<4x64xbf16>, vector<64x128xbf16>, vector<4x128xf32> -> vector<4x128xf32>
    %29 = arith.addf %22, %28 : vector<4x128xf32>
    %c0_38 = arith.constant 0 : index
    %c0_39 = arith.constant 0 : index
    %c1_40 = arith.constant 1 : index
    %c0_41 = arith.constant 0 : index
    %c64_42 = arith.constant 64 : index
    %30 = vector.load %arg1[%c0_38, %c0_39, %c1_40, %c0_41, %c64_42] : memref<1x5x2x5x128xf32, #tpu.memory_space<vmem>>, vector<1x1x1x4x64xf32>
    %31 = vector.shape_cast %30 : vector<1x1x1x4x64xf32> to vector<4x64xf32>
    %32 = arith.truncf %31 : vector<4x64xf32> to vector<4x64xbf16>
    %c1_43 = arith.constant 1 : index
    %c1_44 = arith.constant 1 : index
    %c0_45 = arith.constant 0 : index
    %c0_46 = arith.constant 0 : index
    %33 = vector.load %arg2[%c1_43, %c1_44, %c0_45, %c0_46] : memref<3x3x64x128xbf16, #tpu.memory_space<vmem>>, vector<1x1x64x128xbf16>
    %34 = vector.shape_cast %33 : vector<1x1x64x128xbf16> to vector<64x128xbf16>
    %cst_47 = arith.constant dense<0.000000e+00> : vector<4x128xf32>
    %35 = tpu.matmul %32, %34, %cst_47 {dimension_numbers = #tpu.dot_dimension_numbers<[1], [0], [0], [1], [0, 0, 1, 1], [], []>} : vector<4x64xbf16>, vector<64x128xbf16>, vector<4x128xf32> -> vector<4x128xf32>
    %36 = arith.addf %29, %35 : vector<4x128xf32>
    %c0_48 = arith.constant 0 : index
    %c0_49 = arith.constant 0 : index
    %c1_50 = arith.constant 1 : index
    %c1_51 = arith.constant 1 : index
    %c0_52 = arith.constant 0 : index
    %37 = vector.load %arg1[%c0_48, %c0_49, %c1_50, %c1_51, %c0_52] : memref<1x5x2x5x128xf32, #tpu.memory_space<vmem>>, vector<1x1x1x4x64xf32>
    %38 = vector.shape_cast %37 : vector<1x1x1x4x64xf32> to vector<4x64xf32>
    %39 = arith.truncf %38 : vector<4x64xf32> to vector<4x64xbf16>
    %c1_53 = arith.constant 1 : index
    %c2_54 = arith.constant 2 : index
    %c0_55 = arith.constant 0 : index
    %c0_56 = arith.constant 0 : index
    %40 = vector.load %arg2[%c1_53, %c2_54, %c0_55, %c0_56] : memref<3x3x64x128xbf16, #tpu.memory_space<vmem>>, vector<1x1x64x128xbf16>
    %41 = vector.shape_cast %40 : vector<1x1x64x128xbf16> to vector<64x128xbf16>
    %cst_57 = arith.constant dense<0.000000e+00> : vector<4x128xf32>
    %42 = tpu.matmul %39, %41, %cst_57 {dimension_numbers = #tpu.dot_dimension_numbers<[1], [0], [0], [1], [0, 0, 1, 1], [], []>} : vector<4x64xbf16>, vector<64x128xbf16>, vector<4x128xf32> -> vector<4x128xf32>
    %43 = arith.addf %36, %42 : vector<4x128xf32>
    %c0_58 = arith.constant 0 : index
    %c1_59 = arith.constant 1 : index
    %c0_60 = arith.constant 0 : index
    %c0_61 = arith.constant 0 : index
    %c0_62 = arith.constant 0 : index
    %44 = vector.load %arg1[%c0_58, %c1_59, %c0_60, %c0_61, %c0_62] : memref<1x5x2x5x128xf32, #tpu.memory_space<vmem>>, vector<1x1x1x4x64xf32>
    %45 = vector.shape_cast %44 : vector<1x1x1x4x64xf32> to vector<4x64xf32>
    %46 = arith.truncf %45 : vector<4x64xf32> to vector<4x64xbf16>
    %c2_63 = arith.constant 2 : index
    %c0_64 = arith.constant 0 : index
    %c0_65 = arith.constant 0 : index
    %c0_66 = arith.constant 0 : index
    %47 = vector.load %arg2[%c2_63, %c0_64, %c0_65, %c0_66] : memref<3x3x64x128xbf16, #tpu.memory_space<vmem>>, vector<1x1x64x128xbf16>
    %48 = vector.shape_cast %47 : vector<1x1x64x128xbf16> to vector<64x128xbf16>
    %cst_67 = arith.constant dense<0.000000e+00> : vector<4x128xf32>
    %49 = tpu.matmul %46, %48, %cst_67 {dimension_numbers = #tpu.dot_dimension_numbers<[1], [0], [0], [1], [0, 0, 1, 1], [], []>} : vector<4x64xbf16>, vector<64x128xbf16>, vector<4x128xf32> -> vector<4x128xf32>
    %50 = arith.addf %43, %49 : vector<4x128xf32>
    %c0_68 = arith.constant 0 : index
    %c1_69 = arith.constant 1 : index
    %c0_70 = arith.constant 0 : index
    %c0_71 = arith.constant 0 : index
    %c64_72 = arith.constant 64 : index
    %51 = vector.load %arg1[%c0_68, %c1_69, %c0_70, %c0_71, %c64_72] : memref<1x5x2x5x128xf32, #tpu.memory_space<vmem>>, vector<1x1x1x4x64xf32>
    %52 = vector.shape_cast %51 : vector<1x1x1x4x64xf32> to vector<4x64xf32>
    %53 = arith.truncf %52 : vector<4x64xf32> to vector<4x64xbf16>
    %c2_73 = arith.constant 2 : index
    %c1_74 = arith.constant 1 : index
    %c0_75 = arith.constant 0 : index
    %c0_76 = arith.constant 0 : index
    %54 = vector.load %arg2[%c2_73, %c1_74, %c0_75, %c0_76] : memref<3x3x64x128xbf16, #tpu.memory_space<vmem>>, vector<1x1x64x128xbf16>
    %55 = vector.shape_cast %54 : vector<1x1x64x128xbf16> to vector<64x128xbf16>
    %cst_77 = arith.constant dense<0.000000e+00> : vector<4x128xf32>
    %56 = tpu.matmul %53, %55, %cst_77 {dimension_numbers = #tpu.dot_dimension_numbers<[1], [0], [0], [1], [0, 0, 1, 1], [], []>} : vector<4x64xbf16>, vector<64x128xbf16>, vector<4x128xf32> -> vector<4x128xf32>
    %57 = arith.addf %50, %56 : vector<4x128xf32>
    %c0_78 = arith.constant 0 : index
    %c1_79 = arith.constant 1 : index
    %c0_80 = arith.constant 0 : index
    %c1_81 = arith.constant 1 : index
    %c0_82 = arith.constant 0 : index
    %58 = vector.load %arg1[%c0_78, %c1_79, %c0_80, %c1_81, %c0_82] : memref<1x5x2x5x128xf32, #tpu.memory_space<vmem>>, vector<1x1x1x4x64xf32>
    %59 = vector.shape_cast %58 : vector<1x1x1x4x64xf32> to vector<4x64xf32>
    %60 = arith.truncf %59 : vector<4x64xf32> to vector<4x64xbf16>
    %c2_83 = arith.constant 2 : index
    %c2_84 = arith.constant 2 : index
    %c0_85 = arith.constant 0 : index
    %c0_86 = arith.constant 0 : index
    %61 = vector.load %arg2[%c2_83, %c2_84, %c0_85, %c0_86] : memref<3x3x64x128xbf16, #tpu.memory_space<vmem>>, vector<1x1x64x128xbf16>
    %62 = vector.shape_cast %61 : vector<1x1x64x128xbf16> to vector<64x128xbf16>
    %cst_87 = arith.constant dense<0.000000e+00> : vector<4x128xf32>
    %63 = tpu.matmul %60, %62, %cst_87 {dimension_numbers = #tpu.dot_dimension_numbers<[1], [0], [0], [1], [0, 0, 1, 1], [], []>} : vector<4x64xbf16>, vector<64x128xbf16>, vector<4x128xf32> -> vector<4x128xf32>
    %64 = arith.addf %57, %63 : vector<4x128xf32>
    %65 = vector.broadcast %0 : vector<1x128xf32> to vector<4x128xf32>
    %66 = arith.addf %64, %65 : vector<4x128xf32>
    %cst_88 = arith.constant 0.000000e+00 : f32
    %67 = vector.broadcast %cst_88 : f32 to vector<4x128xf32>
    %68 = arith.maximumf %66, %67 : vector<4x128xf32>
    %c0_89 = arith.constant 0 : index
    %c0_90 = arith.constant 0 : index
    %c0_91 = arith.constant 0 : index
    %69 = vector.load %arg4[%c0_89, %c0_90, %c0_91] : memref<1x16x128xf32, #tpu.memory_space<vmem>>, vector<1x4x128xf32>
    %70 = vector.shape_cast %69 : vector<1x4x128xf32> to vector<4x128xf32>
    %71 = vector.shape_cast %68 : vector<4x128xf32> to vector<1x4x128xf32>
    tpu.vector_store %arg4[%c0_89, %c0_90, %c0_91], %71 {strides = array<i32>} : memref<1x16x128xf32, #tpu.memory_space<vmem>>, vector<1x4x128xf32>,
    %cst_92 = arith.constant 0.000000e+00 : f32
    %72 = vector.broadcast %cst_92 : f32 to vector<4x128xf32>
    %c0_93 = arith.constant 0 : index
    %c1_94 = arith.constant 1 : index
    %c0_95 = arith.constant 0 : index
    %c0_96 = arith.constant 0 : index
    %c0_97 = arith.constant 0 : index
    %73 = vector.load %arg1[%c0_93, %c1_94, %c0_95, %c0_96, %c0_97] : memref<1x5x2x5x128xf32, #tpu.memory_space<vmem>>, vector<1x1x1x4x64xf32>
    %74 = vector.shape_cast %73 : vector<1x1x1x4x64xf32> to vector<4x64xf32>
    %75 = arith.truncf %74 : vector<4x64xf32> to vector<4x64xbf16>
    %c0_98 = arith.constant 0 : index
    %c0_99 = arith.constant 0 : index
    %c0_100 = arith.constant 0 : index
    %c0_101 = arith.constant 0 : index
    %76 = vector.load %arg2[%c0_98, %c0_99, %c0_100, %c0_101] : memref<3x3x64x128xbf16, #tpu.memory_space<vmem>>, vector<1x1x64x128xbf16>
    %77 = vector.shape_cast %76 : vector<1x1x64x128xbf16> to vector<64x128xbf16>
    %cst_102 = arith.constant dense<0.000000e+00> : vector<4x128xf32>
    %78 = tpu.matmul %75, %77, %cst_102 {dimension_numbers = #tpu.dot_dimension_numbers<[1], [0], [0], [1], [0, 0, 1, 1], [], []>} : vector<4x64xbf16>, vector<64x128xbf16>, vector<4x128xf32> -> vector<4x128xf32>
    %79 = arith.addf %72, %78 : vector<4x128xf32>
    %c0_103 = arith.constant 0 : index
    %c1_104 = arith.constant 1 : index
    %c0_105 = arith.constant 0 : index
    %c0_106 = arith.constant 0 : index
    %c64_107 = arith.constant 64 : index
    %80 = vector.load %arg1[%c0_103, %c1_104, %c0_105, %c0_106, %c64_107] : memref<1x5x2x5x128xf32, #tpu.memory_space<vmem>>, vector<1x1x1x4x64xf32>
    %81 = vector.shape_cast %80 : vector<1x1x1x4x64xf32> to vector<4x64xf32>
    %82 = arith.truncf %81 : vector<4x64xf32> to vector<4x64xbf16>
    %c0_108 = arith.constant 0 : index
    %c1_109 = arith.constant 1 : index
    %c0_110 = arith.constant 0 : index
    %c0_111 = arith.constant 0 : index
    %83 = vector.load %arg2[%c0_108, %c1_109, %c0_110, %c0_111] : memref<3x3x64x128xbf16, #tpu.memory_space<vmem>>, vector<1x1x64x128xbf16>
    %84 = vector.shape_cast %83 : vector<1x1x64x128xbf16> to vector<64x128xbf16>
    %cst_112 = arith.constant dense<0.000000e+00> : vector<4x128xf32>
    %85 = tpu.matmul %82, %84, %cst_112 {dimension_numbers = #tpu.dot_dimension_numbers<[1], [0], [0], [1], [0, 0, 1, 1], [], []>} : vector<4x64xbf16>, vector<64x128xbf16>, vector<4x128xf32> -> vector<4x128xf32>
    %86 = arith.addf %79, %85 : vector<4x128xf32>
    %c0_113 = arith.constant 0 : index
    %c1_114 = arith.constant 1 : index
    %c0_115 = arith.constant 0 : index
    %c1_116 = arith.constant 1 : index
    %c0_117 = arith.constant 0 : index
    %87 = vector.load %arg1[%c0_113, %c1_114, %c0_115, %c1_116, %c0_117] : memref<1x5x2x5x128xf32, #tpu.memory_space<vmem>>, vector<1x1x1x4x64xf32>
    %88 = vector.shape_cast %87 : vector<1x1x1x4x64xf32> to vector<4x64xf32>
    %89 = arith.truncf %88 : vector<4x64xf32> to vector<4x64xbf16>
    %c0_118 = arith.constant 0 : index
    %c2_119 = arith.constant 2 : index
    %c0_120 = arith.constant 0 : index
    %c0_121 = arith.constant 0 : index
    %90 = vector.load %arg2[%c0_118, %c2_119, %c0_120, %c0_121] : memref<3x3x64x128xbf16, #tpu.memory_space<vmem>>, vector<1x1x64x128xbf16>
    %91 = vector.shape_cast %90 : vector<1x1x64x128xbf16> to vector<64x128xbf16>
    %cst_122 = arith.constant dense<0.000000e+00> : vector<4x128xf32>
    %92 = tpu.matmul %89, %91, %cst_122 {dimension_numbers = #tpu.dot_dimension_numbers<[1], [0], [0], [1], [0, 0, 1, 1], [], []>} : vector<4x64xbf16>, vector<64x128xbf16>, vector<4x128xf32> -> vector<4x128xf32>
    %93 = arith.addf %86, %92 : vector<4x128xf32>
    %c0_123 = arith.constant 0 : index
    %c1_124 = arith.constant 1 : index
    %c1_125 = arith.constant 1 : index
    %c0_126 = arith.constant 0 : index
    %c0_127 = arith.constant 0 : index
    %94 = vector.load %arg1[%c0_123, %c1_124, %c1_125, %c0_126, %c0_127] : memref<1x5x2x5x128xf32, #tpu.memory_space<vmem>>, vector<1x1x1x4x64xf32>
    %95 = vector.shape_cast %94 : vector<1x1x1x4x64xf32> to vector<4x64xf32>
    %96 = arith.truncf %95 : vector<4x64xf32> to vector<4x64xbf16>
    %c1_128 = arith.constant 1 : index
    %c0_129 = arith.constant 0 : index
    %c0_130 = arith.constant 0 : index
    %c0_131 = arith.constant 0 : index
    %97 = vector.load %arg2[%c1_128, %c0_129, %c0_130, %c0_131] : memref<3x3x64x128xbf16, #tpu.memory_space<vmem>>, vector<1x1x64x128xbf16>
    %98 = vector.shape_cast %97 : vector<1x1x64x128xbf16> to vector<64x128xbf16>
    %cst_132 = arith.constant dense<0.000000e+00> : vector<4x128xf32>
    %99 = tpu.matmul %96, %98, %cst_132 {dimension_numbers = #tpu.dot_dimension_numbers<[1], [0], [0], [1], [0, 0, 1, 1], [], []>} : vector<4x64xbf16>, vector<64x128xbf16>, vector<4x128xf32> -> vector<4x128xf32>
    %100 = arith.addf %93, %99 : vector<4x128xf32>
    %c0_133 = arith.constant 0 : index
    %c1_134 = arith.constant 1 : index
    %c1_135 = arith.constant 1 : index
    %c0_136 = arith.constant 0 : index
    %c64_137 = arith.constant 64 : index
    %101 = vector.load %arg1[%c0_133, %c1_134, %c1_135, %c0_136, %c64_137] : memref<1x5x2x5x128xf32, #tpu.memory_space<vmem>>, vector<1x1x1x4x64xf32>
    %102 = vector.shape_cast %101 : vector<1x1x1x4x64xf32> to vector<4x64xf32>
    %103 = arith.truncf %102 : vector<4x64xf32> to vector<4x64xbf16>
    %c1_138 = arith.constant 1 : index
    %c1_139 = arith.constant 1 : index
    %c0_140 = arith.constant 0 : index
    %c0_141 = arith.constant 0 : index
    %104 = vector.load %arg2[%c1_138, %c1_139, %c0_140, %c0_141] : memref<3x3x64x128xbf16, #tpu.memory_space<vmem>>, vector<1x1x64x128xbf16>
    %105 = vector.shape_cast %104 : vector<1x1x64x128xbf16> to vector<64x128xbf16>
    %cst_142 = arith.constant dense<0.000000e+00> : vector<4x128xf32>
    %106 = tpu.matmul %103, %105, %cst_142 {dimension_numbers = #tpu.dot_dimension_numbers<[1], [0], [0], [1], [0, 0, 1, 1], [], []>} : vector<4x64xbf16>, vector<64x128xbf16>, vector<4x128xf32> -> vector<4x128xf32>
    %107 = arith.addf %100, %106 : vector<4x128xf32>
    %c0_143 = arith.constant 0 : index
    %c1_144 = arith.constant 1 : index
    %c1_145 = arith.constant 1 : index
    %c1_146 = arith.constant 1 : index
    %c0_147 = arith.constant 0 : index
    %108 = vector.load %arg1[%c0_143, %c1_144, %c1_145, %c1_146, %c0_147] : memref<1x5x2x5x128xf32, #tpu.memory_space<vmem>>, vector<1x1x1x4x64xf32>
    %109 = vector.shape_cast %108 : vector<1x1x1x4x64xf32> to vector<4x64xf32>
    %110 = arith.truncf %109 : vector<4x64xf32> to vector<4x64xbf16>
    %c1_148 = arith.constant 1 : index
    %c2_149 = arith.constant 2 : index
    %c0_150 = arith.constant 0 : index
    %c0_151 = arith.constant 0 : index
    %111 = vector.load %arg2[%c1_148, %c2_149, %c0_150, %c0_151] : memref<3x3x64x128xbf16, #tpu.memory_space<vmem>>, vector<1x1x64x128xbf16>
    %112 = vector.shape_cast %111 : vector<1x1x64x128xbf16> to vector<64x128xbf16>
    %cst_152 = arith.constant dense<0.000000e+00> : vector<4x128xf32>
    %113 = tpu.matmul %110, %112, %cst_152 {dimension_numbers = #tpu.dot_dimension_numbers<[1], [0], [0], [1], [0, 0, 1, 1], [], []>} : vector<4x64xbf16>, vector<64x128xbf16>, vector<4x128xf32> -> vector<4x128xf32>
    %114 = arith.addf %107, %113 : vector<4x128xf32>
    %c0_153 = arith.constant 0 : index
    %c2_154 = arith.constant 2 : index
    %c0_155 = arith.constant 0 : index
    %c0_156 = arith.constant 0 : index
    %c0_157 = arith.constant 0 : index
    %115 = vector.load %arg1[%c0_153, %c2_154, %c0_155, %c0_156, %c0_157] : memref<1x5x2x5x128xf32, #tpu.memory_space<vmem>>, vector<1x1x1x4x64xf32>
    %116 = vector.shape_cast %115 : vector<1x1x1x4x64xf32> to vector<4x64xf32>
    %117 = arith.truncf %116 : vector<4x64xf32> to vector<4x64xbf16>
    %c2_158 = arith.constant 2 : index
    %c0_159 = arith.constant 0 : index
    %c0_160 = arith.constant 0 : index
    %c0_161 = arith.constant 0 : index
    %118 = vector.load %arg2[%c2_158, %c0_159, %c0_160, %c0_161] : memref<3x3x64x128xbf16, #tpu.memory_space<vmem>>, vector<1x1x64x128xbf16>
    %119 = vector.shape_cast %118 : vector<1x1x64x128xbf16> to vector<64x128xbf16>
    %cst_162 = arith.constant dense<0.000000e+00> : vector<4x128xf32>
    %120 = tpu.matmul %117, %119, %cst_162 {dimension_numbers = #tpu.dot_dimension_numbers<[1], [0], [0], [1], [0, 0, 1, 1], [], []>} : vector<4x64xbf16>, vector<64x128xbf16>, vector<4x128xf32> -> vector<4x128xf32>
    %121 = arith.addf %114, %120 : vector<4x128xf32>
    %c0_163 = arith.constant 0 : index
    %c2_164 = arith.constant 2 : index
    %c0_165 = arith.constant 0 : index
    %c0_166 = arith.constant 0 : index
    %c64_167 = arith.constant 64 : index
    %122 = vector.load %arg1[%c0_163, %c2_164, %c0_165, %c0_166, %c64_167] : memref<1x5x2x5x128xf32, #tpu.memory_space<vmem>>, vector<1x1x1x4x64xf32>
    %123 = vector.shape_cast %122 : vector<1x1x1x4x64xf32> to vector<4x64xf32>
    %124 = arith.truncf %123 : vector<4x64xf32> to vector<4x64xbf16>
    %c2_168 = arith.constant 2 : index
    %c1_169 = arith.constant 1 : index
    %c0_170 = arith.constant 0 : index
    %c0_171 = arith.constant 0 : index
    %125 = vector.load %arg2[%c2_168, %c1_169, %c0_170, %c0_171] : memref<3x3x64x128xbf16, #tpu.memory_space<vmem>>, vector<1x1x64x128xbf16>
    %126 = vector.shape_cast %125 : vector<1x1x64x128xbf16> to vector<64x128xbf16>
    %cst_172 = arith.constant dense<0.000000e+00> : vector<4x128xf32>
    %127 = tpu.matmul %124, %126, %cst_172 {dimension_numbers = #tpu.dot_dimension_numbers<[1], [0], [0], [1], [0, 0, 1, 1], [], []>} : vector<4x64xbf16>, vector<64x128xbf16>, vector<4x128xf32> -> vector<4x128xf32>
    %128 = arith.addf %121, %127 : vector<4x128xf32>
    %c0_173 = arith.constant 0 : index
    %c2_174 = arith.constant 2 : index
    %c0_175 = arith.constant 0 : index
    %c1_176 = arith.constant 1 : index
    %c0_177 = arith.constant 0 : index
    %129 = vector.load %arg1[%c0_173, %c2_174, %c0_175, %c1_176, %c0_177] : memref<1x5x2x5x128xf32, #tpu.memory_space<vmem>>, vector<1x1x1x4x64xf32>
    %130 = vector.shape_cast %129 : vector<1x1x1x4x64xf32> to vector<4x64xf32>
    %131 = arith.truncf %130 : vector<4x64xf32> to vector<4x64xbf16>
    %c2_178 = arith.constant 2 : index
    %c2_179 = arith.constant 2 : index
    %c0_180 = arith.constant 0 : index
    %c0_181 = arith.constant 0 : index
    %132 = vector.load %arg2[%c2_178, %c2_179, %c0_180, %c0_181] : memref<3x3x64x128xbf16, #tpu.memory_space<vmem>>, vector<1x1x64x128xbf16>
    %133 = vector.shape_cast %132 : vector<1x1x64x128xbf16> to vector<64x128xbf16>
    %cst_182 = arith.constant dense<0.000000e+00> : vector<4x128xf32>
    %134 = tpu.matmul %131, %133, %cst_182 {dimension_numbers = #tpu.dot_dimension_numbers<[1], [0], [0], [1], [0, 0, 1, 1], [], []>} : vector<4x64xbf16>, vector<64x128xbf16>, vector<4x128xf32> -> vector<4x128xf32>
    %135 = arith.addf %128, %134 : vector<4x128xf32>
    %136 = vector.broadcast %0 : vector<1x128xf32> to vector<4x128xf32>
    %137 = arith.addf %135, %136 : vector<4x128xf32>
    %cst_183 = arith.constant 0.000000e+00 : f32
    %138 = vector.broadcast %cst_183 : f32 to vector<4x128xf32>
    %139 = arith.maximumf %137, %138 : vector<4x128xf32>
    %c0_184 = arith.constant 0 : index
    %c4 = arith.constant 4 : index
    %c0_185 = arith.constant 0 : index
    %140 = vector.load %arg4[%c0_184, %c4, %c0_185] : memref<1x16x128xf32, #tpu.memory_space<vmem>>, vector<1x4x128xf32>
    %141 = vector.shape_cast %140 : vector<1x4x128xf32> to vector<4x128xf32>
    %142 = vector.shape_cast %139 : vector<4x128xf32> to vector<1x4x128xf32>
    tpu.vector_store %arg4[%c0_184, %c4, %c0_185], %142 {strides = array<i32>} : memref<1x16x128xf32, #tpu.memory_space<vmem>>, vector<1x4x128xf32>,
    %cst_186 = arith.constant 0.000000e+00 : f32
    %143 = vector.broadcast %cst_186 : f32 to vector<4x128xf32>
    %c0_187 = arith.constant 0 : index
    %c2_188 = arith.constant 2 : index
    %c0_189 = arith.constant 0 : index
    %c0_190 = arith.constant 0 : index
    %c0_191 = arith.constant 0 : index
    %144 = vector.load %arg1[%c0_187, %c2_188, %c0_189, %c0_190, %c0_191] : memref<1x5x2x5x128xf32, #tpu.memory_space<vmem>>, vector<1x1x1x4x64xf32>
    %145 = vector.shape_cast %144 : vector<1x1x1x4x64xf32> to vector<4x64xf32>
    %146 = arith.truncf %145 : vector<4x64xf32> to vector<4x64xbf16>
    %c0_192 = arith.constant 0 : index
    %c0_193 = arith.constant 0 : index
    %c0_194 = arith.constant 0 : index
    %c0_195 = arith.constant 0 : index
    %147 = vector.load %arg2[%c0_192, %c0_193, %c0_194, %c0_195] : memref<3x3x64x128xbf16, #tpu.memory_space<vmem>>, vector<1x1x64x128xbf16>
    %148 = vector.shape_cast %147 : vector<1x1x64x128xbf16> to vector<64x128xbf16>
    %cst_196 = arith.constant dense<0.000000e+00> : vector<4x128xf32>
    %149 = tpu.matmul %146, %148, %cst_196 {dimension_numbers = #tpu.dot_dimension_numbers<[1], [0], [0], [1], [0, 0, 1, 1], [], []>} : vector<4x64xbf16>, vector<64x128xbf16>, vector<4x128xf32> -> vector<4x128xf32>
    %150 = arith.addf %143, %149 : vector<4x128xf32>
    %c0_197 = arith.constant 0 : index
    %c2_198 = arith.constant 2 : index
    %c0_199 = arith.constant 0 : index
    %c0_200 = arith.constant 0 : index
    %c64_201 = arith.constant 64 : index
    %151 = vector.load %arg1[%c0_197, %c2_198, %c0_199, %c0_200, %c64_201] : memref<1x5x2x5x128xf32, #tpu.memory_space<vmem>>, vector<1x1x1x4x64xf32>
    %152 = vector.shape_cast %151 : vector<1x1x1x4x64xf32> to vector<4x64xf32>
    %153 = arith.truncf %152 : vector<4x64xf32> to vector<4x64xbf16>
    %c0_202 = arith.constant 0 : index
    %c1_203 = arith.constant 1 : index
    %c0_204 = arith.constant 0 : index
    %c0_205 = arith.constant 0 : index
    %154 = vector.load %arg2[%c0_202, %c1_203, %c0_204, %c0_205] : memref<3x3x64x128xbf16, #tpu.memory_space<vmem>>, vector<1x1x64x128xbf16>
    %155 = vector.shape_cast %154 : vector<1x1x64x128xbf16> to vector<64x128xbf16>
    %cst_206 = arith.constant dense<0.000000e+00> : vector<4x128xf32>
    %156 = tpu.matmul %153, %155, %cst_206 {dimension_numbers = #tpu.dot_dimension_numbers<[1], [0], [0], [1], [0, 0, 1, 1], [], []>} : vector<4x64xbf16>, vector<64x128xbf16>, vector<4x128xf32> -> vector<4x128xf32>
    %157 = arith.addf %150, %156 : vector<4x128xf32>
    %c0_207 = arith.constant 0 : index
    %c2_208 = arith.constant 2 : index
    %c0_209 = arith.constant 0 : index
    %c1_210 = arith.constant 1 : index
    %c0_211 = arith.constant 0 : index
    %158 = vector.load %arg1[%c0_207, %c2_208, %c0_209, %c1_210, %c0_211] : memref<1x5x2x5x128xf32, #tpu.memory_space<vmem>>, vector<1x1x1x4x64xf32>
    %159 = vector.shape_cast %158 : vector<1x1x1x4x64xf32> to vector<4x64xf32>
    %160 = arith.truncf %159 : vector<4x64xf32> to vector<4x64xbf16>
    %c0_212 = arith.constant 0 : index
    %c2_213 = arith.constant 2 : index
    %c0_214 = arith.constant 0 : index
    %c0_215 = arith.constant 0 : index
    %161 = vector.load %arg2[%c0_212, %c2_213, %c0_214, %c0_215] : memref<3x3x64x128xbf16, #tpu.memory_space<vmem>>, vector<1x1x64x128xbf16>
    %162 = vector.shape_cast %161 : vector<1x1x64x128xbf16> to vector<64x128xbf16>
    %cst_216 = arith.constant dense<0.000000e+00> : vector<4x128xf32>
    %163 = tpu.matmul %160, %162, %cst_216 {dimension_numbers = #tpu.dot_dimension_numbers<[1], [0], [0], [1], [0, 0, 1, 1], [], []>} : vector<4x64xbf16>, vector<64x128xbf16>, vector<4x128xf32> -> vector<4x128xf32>
    %164 = arith.addf %157, %163 : vector<4x128xf32>
    %c0_217 = arith.constant 0 : index
    %c2_218 = arith.constant 2 : index
    %c1_219 = arith.constant 1 : index
    %c0_220 = arith.constant 0 : index
    %c0_221 = arith.constant 0 : index
    %165 = vector.load %arg1[%c0_217, %c2_218, %c1_219, %c0_220, %c0_221] : memref<1x5x2x5x128xf32, #tpu.memory_space<vmem>>, vector<1x1x1x4x64xf32>
    %166 = vector.shape_cast %165 : vector<1x1x1x4x64xf32> to vector<4x64xf32>
    %167 = arith.truncf %166 : vector<4x64xf32> to vector<4x64xbf16>
    %c1_222 = arith.constant 1 : index
    %c0_223 = arith.constant 0 : index
    %c0_224 = arith.constant 0 : index
    %c0_225 = arith.constant 0 : index
    %168 = vector.load %arg2[%c1_222, %c0_223, %c0_224, %c0_225] : memref<3x3x64x128xbf16, #tpu.memory_space<vmem>>, vector<1x1x64x128xbf16>
    %169 = vector.shape_cast %168 : vector<1x1x64x128xbf16> to vector<64x128xbf16>
    %cst_226 = arith.constant dense<0.000000e+00> : vector<4x128xf32>
    %170 = tpu.matmul %167, %169, %cst_226 {dimension_numbers = #tpu.dot_dimension_numbers<[1], [0], [0], [1], [0, 0, 1, 1], [], []>} : vector<4x64xbf16>, vector<64x128xbf16>, vector<4x128xf32> -> vector<4x128xf32>
    %171 = arith.addf %164, %170 : vector<4x128xf32>
    %c0_227 = arith.constant 0 : index
    %c2_228 = arith.constant 2 : index
    %c1_229 = arith.constant 1 : index
    %c0_230 = arith.constant 0 : index
    %c64_231 = arith.constant 64 : index
    %172 = vector.load %arg1[%c0_227, %c2_228, %c1_229, %c0_230, %c64_231] : memref<1x5x2x5x128xf32, #tpu.memory_space<vmem>>, vector<1x1x1x4x64xf32>
    %173 = vector.shape_cast %172 : vector<1x1x1x4x64xf32> to vector<4x64xf32>
    %174 = arith.truncf %173 : vector<4x64xf32> to vector<4x64xbf16>
    %c1_232 = arith.constant 1 : index
    %c1_233 = arith.constant 1 : index
    %c0_234 = arith.constant 0 : index
    %c0_235 = arith.constant 0 : index
    %175 = vector.load %arg2[%c1_232, %c1_233, %c0_234, %c0_235] : memref<3x3x64x128xbf16, #tpu.memory_space<vmem>>, vector<1x1x64x128xbf16>
    %176 = vector.shape_cast %175 : vector<1x1x64x128xbf16> to vector<64x128xbf16>
    %cst_236 = arith.constant dense<0.000000e+00> : vector<4x128xf32>
    %177 = tpu.matmul %174, %176, %cst_236 {dimension_numbers = #tpu.dot_dimension_numbers<[1], [0], [0], [1], [0, 0, 1, 1], [], []>} : vector<4x64xbf16>, vector<64x128xbf16>, vector<4x128xf32> -> vector<4x128xf32>
    %178 = arith.addf %171, %177 : vector<4x128xf32>
    %c0_237 = arith.constant 0 : index
    %c2_238 = arith.constant 2 : index
    %c1_239 = arith.constant 1 : index
    %c1_240 = arith.constant 1 : index
    %c0_241 = arith.constant 0 : index
    %179 = vector.load %arg1[%c0_237, %c2_238, %c1_239, %c1_240, %c0_241] : memref<1x5x2x5x128xf32, #tpu.memory_space<vmem>>, vector<1x1x1x4x64xf32>
    %180 = vector.shape_cast %179 : vector<1x1x1x4x64xf32> to vector<4x64xf32>
    %181 = arith.truncf %180 : vector<4x64xf32> to vector<4x64xbf16>
    %c1_242 = arith.constant 1 : index
    %c2_243 = arith.constant 2 : index
    %c0_244 = arith.constant 0 : index
    %c0_245 = arith.constant 0 : index
    %182 = vector.load %arg2[%c1_242, %c2_243, %c0_244, %c0_245] : memref<3x3x64x128xbf16, #tpu.memory_space<vmem>>, vector<1x1x64x128xbf16>
    %183 = vector.shape_cast %182 : vector<1x1x64x128xbf16> to vector<64x128xbf16>
    %cst_246 = arith.constant dense<0.000000e+00> : vector<4x128xf32>
    %184 = tpu.matmul %181, %183, %cst_246 {dimension_numbers = #tpu.dot_dimension_numbers<[1], [0], [0], [1], [0, 0, 1, 1], [], []>} : vector<4x64xbf16>, vector<64x128xbf16>, vector<4x128xf32> -> vector<4x128xf32>
    %185 = arith.addf %178, %184 : vector<4x128xf32>
    %c0_247 = arith.constant 0 : index
    %c3 = arith.constant 3 : index
    %c0_248 = arith.constant 0 : index
    %c0_249 = arith.constant 0 : index
    %c0_250 = arith.constant 0 : index
    %186 = vector.load %arg1[%c0_247, %c3, %c0_248, %c0_249, %c0_250] : memref<1x5x2x5x128xf32, #tpu.memory_space<vmem>>, vector<1x1x1x4x64xf32>
    %187 = vector.shape_cast %186 : vector<1x1x1x4x64xf32> to vector<4x64xf32>
    %188 = arith.truncf %187 : vector<4x64xf32> to vector<4x64xbf16>
    %c2_251 = arith.constant 2 : index
    %c0_252 = arith.constant 0 : index
    %c0_253 = arith.constant 0 : index
    %c0_254 = arith.constant 0 : index
    %189 = vector.load %arg2[%c2_251, %c0_252, %c0_253, %c0_254] : memref<3x3x64x128xbf16, #tpu.memory_space<vmem>>, vector<1x1x64x128xbf16>
    %190 = vector.shape_cast %189 : vector<1x1x64x128xbf16> to vector<64x128xbf16>
    %cst_255 = arith.constant dense<0.000000e+00> : vector<4x128xf32>
    %191 = tpu.matmul %188, %190, %cst_255 {dimension_numbers = #tpu.dot_dimension_numbers<[1], [0], [0], [1], [0, 0, 1, 1], [], []>} : vector<4x64xbf16>, vector<64x128xbf16>, vector<4x128xf32> -> vector<4x128xf32>
    %192 = arith.addf %185, %191 : vector<4x128xf32>
    %c0_256 = arith.constant 0 : index
    %c3_257 = arith.constant 3 : index
    %c0_258 = arith.constant 0 : index
    %c0_259 = arith.constant 0 : index
    %c64_260 = arith.constant 64 : index
    %193 = vector.load %arg1[%c0_256, %c3_257, %c0_258, %c0_259, %c64_260] : memref<1x5x2x5x128xf32, #tpu.memory_space<vmem>>, vector<1x1x1x4x64xf32>
    %194 = vector.shape_cast %193 : vector<1x1x1x4x64xf32> to vector<4x64xf32>
    %195 = arith.truncf %194 : vector<4x64xf32> to vector<4x64xbf16>
    %c2_261 = arith.constant 2 : index
    %c1_262 = arith.constant 1 : index
    %c0_263 = arith.constant 0 : index
    %c0_264 = arith.constant 0 : index
    %196 = vector.load %arg2[%c2_261, %c1_262, %c0_263, %c0_264] : memref<3x3x64x128xbf16, #tpu.memory_space<vmem>>, vector<1x1x64x128xbf16>
    %197 = vector.shape_cast %196 : vector<1x1x64x128xbf16> to vector<64x128xbf16>
    %cst_265 = arith.constant dense<0.000000e+00> : vector<4x128xf32>
    %198 = tpu.matmul %195, %197, %cst_265 {dimension_numbers = #tpu.dot_dimension_numbers<[1], [0], [0], [1], [0, 0, 1, 1], [], []>} : vector<4x64xbf16>, vector<64x128xbf16>, vector<4x128xf32> -> vector<4x128xf32>
    %199 = arith.addf %192, %198 : vector<4x128xf32>
    %c0_266 = arith.constant 0 : index
    %c3_267 = arith.constant 3 : index
    %c0_268 = arith.constant 0 : index
    %c1_269 = arith.constant 1 : index
    %c0_270 = arith.constant 0 : index
    %200 = vector.load %arg1[%c0_266, %c3_267, %c0_268, %c1_269, %c0_270] : memref<1x5x2x5x128xf32, #tpu.memory_space<vmem>>, vector<1x1x1x4x64xf32>
    %201 = vector.shape_cast %200 : vector<1x1x1x4x64xf32> to vector<4x64xf32>
    %202 = arith.truncf %201 : vector<4x64xf32> to vector<4x64xbf16>
    %c2_271 = arith.constant 2 : index
    %c2_272 = arith.constant 2 : index
    %c0_273 = arith.constant 0 : index
    %c0_274 = arith.constant 0 : index
    %203 = vector.load %arg2[%c2_271, %c2_272, %c0_273, %c0_274] : memref<3x3x64x128xbf16, #tpu.memory_space<vmem>>, vector<1x1x64x128xbf16>
    %204 = vector.shape_cast %203 : vector<1x1x64x128xbf16> to vector<64x128xbf16>
    %cst_275 = arith.constant dense<0.000000e+00> : vector<4x128xf32>
    %205 = tpu.matmul %202, %204, %cst_275 {dimension_numbers = #tpu.dot_dimension_numbers<[1], [0], [0], [1], [0, 0, 1, 1], [], []>} : vector<4x64xbf16>, vector<64x128xbf16>, vector<4x128xf32> -> vector<4x128xf32>
    %206 = arith.addf %199, %205 : vector<4x128xf32>
    %207 = vector.broadcast %0 : vector<1x128xf32> to vector<4x128xf32>
    %208 = arith.addf %206, %207 : vector<4x128xf32>
    %cst_276 = arith.constant 0.000000e+00 : f32
    %209 = vector.broadcast %cst_276 : f32 to vector<4x128xf32>
    %210 = arith.maximumf %208, %209 : vector<4x128xf32>
    %c0_277 = arith.constant 0 : index
    %c8 = arith.constant 8 : index
    %c0_278 = arith.constant 0 : index
    %211 = vector.load %arg4[%c0_277, %c8, %c0_278] : memref<1x16x128xf32, #tpu.memory_space<vmem>>, vector<1x4x128xf32>
    %212 = vector.shape_cast %211 : vector<1x4x128xf32> to vector<4x128xf32>
    %213 = vector.shape_cast %210 : vector<4x128xf32> to vector<1x4x128xf32>
    tpu.vector_store %arg4[%c0_277, %c8, %c0_278], %213 {strides = array<i32>} : memref<1x16x128xf32, #tpu.memory_space<vmem>>, vector<1x4x128xf32>,
    %cst_279 = arith.constant 0.000000e+00 : f32
    %214 = vector.broadcast %cst_279 : f32 to vector<4x128xf32>
    %c0_280 = arith.constant 0 : index
    %c3_281 = arith.constant 3 : index
    %c0_282 = arith.constant 0 : index
    %c0_283 = arith.constant 0 : index
    %c0_284 = arith.constant 0 : index
    %215 = vector.load %arg1[%c0_280, %c3_281, %c0_282, %c0_283, %c0_284] : memref<1x5x2x5x128xf32, #tpu.memory_space<vmem>>, vector<1x1x1x4x64xf32>
    %216 = vector.shape_cast %215 : vector<1x1x1x4x64xf32> to vector<4x64xf32>
    %217 = arith.truncf %216 : vector<4x64xf32> to vector<4x64xbf16>
    %c0_285 = arith.constant 0 : index
    %c0_286 = arith.constant 0 : index
    %c0_287 = arith.constant 0 : index
    %c0_288 = arith.constant 0 : index
    %218 = vector.load %arg2[%c0_285, %c0_286, %c0_287, %c0_288] : memref<3x3x64x128xbf16, #tpu.memory_space<vmem>>, vector<1x1x64x128xbf16>
    %219 = vector.shape_cast %218 : vector<1x1x64x128xbf16> to vector<64x128xbf16>
    %cst_289 = arith.constant dense<0.000000e+00> : vector<4x128xf32>
    %220 = tpu.matmul %217, %219, %cst_289 {dimension_numbers = #tpu.dot_dimension_numbers<[1], [0], [0], [1], [0, 0, 1, 1], [], []>} : vector<4x64xbf16>, vector<64x128xbf16>, vector<4x128xf32> -> vector<4x128xf32>
    %221 = arith.addf %214, %220 : vector<4x128xf32>
    %c0_290 = arith.constant 0 : index
    %c3_291 = arith.constant 3 : index
    %c0_292 = arith.constant 0 : index
    %c0_293 = arith.constant 0 : index
    %c64_294 = arith.constant 64 : index
    %222 = vector.load %arg1[%c0_290, %c3_291, %c0_292, %c0_293, %c64_294] : memref<1x5x2x5x128xf32, #tpu.memory_space<vmem>>, vector<1x1x1x4x64xf32>
    %223 = vector.shape_cast %222 : vector<1x1x1x4x64xf32> to vector<4x64xf32>
    %224 = arith.truncf %223 : vector<4x64xf32> to vector<4x64xbf16>
    %c0_295 = arith.constant 0 : index
    %c1_296 = arith.constant 1 : index
    %c0_297 = arith.constant 0 : index
    %c0_298 = arith.constant 0 : index
    %225 = vector.load %arg2[%c0_295, %c1_296, %c0_297, %c0_298] : memref<3x3x64x128xbf16, #tpu.memory_space<vmem>>, vector<1x1x64x128xbf16>
    %226 = vector.shape_cast %225 : vector<1x1x64x128xbf16> to vector<64x128xbf16>
    %cst_299 = arith.constant dense<0.000000e+00> : vector<4x128xf32>
    %227 = tpu.matmul %224, %226, %cst_299 {dimension_numbers = #tpu.dot_dimension_numbers<[1], [0], [0], [1], [0, 0, 1, 1], [], []>} : vector<4x64xbf16>, vector<64x128xbf16>, vector<4x128xf32> -> vector<4x128xf32>
    %228 = arith.addf %221, %227 : vector<4x128xf32>
    %c0_300 = arith.constant 0 : index
    %c3_301 = arith.constant 3 : index
    %c0_302 = arith.constant 0 : index
    %c1_303 = arith.constant 1 : index
    %c0_304 = arith.constant 0 : index
    %229 = vector.load %arg1[%c0_300, %c3_301, %c0_302, %c1_303, %c0_304] : memref<1x5x2x5x128xf32, #tpu.memory_space<vmem>>, vector<1x1x1x4x64xf32>
    %230 = vector.shape_cast %229 : vector<1x1x1x4x64xf32> to vector<4x64xf32>
    %231 = arith.truncf %230 : vector<4x64xf32> to vector<4x64xbf16>
    %c0_305 = arith.constant 0 : index
    %c2_306 = arith.constant 2 : index
    %c0_307 = arith.constant 0 : index
    %c0_308 = arith.constant 0 : index
    %232 = vector.load %arg2[%c0_305, %c2_306, %c0_307, %c0_308] : memref<3x3x64x128xbf16, #tpu.memory_space<vmem>>, vector<1x1x64x128xbf16>
    %233 = vector.shape_cast %232 : vector<1x1x64x128xbf16> to vector<64x128xbf16>
    %cst_309 = arith.constant dense<0.000000e+00> : vector<4x128xf32>
    %234 = tpu.matmul %231, %233, %cst_309 {dimension_numbers = #tpu.dot_dimension_numbers<[1], [0], [0], [1], [0, 0, 1, 1], [], []>} : vector<4x64xbf16>, vector<64x128xbf16>, vector<4x128xf32> -> vector<4x128xf32>
    %235 = arith.addf %228, %234 : vector<4x128xf32>
    %c0_310 = arith.constant 0 : index
    %c3_311 = arith.constant 3 : index
    %c1_312 = arith.constant 1 : index
    %c0_313 = arith.constant 0 : index
    %c0_314 = arith.constant 0 : index
    %236 = vector.load %arg1[%c0_310, %c3_311, %c1_312, %c0_313, %c0_314] : memref<1x5x2x5x128xf32, #tpu.memory_space<vmem>>, vector<1x1x1x4x64xf32>
    %237 = vector.shape_cast %236 : vector<1x1x1x4x64xf32> to vector<4x64xf32>
    %238 = arith.truncf %237 : vector<4x64xf32> to vector<4x64xbf16>
    %c1_315 = arith.constant 1 : index
    %c0_316 = arith.constant 0 : index
    %c0_317 = arith.constant 0 : index
    %c0_318 = arith.constant 0 : index
    %239 = vector.load %arg2[%c1_315, %c0_316, %c0_317, %c0_318] : memref<3x3x64x128xbf16, #tpu.memory_space<vmem>>, vector<1x1x64x128xbf16>
    %240 = vector.shape_cast %239 : vector<1x1x64x128xbf16> to vector<64x128xbf16>
    %cst_319 = arith.constant dense<0.000000e+00> : vector<4x128xf32>
    %241 = tpu.matmul %238, %240, %cst_319 {dimension_numbers = #tpu.dot_dimension_numbers<[1], [0], [0], [1], [0, 0, 1, 1], [], []>} : vector<4x64xbf16>, vector<64x128xbf16>, vector<4x128xf32> -> vector<4x128xf32>
    %242 = arith.addf %235, %241 : vector<4x128xf32>
    %c0_320 = arith.constant 0 : index
    %c3_321 = arith.constant 3 : index
    %c1_322 = arith.constant 1 : index
    %c0_323 = arith.constant 0 : index
    %c64_324 = arith.constant 64 : index
    %243 = vector.load %arg1[%c0_320, %c3_321, %c1_322, %c0_323, %c64_324] : memref<1x5x2x5x128xf32, #tpu.memory_space<vmem>>, vector<1x1x1x4x64xf32>
    %244 = vector.shape_cast %243 : vector<1x1x1x4x64xf32> to vector<4x64xf32>
    %245 = arith.truncf %244 : vector<4x64xf32> to vector<4x64xbf16>
    %c1_325 = arith.constant 1 : index
    %c1_326 = arith.constant 1 : index
    %c0_327 = arith.constant 0 : index
    %c0_328 = arith.constant 0 : index
    %246 = vector.load %arg2[%c1_325, %c1_326, %c0_327, %c0_328] : memref<3x3x64x128xbf16, #tpu.memory_space<vmem>>, vector<1x1x64x128xbf16>
    %247 = vector.shape_cast %246 : vector<1x1x64x128xbf16> to vector<64x128xbf16>
    %cst_329 = arith.constant dense<0.000000e+00> : vector<4x128xf32>
    %248 = tpu.matmul %245, %247, %cst_329 {dimension_numbers = #tpu.dot_dimension_numbers<[1], [0], [0], [1], [0, 0, 1, 1], [], []>} : vector<4x64xbf16>, vector<64x128xbf16>, vector<4x128xf32> -> vector<4x128xf32>
    %249 = arith.addf %242, %248 : vector<4x128xf32>
    %c0_330 = arith.constant 0 : index
    %c3_331 = arith.constant 3 : index
    %c1_332 = arith.constant 1 : index
    %c1_333 = arith.constant 1 : index
    %c0_334 = arith.constant 0 : index
    %250 = vector.load %arg1[%c0_330, %c3_331, %c1_332, %c1_333, %c0_334] : memref<1x5x2x5x128xf32, #tpu.memory_space<vmem>>, vector<1x1x1x4x64xf32>
    %251 = vector.shape_cast %250 : vector<1x1x1x4x64xf32> to vector<4x64xf32>
    %252 = arith.truncf %251 : vector<4x64xf32> to vector<4x64xbf16>
    %c1_335 = arith.constant 1 : index
    %c2_336 = arith.constant 2 : index
    %c0_337 = arith.constant 0 : index
    %c0_338 = arith.constant 0 : index
    %253 = vector.load %arg2[%c1_335, %c2_336, %c0_337, %c0_338] : memref<3x3x64x128xbf16, #tpu.memory_space<vmem>>, vector<1x1x64x128xbf16>
    %254 = vector.shape_cast %253 : vector<1x1x64x128xbf16> to vector<64x128xbf16>
    %cst_339 = arith.constant dense<0.000000e+00> : vector<4x128xf32>
    %255 = tpu.matmul %252, %254, %cst_339 {dimension_numbers = #tpu.dot_dimension_numbers<[1], [0], [0], [1], [0, 0, 1, 1], [], []>} : vector<4x64xbf16>, vector<64x128xbf16>, vector<4x128xf32> -> vector<4x128xf32>
    %256 = arith.addf %249, %255 : vector<4x128xf32>
    %c0_340 = arith.constant 0 : index
    %c4_341 = arith.constant 4 : index
    %c0_342 = arith.constant 0 : index
    %c0_343 = arith.constant 0 : index
    %c0_344 = arith.constant 0 : index
    %257 = vector.load %arg1[%c0_340, %c4_341, %c0_342, %c0_343, %c0_344] : memref<1x5x2x5x128xf32, #tpu.memory_space<vmem>>, vector<1x1x1x4x64xf32>
    %258 = vector.shape_cast %257 : vector<1x1x1x4x64xf32> to vector<4x64xf32>
    %259 = arith.truncf %258 : vector<4x64xf32> to vector<4x64xbf16>
    %c2_345 = arith.constant 2 : index
    %c0_346 = arith.constant 0 : index
    %c0_347 = arith.constant 0 : index
    %c0_348 = arith.constant 0 : index
    %260 = vector.load %arg2[%c2_345, %c0_346, %c0_347, %c0_348] : memref<3x3x64x128xbf16, #tpu.memory_space<vmem>>, vector<1x1x64x128xbf16>
    %261 = vector.shape_cast %260 : vector<1x1x64x128xbf16> to vector<64x128xbf16>
    %cst_349 = arith.constant dense<0.000000e+00> : vector<4x128xf32>
    %262 = tpu.matmul %259, %261, %cst_349 {dimension_numbers = #tpu.dot_dimension_numbers<[1], [0], [0], [1], [0, 0, 1, 1], [], []>} : vector<4x64xbf16>, vector<64x128xbf16>, vector<4x128xf32> -> vector<4x128xf32>
    %263 = arith.addf %256, %262 : vector<4x128xf32>
    %c0_350 = arith.constant 0 : index
    %c4_351 = arith.constant 4 : index
    %c0_352 = arith.constant 0 : index
    %c0_353 = arith.constant 0 : index
    %c64_354 = arith.constant 64 : index
    %264 = vector.load %arg1[%c0_350, %c4_351, %c0_352, %c0_353, %c64_354] : memref<1x5x2x5x128xf32, #tpu.memory_space<vmem>>, vector<1x1x1x4x64xf32>
    %265 = vector.shape_cast %264 : vector<1x1x1x4x64xf32> to vector<4x64xf32>
    %266 = arith.truncf %265 : vector<4x64xf32> to vector<4x64xbf16>
    %c2_355 = arith.constant 2 : index
    %c1_356 = arith.constant 1 : index
    %c0_357 = arith.constant 0 : index
    %c0_358 = arith.constant 0 : index
    %267 = vector.load %arg2[%c2_355, %c1_356, %c0_357, %c0_358] : memref<3x3x64x128xbf16, #tpu.memory_space<vmem>>, vector<1x1x64x128xbf16>
    %268 = vector.shape_cast %267 : vector<1x1x64x128xbf16> to vector<64x128xbf16>
    %cst_359 = arith.constant dense<0.000000e+00> : vector<4x128xf32>
    %269 = tpu.matmul %266, %268, %cst_359 {dimension_numbers = #tpu.dot_dimension_numbers<[1], [0], [0], [1], [0, 0, 1, 1], [], []>} : vector<4x64xbf16>, vector<64x128xbf16>, vector<4x128xf32> -> vector<4x128xf32>
    %270 = arith.addf %263, %269 : vector<4x128xf32>
    %c0_360 = arith.constant 0 : index
    %c4_361 = arith.constant 4 : index
    %c0_362 = arith.constant 0 : index
    %c1_363 = arith.constant 1 : index
    %c0_364 = arith.constant 0 : index
    %271 = vector.load %arg1[%c0_360, %c4_361, %c0_362, %c1_363, %c0_364] : memref<1x5x2x5x128xf32, #tpu.memory_space<vmem>>, vector<1x1x1x4x64xf32>
    %272 = vector.shape_cast %271 : vector<1x1x1x4x64xf32> to vector<4x64xf32>
    %273 = arith.truncf %272 : vector<4x64xf32> to vector<4x64xbf16>
    %c2_365 = arith.constant 2 : index
    %c2_366 = arith.constant 2 : index
    %c0_367 = arith.constant 0 : index
    %c0_368 = arith.constant 0 : index
    %274 = vector.load %arg2[%c2_365, %c2_366, %c0_367, %c0_368] : memref<3x3x64x128xbf16, #tpu.memory_space<vmem>>, vector<1x1x64x128xbf16>
    %275 = vector.shape_cast %274 : vector<1x1x64x128xbf16> to vector<64x128xbf16>
    %cst_369 = arith.constant dense<0.000000e+00> : vector<4x128xf32>
    %276 = tpu.matmul %273, %275, %cst_369 {dimension_numbers = #tpu.dot_dimension_numbers<[1], [0], [0], [1], [0, 0, 1, 1], [], []>} : vector<4x64xbf16>, vector<64x128xbf16>, vector<4x128xf32> -> vector<4x128xf32>
    %277 = arith.addf %270, %276 : vector<4x128xf32>
    %278 = vector.broadcast %0 : vector<1x128xf32> to vector<4x128xf32>
    %279 = arith.addf %277, %278 : vector<4x128xf32>
    %cst_370 = arith.constant 0.000000e+00 : f32
    %280 = vector.broadcast %cst_370 : f32 to vector<4x128xf32>
    %281 = arith.maximumf %279, %280 : vector<4x128xf32>
    %c0_371 = arith.constant 0 : index
    %c12 = arith.constant 12 : index
    %c0_372 = arith.constant 0 : index
    %282 = vector.load %arg4[%c0_371, %c12, %c0_372] : memref<1x16x128xf32, #tpu.memory_space<vmem>>, vector<1x4x128xf32>
    %283 = vector.shape_cast %282 : vector<1x4x128xf32> to vector<4x128xf32>
    %284 = vector.shape_cast %281 : vector<4x128xf32> to vector<1x4x128xf32>
    tpu.vector_store %arg4[%c0_371, %c12, %c0_372], %284 {strides = array<i32>} : memref<1x16x128xf32, #tpu.memory_space<vmem>>, vector<1x4x128xf32>,
    return
  }
  func.func @transform_0(%arg0: i32) -> (i32, i32, i32, i32, i32) {
    %c0_i32 = arith.constant 0 : i32
    %c0_i32_0 = arith.constant 0 : i32
    %c0_i32_1 = arith.constant 0 : i32
    %c0_i32_2 = arith.constant 0 : i32
    %c0_i32_3 = arith.constant 0 : i32
    return %arg0, %c0_i32, %c0_i32_0, %c0_i32_1, %c0_i32_2 : i32, i32, i32, i32, i32
  }
  func.func @transform_1(%arg0: i32) -> (i32, i32, i32, i32) {
    %c0_i32 = arith.constant 0 : i32
    %c0_i32_0 = arith.constant 0 : i32
    %c0_i32_1 = arith.constant 0 : i32
    %c0_i32_2 = arith.constant 0 : i32
    %c0_i32_3 = arith.constant 0 : i32
    return %c0_i32, %c0_i32_0, %c0_i32_1, %c0_i32_2 : i32, i32, i32, i32
  }
  func.func @transform_2(%arg0: i32) -> (i32, i32) {
    %c0_i32 = arith.constant 0 : i32
    %c0_i32_0 = arith.constant 0 : i32
    %c0_i32_1 = arith.constant 0 : i32
    return %c0_i32, %c0_i32_0 : i32, i32
  }
  func.func @transform_3(%arg0: i32) -> (i32, i32, i32) {
    %c0_i32 = arith.constant 0 : i32
    %c0_i32_0 = arith.constant 0 : i32
    %c0_i32_1 = arith.constant 0 : i32
    return %arg0, %c0_i32, %c0_i32_0 : i32, i32, i32
  }
}

module attributes {stable_mosaic.version = 11 : i64} {
  func.func @_mlp_kernel(%arg0: i32, %arg1: memref<8x2048xf32, #tpu.memory_space<vmem>>, %arg2: memref<2048x128xbf16, #tpu.memory_space<vmem>>, %arg3: memref<1x128xf32, #tpu.memory_space<vmem>>, %arg4: memref<128x128xbf16, #tpu.memory_space<vmem>>, %arg5: memref<1x128xf32, #tpu.memory_space<vmem>>, %arg6: memref<8x128xf32, #tpu.memory_space<vmem>>) attributes {dimension_semantics = [#tpu.dimension_semantics<parallel>], iteration_bounds = array<i64: 1>, scalar_prefetch = 0 : i64, scratch_operands = 0 : i64, tpu.core_type = #tpu.core_type<tc>, window_params = [{transform_indices = @transform_0, window_bounds = array<i64: 8, 2048>}, {pipeline_mode = #tpu.pipeline_mode<synchronous>, transform_indices = @transform_1, window_bounds = array<i64: 2048, 128>}, {pipeline_mode = #tpu.pipeline_mode<synchronous>, transform_indices = @transform_2, window_bounds = array<i64: 1, 128>}, {pipeline_mode = #tpu.pipeline_mode<synchronous>, transform_indices = @transform_3, window_bounds = array<i64: 128, 128>}, {pipeline_mode = #tpu.pipeline_mode<synchronous>, transform_indices = @transform_4, window_bounds = array<i64: 1, 128>}, {transform_indices = @transform_5, window_bounds = array<i64: 8, 128>}]} {
    %c0 = arith.constant 0 : index
    %c0_0 = arith.constant 0 : index
    %0 = vector.load %arg1[%c0, %c0_0] : memref<8x2048xf32, #tpu.memory_space<vmem>>, vector<8x2048xf32>
    %1 = arith.truncf %0 : vector<8x2048xf32> to vector<8x2048xbf16>
    %c0_1 = arith.constant 0 : index
    %c0_2 = arith.constant 0 : index
    %2 = vector.load %arg2[%c0_1, %c0_2] : memref<2048x128xbf16, #tpu.memory_space<vmem>>, vector<2048x128xbf16>
    %cst = arith.constant dense<0.000000e+00> : vector<8x128xf32>
    %3 = tpu.matmul %1, %2, %cst {dimension_numbers = #tpu.dot_dimension_numbers<[1], [0], [0], [1], [0, 0, 1, 1], [], []>} : vector<8x2048xbf16>, vector<2048x128xbf16>, vector<8x128xf32> -> vector<8x128xf32>
    %c0_3 = arith.constant 0 : index
    %c0_4 = arith.constant 0 : index
    %4 = vector.load %arg3[%c0_3, %c0_4] : memref<1x128xf32, #tpu.memory_space<vmem>>, vector<1x128xf32>
    %5 = vector.broadcast %4 : vector<1x128xf32> to vector<8x128xf32>
    %6 = arith.addf %3, %5 : vector<8x128xf32>
    %cst_5 = arith.constant 0.000000e+00 : f32
    %7 = vector.broadcast %cst_5 : f32 to vector<8x128xf32>
    %8 = arith.maximumf %6, %7 : vector<8x128xf32>
    %9 = arith.truncf %8 : vector<8x128xf32> to vector<8x128xbf16>
    %c0_6 = arith.constant 0 : index
    %c0_7 = arith.constant 0 : index
    %10 = vector.load %arg4[%c0_6, %c0_7] : memref<128x128xbf16, #tpu.memory_space<vmem>>, vector<128x128xbf16>
    %cst_8 = arith.constant dense<0.000000e+00> : vector<8x128xf32>
    %11 = tpu.matmul %9, %10, %cst_8 {dimension_numbers = #tpu.dot_dimension_numbers<[1], [0], [0], [1], [0, 0, 1, 1], [], []>} : vector<8x128xbf16>, vector<128x128xbf16>, vector<8x128xf32> -> vector<8x128xf32>
    %c0_9 = arith.constant 0 : index
    %c0_10 = arith.constant 0 : index
    %12 = vector.load %arg5[%c0_9, %c0_10] : memref<1x128xf32, #tpu.memory_space<vmem>>, vector<1x128xf32>
    %13 = vector.broadcast %12 : vector<1x128xf32> to vector<8x128xf32>
    %14 = arith.addf %11, %13 : vector<8x128xf32>
    %c0_11 = arith.constant 0 : index
    %c0_12 = arith.constant 0 : index
    %15 = vector.load %arg6[%c0_11, %c0_12] : memref<8x128xf32, #tpu.memory_space<vmem>>, vector<8x128xf32>
    tpu.vector_store %arg6[%c0_11, %c0_12], %14 {strides = array<i32>} : memref<8x128xf32, #tpu.memory_space<vmem>>, vector<8x128xf32>,
    return
  }
  func.func @transform_0(%arg0: i32) -> (i32, i32) {
    %c0_i32 = arith.constant 0 : i32
    %c0_i32_0 = arith.constant 0 : i32
    return %arg0, %c0_i32 : i32, i32
  }
  func.func @transform_1(%arg0: i32) -> (i32, i32) {
    %c0_i32 = arith.constant 0 : i32
    %c0_i32_0 = arith.constant 0 : i32
    %c0_i32_1 = arith.constant 0 : i32
    return %c0_i32, %c0_i32_0 : i32, i32
  }
  func.func @transform_2(%arg0: i32) -> (i32, i32) {
    %c0_i32 = arith.constant 0 : i32
    %c0_i32_0 = arith.constant 0 : i32
    %c0_i32_1 = arith.constant 0 : i32
    return %c0_i32, %c0_i32_0 : i32, i32
  }
  func.func @transform_3(%arg0: i32) -> (i32, i32) {
    %c0_i32 = arith.constant 0 : i32
    %c0_i32_0 = arith.constant 0 : i32
    %c0_i32_1 = arith.constant 0 : i32
    return %c0_i32, %c0_i32_0 : i32, i32
  }
  func.func @transform_4(%arg0: i32) -> (i32, i32) {
    %c0_i32 = arith.constant 0 : i32
    %c0_i32_0 = arith.constant 0 : i32
    %c0_i32_1 = arith.constant 0 : i32
    return %c0_i32, %c0_i32_0 : i32, i32
  }
  func.func @transform_5(%arg0: i32) -> (i32, i32) {
    %c0_i32 = arith.constant 0 : i32
    %c0_i32_0 = arith.constant 0 : i32
    return %arg0, %c0_i32 : i32, i32
  }
}

</mosaic_0001>

<bundles_post_ra>
// kernel: net_forward.4
= control target key start
LH: loop header
LB: loop body
LE: loop exit
PB: predicated region body
PF: predicated region fallthrough
CT: control target
= control target key end

     0   :  { %s2604_s12 = smov 0   ;;  %s3530_s0 = inlined_call_operand.vmem [shape: f32[2,17,2,17,6], index: 0, kind: input, shape index: {}]   ;;  %s3531_s1 = inlined_call_operand.vmem [shape: bf16[3,3,3,32], index: 1, kind: input, shape index: {}]   ;;  %s3532_s2 = inlined_call_operand.vmem [shape: f32[1,32], index: 2, kind: input, shape index: {}]   ;;  %s3533_s3 = inlined_call_operand.vmem [shape: f32[2,256,32], index: 3, kind: output, shape index: {}]  }
   0x1 LB: > { %s2268_s13 = sadd.s32 4294967295, %s2580_s12   ;;  %p2272_p0 = scmp.ge.s32.totalorder %s2580_s12, 1  ;;  %s2580_s12 = sphi %s2604_s12, %s13_s12  }
   0x2   : > { %p137_p1 = scmp.lt.s32.totalorder %s2580_s12, 3 }
   0x4   : > { %p138_p2 = pnand %p2272_p0, %p137_p1 }
   0x6   : > { %141 = sbr.rel (%p138_p2) target bundleno = 852 (0x354), region = 32 }
   0xb   : > { %p161_p3 = scmp.lt.s32.totalorder %s2268_s13, 1  ;;  %s2582_s18 = smov 125   ;;  %v2276_v26 = vld [vmem:[%s3531_s1 + $0x2] sm:$0x3]  ;;  %vm321_vm0 = vcmask 1040384   ;;  %vm322_vm1 = vcmask 1041408  }
   0xc   : > { %v2583_v30 = vmov 65535   ;;  %vm272_vm2 = vcmask 23552   ;;  %vm2180_vm3 = vcmask 261120  }
   0xd   : > { %s3572_s13 = smov (!%p161_p3, %s2268_s13), 1  ;;  %v323_v31 = vsel %vm321_vm0, 4294967295, %v2583_v30 }
   0xe   : > { %s2562_s14 = smul.u32 816, %s3572_s13  ;;  %v2679_v34 = vsel %vm322_vm1, %v323_v31, 0 }
   0xf   : > { %v326_v35 = vand.u32 %v2276_v26, %v2679_v34 }
  0x10   : > { %s2618_s17 = scalar_lea.vmem %s3530_s0, %s2562_s14  ;;  %s2558_s14 = sshll.u32 %s3572_s13, 8 }
  0x11   : > { %v189_v0 = vld [vmem:[%s2618_s17 + $0x180] sm:$0xff]  ;;  %v190_v1 = vld [vmem:[%s2618_s17 + $0x188] sm:$0xff]  ;;  %v191_v8 = vld [vmem:[%s2618_s17 + $0x1b0] sm:$0xff]  ;;  %2559 = vmatpush.bf16.msra.mxu1 %v326_v35  ;;  %2560 = vmatpush.bf16.msra.mxu2 %v326_v35 }
  0x12   : > { %v181_v2 = vld [vmem:[%s2618_s17 + $0xc0] sm:$0xff]  ;;  %v2623_v3 = vpack.c.bf16 %v190_v1, %v189_v0  ;;  %v182_v4 = vld [vmem:[%s2618_s17 + $0xc8] sm:$0xff]  ;;  %v192_v11 = vld [vmem:[%s2618_s17 + $0x1b8] sm:$0xff]  ;;  %335 = vmatpush.bf16.msra.mxu0 %v326_v35  ;;  %2561 = vmatpush.bf16.msra.mxu3 %v326_v35 }
  0x13   : > { %v2626_v5 = vpack.c.bf16 %v182_v4, %v181_v2  ;;  %v197_v6 = vld [vmem:[%s2618_s17 + $0x240] sm:$0xff]  ;;  %v198_v7 = vld [vmem:[%s2618_s17 + $0x248] sm:$0xff]  ;;  %v2638_v12 = vpack.c.bf16 %v192_v11, %v191_v8  ;;  %v199_v15 = vld [vmem:[%s2618_s17 + $0x270] sm:$0xff] }
  0x14   : > { %3541 = vst [vmem:[#allocation2_spill] sm:$0xff] %v2623_v3  ;;  %256 = vrot.lane.b32.xlu0 %v2623_v3, %s2582_s18  ;;  %v173_v9 = vld [vmem:[%s2618_s17] sm:$0xff]  ;;  %v174_v10 = vld [vmem:[%s2618_s17 + $0x8] sm:$0xff]  ;;  %v2640_v13 = vpack.c.bf16 %v198_v7, %v197_v6  ;;  %v200_v16 = vld [vmem:[%s2618_s17 + $0x278] sm:$0xff] }
  0x15   : > { %248 = vrot.lane.b32.xlu1 %v2626_v5, %s2582_s18  ;;  %v2642_v14 = vpack.c.bf16 %v174_v10, %v173_v9  ;;  %258 = vrot.lane.b32.xlu2 %v2638_v12, %s2582_s18  ;;  %v183_v17 = vld [vmem:[%s2618_s17 + $0xf0] sm:$0xff]  ;;  %v184_v18 = vld [vmem:[%s2618_s17 + $0xf8] sm:$0xff]  ;;  %v2654_v19 = vpack.c.bf16 %v200_v16, %v199_v15 }
  0x16   : > { %v175_v20 = vld [vmem:[%s2618_s17 + $0x30] sm:$0xff]  ;;  %v176_v21 = vld [vmem:[%s2618_s17 + $0x38] sm:$0xff]  ;;  %v2658_v22 = vpack.c.bf16 %v184_v18, %v183_v17  ;;  %v193_v24 = vld [vmem:[%s2618_s17 + $0x1e0] sm:$0xff] }
  0x17   : > { %v2660_v23 = vpack.c.bf16 %v176_v21, %v175_v20  ;;  %v194_v25 = vld [vmem:[%s2618_s17 + $0x1e8] sm:$0xff]  ;;  %v201_v27 = vld [vmem:[%s2618_s17 + $0x2a0] sm:$0xff]  ;;  %v195_v40 = vld [vmem:[%s2618_s17 + $0x210] sm:$0xff] }
  0x18   : > { %v202_v28 = vld [vmem:[%s2618_s17 + $0x2a8] sm:$0xff]  ;;  %v2675_v29 = vpack.c.bf16 %v194_v25, %v193_v24  ;;  %v185_v32 = vld [vmem:[%s2618_s17 + $0x120] sm:$0xff]  ;;  %v196_v41 = vld [vmem:[%s2618_s17 + $0x218] sm:$0xff] }
  0x19   : > { %v186_v33 = vld [vmem:[%s2618_s17 + $0x128] sm:$0xff]  ;;  %v2682_v36 = vpack.c.bf16 %v202_v28, %v201_v27  ;;  %v177_v38 = vld [vmem:[%s2618_s17 + $0x60] sm:$0xff]  ;;  %v203_v43 = vld [vmem:[%s2618_s17 + $0x2d0] sm:$0xff]  ;;  %v2700_v45 = vpack.c.bf16 %v196_v41, %v195_v40 }
  0x1a   : > { %v2684_v37 = vpack.c.bf16 %v186_v33, %v185_v32  ;;  %v178_v39 = vld [vmem:[%s2618_s17 + $0x68] sm:$0xff]  ;;  %v204_v44 = vld [vmem:[%s2618_s17 + $0x2d8] sm:$0xff]  ;;  %v187_v47 = vld [vmem:[%s2618_s17 + $0x150] sm:$0xff] }
  0x1b   : > { %v2696_v42 = vpack.c.bf16 %v178_v39, %v177_v38  ;;  %v2702_v46 = vpack.c.bf16 %v204_v44, %v203_v43  ;;  %v188_v48 = vld [vmem:[%s2618_s17 + $0x158] sm:$0xff]  ;;  %v179_v49 = vld [vmem:[%s2618_s17 + $0x90] sm:$0xff]  ;;  %v2327_v53 = vld [vmem:[%s2618_s17 + $0x20] sm:$0xff] }
  0x1c   : > { %264 = vrot.lane.b32.xlu0 %v2640_v13, %s2582_s18  ;;  %3542 = vst [vmem:[#allocation3_spill] sm:$0xff] %v2684_v37  ;;  %v180_v50 = vld [vmem:[%s2618_s17 + $0x98] sm:$0xff]  ;;  %v2714_v51 = vpack.c.bf16 %v188_v48, %v187_v47  ;;  %v2328_v56 = vld [vmem:[%s2618_s17 + $0x48] sm:$0xff]  ;;  %v2329_v57 = vld [vmem:[%s2618_s17 + $0x50] sm:$0xff] }
  0x1d   : > { %240 = vrot.lane.b32.xlu1 %v2642_v14, %s2582_s18  ;;  %266 = vrot.lane.b32.xlu2 %v2654_v19, %s2582_s18  ;;  %v2326_v52 = vld [vmem:[%s2618_s17 + $0x18] sm:$0xff]  ;;  %v2718_v54 = vpack.c.bf16 %v180_v50, %v179_v49  ;;  %v2331_v59 = vld [vmem:[%s2618_s17 + $0x80] sm:$0xff]  ;;  %v2732_v60 = vpack.c.bf16 %v2329_v57, %v2328_v56 }
  0x1e   : > { %3543 = vst [vmem:[#allocation4_spill] sm:$0xff] %v2714_v51  ;;  %v2722_v55 = vpack.c.bf16 %v2327_v53, %v2326_v52  ;;  %v2330_v58 = vld [vmem:[%s2618_s17 + $0x78] sm:$0xff]  ;;  %v2332_v62 = vld [vmem:[%s2618_s17 + $0xa8] sm:$0xff]  ;;  %v2333_v63 = vld [vmem:[%s2618_s17 + $0xb0] sm:$0xff] }
  0x1f   : > { %v2734_v61 = vpack.c.bf16 %v2331_v59, %v2330_v58  ;;  %v2309_v0 = vld [vmem:[%s3531_s1 + $0x4] sm:$0x3]  ;;  %v2745_v1 = vpack.c.bf16 %v2333_v63, %v2332_v62  ;;  %v2358_v4 = vld [vmem:[%s3531_s1 + $0x6] sm:$0x3]  ;;  %v221_v6 = vld [vmem:[%s3531_s1] sm:$0x3] }
  0x20   : > { %v656_v2 = vand.u32 %v2309_v0, %v2679_v34  ;;  %v879_v7 = vand.u32 %v2358_v4, %v2679_v34  ;;  %v466_v8 = vand.u32 %v2679_v34, %v221_v6  ;;  %v2375_v9 = vld [vmem:[%s3531_s1 + $0x8] sm:$0x3]  ;;  %v2337_v17 = vld [vmem:[%s2618_s17 + $0x110] sm:$0xff]  ;;  %v2334_v25 = vld [vmem:[%s2618_s17 + $0xd8] sm:$0xff] }
  0x21   : > { %v1101_v10 = vand.u32 %v2375_v9, %v2679_v34  ;;  %v2336_v16 = vld [vmem:[%s2618_s17 + $0x108] sm:$0xff]  ;;  %v2335_v26 = vld [vmem:[%s2618_s17 + $0xe0] sm:$0xff]  ;;  %v2338_v31 = vld [vmem:[%s2618_s17 + $0x138] sm:$0xff] }
  0x22   : > { %665 = vmatpush.bf16.msrb.mxu2 %v656_v2  ;;  %888 = vmatpush.bf16.msrb.mxu3 %v879_v7  ;;  %v2766_v18 = vpack.c.bf16 %v2337_v17, %v2336_v16  ;;  %v2774_v27 = vpack.c.bf16 %v2335_v26, %v2334_v25  ;;  %v2339_v32 = vld [vmem:[%s2618_s17 + $0x140] sm:$0xff]  ;;  %v2473_v40 = vld [vmem:[%s3531_s1 + $0xc] sm:$0x3]  ;;  %v2490_v47 = vld [vmem:[%s3531_s1 + $0xe] sm:$0x3] }
  0x23   : > { %475 = vmatpush.bf16.msrb.mxu1 %v466_v8  ;;  %1110 = vmatpush.bf16.msrb.mxu0 %v1101_v10  ;;  %v2782_v33 = vpack.c.bf16 %v2339_v32, %v2338_v31  ;;  %v1546_v43 = vand.u32 %v2473_v40, %v2679_v34  ;;  %v2424_v48 = vld [vmem:[%s3531_s1 + $0xa] sm:$0x3]  ;;  %v1768_v49 = vand.u32 %v2490_v47, %v2679_v34  ;;  %v2539_v56 = vld [vmem:[%s3531_s1 + $0x10] sm:$0x3]  ;;  %v2342_v57 = vld [vmem:[%s2618_s17 + $0x198] sm:$0xff] }
  0x24   : > { %250 = vrot.lane.b32.xlu0 %v2658_v22, %s2582_s18  ;;  %v1323_v50 = vand.u32 %v2424_v48, %v2679_v34  ;;  %v2343_v58 = vld [vmem:[%s2618_s17 + $0x1a0] sm:$0xff]  ;;  %v1990_v59 = vand.u32 %v2539_v56, %v2679_v34  ;;  %v558_v4 = vld [vmem:[%s2618_s17 + $0x9] sm:$0xff]  ;;  %v559_v16 = vld [vmem:[%s2618_s17 + $0x31] sm:$0xff] }
  0x25   : > { %242 = vrot.lane.b32.xlu1 %v2660_v23, %s2582_s18  ;;  %260 = vrot.lane.b32.xlu2 %v2675_v29, %s2582_s18  ;;  %v2812_v62 = vpack.c.bf16 %v2343_v58, %v2342_v57  ;;  %v557_v2 = vld [vmem:[%s2618_s17 + $0x1] sm:$0xff]  ;;  %v2341_v34 = vld [vmem:[%s2618_s17 + $0x170] sm:$0xff] }
  0x26   : > { %v2340_v6 = vld [vmem:[%s2618_s17 + $0x168] sm:$0xff]  ;;  %v589_v8 = vpack.c.bf16 %v558_v4, %v557_v2  ;;  %v2345_v10 = vld [vmem:[%s2618_s17 + $0x1d0] sm:$0xff]  ;;  %v560_v17 = vld [vmem:[%s2618_s17 + $0x39] sm:$0xff] }
  0x27   : > { %v2822_v7 = vpack.c.bf16 %v2341_v34, %v2340_v6  ;;  %v2344_v9 = vld [vmem:[%s2618_s17 + $0x1c8] sm:$0xff]  ;;  %v2349_v26 = vld [vmem:[%s2618_s17 + $0x230] sm:$0xff]  ;;  %v564_v31 = vld [vmem:[%s2618_s17 + $0x99] sm:$0xff] }
  0x28   : > { %v2348_v25 = vld [vmem:[%s2618_s17 + $0x228] sm:$0xff]  ;;  %v2346_v32 = vld [vmem:[%s2618_s17 + $0x1f8] sm:$0xff]  ;;  %v2351_v40 = vld [vmem:[%s2618_s17 + $0x260] sm:$0xff] }
  0x29   : > { %v566_v47 = vld [vmem:[%s2618_s17 + $0xc9] sm:$0xff]  ;;  %v567_v56 = vld [vmem:[%s2618_s17 + $0xf1] sm:$0xff]  ;;  %v568_v57 = vld [vmem:[%s2618_s17 + $0xf9] sm:$0xff] }
  0x2a   : > { %v2354_v6 = vld [vmem:[%s2618_s17 + $0x2b8] sm:$0xff]  ;;  %v2355_v34 = vld [vmem:[%s2618_s17 + $0x2c0] sm:$0xff] }
  0x2c   : > { %268 = vrot.lane.b32.xlu0 %v2682_v36, %s2582_s18 }
  0x2d   : > { %252 = vrot.lane.b32.xlu1 %v2684_v37, %s2582_s18  ;;  %244 = vrot.lane.b32.xlu2 %v2696_v42, %s2582_s18 }
  0x34   : > { %262 = vrot.lane.b32.xlu0 %v2700_v45, %s2582_s18 }
  0x35   : > { %270 = vrot.lane.b32.xlu1 %v2702_v46, %s2582_s18  ;;  %254 = vrot.lane.b32.xlu2 %v2714_v51, %s2582_s18 }
  0x3c   : > { %246 = vrot.lane.b32.xlu0 %v2718_v54, %s2582_s18 }
  0x3d   : > { %1020 = vrot.lane.b32.xlu1 %v2722_v55, %s2582_s18  ;;  %1022 = vrot.lane.b32.xlu2 %v2732_v60, %s2582_s18 }
  0x44   : > { %1024 = vrot.lane.b32.xlu0 %v2734_v61, %s2582_s18 }
  0x45   : > { %1026 = vrot.lane.b32.xlu1 %v2745_v1, %s2582_s18  ;;  %1028 = vrot.lane.b32.xlu2 %v2774_v27, %s2582_s18 }
  0x4c   : > { %1030 = vrot.lane.b32.xlu0 %v2766_v18, %s2582_s18 }
  0x4d   : > { %1032 = vrot.lane.b32.xlu1 %v2782_v33, %s2582_s18  ;;  %1034 = vrot.lane.b32.xlu2 %v2822_v7, %s2582_s18 }
  0x54   : > { %1036 = vrot.lane.b32.xlu0 %v2812_v62, %s2582_s18 }
  0x6f   : > { %v259_v20 = vpop.permute.xlu2 %258 }
  0x77   : > { %v267_v30 = vpop.permute.xlu2 %266 }
  0x7f   : > { %v261_v38 = vpop.permute.xlu2 %260 }
  0x86   : > { %v257_v11 = vpop.permute.xlu0 %256 }
  0x87   : > { %v249_v15 = vpop.permute.xlu1 %248  ;;  %2285 = vmatmul.msk.bf16.vlgmr.msra.gmra.mxu2 %vm272_vm2, %v257_v11  ;;  %v245_v44 = vpop.permute.xlu2 %244  ;;  %v2831_v11 = vpack.c.bf16 %v2345_v10, %v2344_v9 }
  0x88   : > { %2281 = vmatmul.msk.bf16.vlgmr.msra.gmra.mxu1 %vm272_vm2, %v249_v15  ;;  %1555 = vmatpush.bf16.msra.mxu2 %v1546_v43 }
  0x89   : > { %1332 = vmatpush.bf16.msra.mxu1 %v1323_v50  ;;  %1038 = vrot.lane.b32.xlu1 %v2831_v11, %s2582_s18 }
  0x8e   : > { %v265_v21 = vpop.permute.xlu0 %264 }
  0x8f   : > { %v241_v24 = vpop.permute.xlu1 %240  ;;  %2289 = vmatmul.msk.bf16.vlgmr.msra.gmra.mxu3 %vm272_vm2, %v265_v21  ;;  %v255_v53 = vpop.permute.xlu2 %254  ;;  %v562_v21 = vld [vmem:[%s2618_s17 + $0x69] sm:$0xff] }
  0x90   : > { %2277 = vmatmul.msk.bf16.vlgmr.msra.gmra.mxu0 %vm272_vm2, %v241_v24  ;;  %1777 = vmatpush.bf16.msra.mxu3 %v1768_v49 }
  0x91   : > { %1999 = vmatpush.bf16.msra.mxu0 %v1990_v59 }
  0x96   : > { %v251_v28 = vpop.permute.xlu0 %250 }
  0x97   : > { %2286 = vmatmul.msk.bf16.gmra.mxu2 %vm272_vm2, %v259_v20  ;;  %v243_v35 = vpop.permute.xlu1 %242  ;;  %v1023_v20 = vpop.permute.xlu2 %1022 }
  0x98   : > { %2282 = vmatmul.msk.bf16.gmra.mxu1 %vm272_vm2, %v251_v28  ;;  %v2859_v28 = vpack.c.bf16 %v2349_v26, %v2348_v25  ;;  %v2353_v25 = vld [vmem:[%s2618_s17 + $0x290] sm:$0xff] }
  0x9a   : > { %1042 = vrot.lane.b32.xlu0 %v2859_v28, %s2582_s18 }
  0x9e   : > { %v269_v41 = vpop.permute.xlu0 %268 }
  0x9f   : > { %2290 = vmatmul.msk.bf16.gmra.mxu3 %vm272_vm2, %v267_v30  ;;  %v253_v39 = vpop.permute.xlu1 %252  ;;  %v563_v30 = vld [vmem:[%s2618_s17 + $0x91] sm:$0xff] }
  0xa0   : > { %2278 = vmatmul.msk.bf16.gmra.mxu0 %vm272_vm2, %v243_v35  ;;  %v2347_v35 = vld [vmem:[%s2618_s17 + $0x200] sm:$0xff] }
  0xa6   : > { %v263_v52 = vpop.permute.xlu0 %262 }
  0xa7   : > { %2287 = vmatmul.msk.bf16.gmra.mxu2 %vm272_vm2, %v261_v38  ;;  %v271_v63 = vpop.permute.xlu1 %270  ;;  %v2870_v38 = vpack.c.bf16 %v564_v31, %v563_v30 }
  0xa8   : > { %2283 = vmatmul.msk.bf16.gmra.mxu1 %vm272_vm2, %v253_v39  ;;  %v2872_v39 = vpack.c.bf16 %v2347_v35, %v2346_v32  ;;  %v2356_v35 = vld [vmem:[%s2618_s17 + $0x2e8] sm:$0xff] }
  0xaa   : > { %1040 = vrot.lane.b32.xlu2 %v2872_v39, %s2582_s18 }
  0xae   : > { %v247_v0 = vpop.permute.xlu0 %246 }
  0xaf   : > { %2291 = vmatmul.msk.bf16.gmra.mxu3 %vm272_vm2, %v269_v41  ;;  %v1021_v15 = vpop.permute.xlu1 %1020 }
  0xb0   : > { %2279 = vmatmul.msk.bf16.gmra.mxu0 %vm272_vm2, %v245_v44  ;;  %v565_v44 = vld [vmem:[%s2618_s17 + $0xc1] sm:$0xff] }
  0xb1   : > { %v2891_v48 = vpack.c.bf16 %v566_v47, %v565_v44 }
  0xb7   : > { %2288 = vmatmul.msk.bf16.gmra.mxu2 %vm272_vm2, %v263_v52  ;;  %v1027_v43 = vpop.permute.xlu1 %1026  ;;  %v1029_v52 = vpop.permute.xlu2 %1028 }
  0xb8   : > { %2284 = vmatmul.msk.bf16.gmra.mxu1 %vm272_vm2, %v255_v53 }
  0xbf   : > { %2292 = vmatmul.msk.bf16.gmra.mxu3 %vm272_vm2, %v271_v63  ;;  %v2914_v63 = vpack.c.bf16 %v568_v57, %v567_v56  ;;  %v572_v56 = vld [vmem:[%s2618_s17 + $0x159] sm:$0xff] }
  0xc0   : > { %2280 = vmatmul.msk.bf16.gmra.mxu0 %vm272_vm2, %v247_v0 }
  0xc7   : > { %2310 = vmatmul.msk.bf16.vlgmr.msrb.gmra.mxu2 %vm272_vm2, %v589_v8  ;;  %v2930_v8 = vpack.c.bf16 %v2355_v34, %v2354_v6 }
  0xc8   : > { %2293 = vmatmul.msk.bf16.vlgmr.msrb.gmra.mxu1 %vm272_vm2, %v2642_v14  ;;  %v2840_v14 = vpack.c.bf16 %v560_v17, %v559_v16  ;;  %v569_v16 = vld [vmem:[%s2618_s17 + $0x121] sm:$0xff]  ;;  %v570_v17 = vld [vmem:[%s2618_s17 + $0x129] sm:$0xff] }
  0xc9   : > { %1048 = vrot.lane.b32.xlu0 %v2930_v8, %s2582_s18  ;;  %v2949_v26 = vpack.c.bf16 %v570_v17, %v569_v16 }
  0xcb   : > { %3546 = vst [vmem:[#allocation7_spill] sm:$0xff] %v2949_v26 }
  0xcf   : > { %2359 = vmatmul.msk.bf16.vlgmr.msrb.gmra.mxu3 %vm272_vm2, %v2722_v55  ;;  %v561_v55 = vld [vmem:[%s2618_s17 + $0x61] sm:$0xff] }
  0xd0   : > { %2376 = vmatmul.msk.bf16.vlgmr.msrb.gmra.mxu0 %vm272_vm2, %v1021_v15  ;;  %v2851_v24 = vpack.c.bf16 %v562_v21, %v561_v55  ;;  %v2352_v21 = vld [vmem:[%s2618_s17 + $0x288] sm:$0xff] }
  0xd1   : > { %1689 = vrot.lane.b32.xlu0 %v2696_v42, %s2582_s18 }
  0xd7   : > { %2311 = vmatmul.msk.bf16.gmra.mxu2 %vm272_vm2, %v2840_v14 }
  0xd8   : > { %2294 = vmatmul.msk.bf16.gmra.mxu1 %vm272_vm2, %v2660_v23 }
  0xd9   : > { %1695 = vrot.lane.b32.xlu0 %v2658_v22, %s2582_s18 }
  0xdf   : > { %2360 = vmatmul.msk.bf16.gmra.mxu3 %vm272_vm2, %v2732_v60  ;;  %v1025_v60 = vpop.permute.xlu0 %1024 }
  0xe0   : > { %2377 = vmatmul.msk.bf16.gmra.mxu0 %vm272_vm2, %v1023_v20 }
  0xe1   : > { %1701 = vrot.lane.b32.xlu0 %v2623_v3, %s2582_s18 }
  0xe7   : > { %2312 = vmatmul.msk.bf16.gmra.mxu2 %vm272_vm2, %v2851_v24  ;;  %v1031_v9 = vpop.permute.xlu0 %1030 }
  0xe8   : > { %2295 = vmatmul.msk.bf16.gmra.mxu1 %vm272_vm2, %v2696_v42 }
  0xef   : > { %2361 = vmatmul.msk.bf16.gmra.mxu3 %vm272_vm2, %v2734_v61  ;;  %v2350_v61 = vld [vmem:[%s2618_s17 + $0x258] sm:$0xff] }
  0xf0   : > { %2378 = vmatmul.msk.bf16.gmra.mxu0 %vm272_vm2, %v1025_v60  ;;  %v2882_v41 = vpack.c.bf16 %v2351_v40, %v2350_v61  ;;  %v2951_v60 = vpack.c.bf16 %v2353_v25, %v2352_v21  ;;  %v2357_v61 = vld [vmem:[%s2618_s17 + $0x2f0] sm:$0xff]  ;;  %v1035_v21 = vpop.permute.xlu2 %1034 }
  0xf1   : > { %v2971_v40 = vpack.c.bf16 %v2357_v61, %v2356_v35  ;;  %v573_v61 = vld [vmem:[%s2618_s17 + $0x181] sm:$0xff] }
  0xf2   : > { %1044 = vrot.lane.b32.xlu1 %v2882_v41, %s2582_s18  ;;  %1046 = vrot.lane.b32.xlu2 %v2951_v60, %s2582_s18 }
  0xf7   : > { %2313 = vmatmul.msk.bf16.gmra.mxu2 %vm272_vm2, %v2870_v38 }
  0xf8   : > { %2296 = vmatmul.msk.bf16.gmra.mxu1 %vm272_vm2, %v2718_v54 }
  0xfa   : > { %1050 = vrot.lane.b32.xlu1 %v2971_v40, %s2582_s18  ;;  %1687 = vrot.lane.b32.xlu2 %v2660_v23, %s2582_s18 }
  0xff   : > { %2362 = vmatmul.msk.bf16.gmra.mxu3 %vm272_vm2, %v2745_v1 }
 0x100   : > { %2379 = vmatmul.msk.bf16.gmra.mxu0 %vm272_vm2, %v1027_v43  ;;  %v1033_v43 = vpop.permute.xlu1 %1032 }
 0x102   : > { %1691 = vrot.lane.b32.xlu1 %v2718_v54, %s2582_s18  ;;  %1693 = vrot.lane.b32.xlu2 %v2626_v5, %s2582_s18 }
 0x105   : > { %v2893_v49 = vpop.f32.mrf.mxu1 }
 0x107   : > { %2314 = vmatmul.msk.bf16.gmra.mxu2 %vm272_vm2, %v2891_v48 }
 0x108   : > { %2297 = vmatmul.msk.bf16.gmra.mxu1 %vm272_vm2, %v2626_v5 }
 0x10a   : > { %v2899_v50 = vpop.f32.mrf.mxu2  ;;  %1697 = vrot.lane.b32.xlu1 %v2684_v37, %s2582_s18  ;;  %1699 = vrot.lane.b32.xlu2 %v2714_v51, %s2582_s18 }
 0x10d   : > { %v2901_v53 = vpop.f32.mrf.mxu1  ;;  %v2903_v1 = vpop.f32.mrf.mxu0 }
 0x10f   : > { %2363 = vmatmul.msk.bf16.gmra.mxu3 %vm272_vm2, %v2774_v27 }
 0x110   : > { %2380 = vmatmul.msk.bf16.gmra.mxu0 %vm272_vm2, %v1029_v52  ;;  %v571_v52 = vld [vmem:[%s2618_s17 + $0x151] sm:$0xff] }
 0x111   : > { %v2992_v34 = vpack.c.bf16 %v572_v56, %v571_v52 }
 0x112   : > { %v2910_v58 = vpop.f32.mrf.mxu2  ;;  %v2912_v59 = vpop.f32.mrf.mxu3  ;;  %1703 = vrot.lane.b32.xlu1 %v2638_v12, %s2582_s18 }
 0x113   : > { %3549 = vst [vmem:[#allocation10_spill] sm:$0xff] %v2992_v34 }
 0x115   : > { %v2916_v0 = vpop.f32.mrf.mxu1  ;;  %v2918_v2 = vpop.f32.mrf.mxu0 }
 0x117   : > { %2315 = vmatmul.msk.bf16.gmra.mxu2 %vm272_vm2, %v2914_v63 }
 0x118   : > { %2298 = vmatmul.msk.bf16.gmra.mxu1 %vm272_vm2, %v2658_v22 }
 0x11a   : > { %v2924_v27 = vpop.f32.mrf.mxu2  ;;  %v2926_v4 = vpop.f32.mrf.mxu3 }
 0x11b   : > { %3544 = vst [vmem:[#allocation5_spill] sm:$0xff] %v2926_v4 }
 0x11d   : > { %v2932_v10 = vpop.f32.mrf.mxu1  ;;  %v2934_v15 = vpop.f32.mrf.mxu0 }
 0x11f   : > { %2364 = vmatmul.msk.bf16.gmra.mxu3 %vm272_vm2, %v2766_v18 }
 0x120   : > { %2381 = vmatmul.msk.bf16.gmra.mxu0 %vm272_vm2, %v1031_v9 }
 0x122   : > { %v2943_v20 = vpop.f32.mrf.mxu2  ;;  %v2945_v55 = vpop.f32.mrf.mxu3 }
 0x123   : > { %3545 = vst [vmem:[#allocation6_spill] sm:$0xff] %v2945_v55 }
 0x125   : > { %v2953_v30 = vpop.f32.mrf.mxu0  ;;  %v2955_v31 = vpop.f32.mrf.mxu1 }
 0x127   : > { %2316 = vmatmul.msk.bf16.gmra.mxu2 %vm272_vm2, %v2949_v26 }
 0x128   : > { %2299 = vmatmul.msk.bf16.gmra.mxu1 %vm272_vm2, %v2684_v37 }
 0x12a   : > { %v2965_v18 = vpop.f32.mrf.mxu2  ;;  %v2967_v32 = vpop.f32.mrf.mxu3 }
 0x12b   : > { %3547 = vst [vmem:[#allocation8_spill] sm:$0xff] %v2967_v32 }
 0x12d   : > { %v2973_v44 = vpop.f32.mrf.mxu0  ;;  %v2975_v47 = vpop.f32.mrf.mxu1 }
 0x12f   : > { %2365 = vmatmul.msk.bf16.gmra.mxu3 %vm272_vm2, %v2782_v33 }
 0x130   : > { %2382 = vmatmul.msk.bf16.gmra.mxu0 %vm272_vm2, %v1033_v43  ;;  %v574_v43 = vld [vmem:[%s2618_s17 + $0x189] sm:$0xff] }
 0x132   : > { %v2988_v57 = vpop.f32.mrf.mxu2  ;;  %v2990_v6 = vpop.f32.mrf.mxu3 }
 0x133   : > { %3548 = vst [vmem:[#allocation9_spill] sm:$0xff] %v2990_v6 }
 0x135   : > { %v2994_v9 = vpop.f32.mrf.mxu0  ;;  %v2996_v16 = vpop.f32.mrf.mxu1 }
 0x137   : > { %2317 = vmatmul.msk.bf16.gmra.mxu2 %vm272_vm2, %v2992_v34 }
 0x138   : > { %2300 = vmatmul.msk.bf16.gmra.mxu1 %vm272_vm2, %v2714_v51 }
 0x13a   : > { %v3008_v33 = vpop.f32.mrf.mxu2  ;;  %v3010_v17 = vpop.f32.mrf.mxu3 }
 0x13b   : > { %3550 = vst [vmem:[#allocation11_spill] sm:$0xff] %v3010_v17  ;;  %v3029_v17 = vpack.c.bf16 %v574_v43, %v573_v61 }
 0x13d   : > { %v3012_v25 = vpop.f32.mrf.mxu0  ;;  %v3014_v35 = vpop.f32.mrf.mxu1  ;;  %3552 = vst [vmem:[#allocation13_spill] sm:$0xff] %v3029_v17 }
 0x13f   : > { %2366 = vmatmul.msk.bf16.gmra.mxu3 %vm272_vm2, %v2822_v7 }
 0x140   : > { %2383 = vmatmul.msk.bf16.gmra.mxu0 %vm272_vm2, %v1035_v21 }
 0x142   : > { %v3025_v52 = vpop.f32.mrf.mxu2  ;;  %v3027_v56 = vpop.f32.mrf.mxu3 }
 0x143   : > { %3551 = vst [vmem:[#allocation12_spill] sm:$0xff] %v3027_v56  ;;  %v1037_v56 = vpop.permute.xlu0 %1036 }
 0x145   : > { %v3031_v34 = vpop.f32.mrf.mxu0  ;;  %v477_v6 = vpop.f32.mrf.mxu1 }
 0x146   : > { %v478_v7 = vadd.f32 %v477_v6, %v2903_v1  ;;  %v575_v1 = vld [vmem:[%s2618_s17 + $0x1b1] sm:$0xff]  ;;  %v576_v6 = vld [vmem:[%s2618_s17 + $0x1b9] sm:$0xff] }
 0x147   : > { %2318 = vmatmul.msk.bf16.gmra.mxu2 %vm272_vm2, %v3029_v17  ;;  %v3048_v4 = vpack.c.bf16 %v576_v6, %v575_v1 }
 0x148   : > { %2301 = vmatmul.msk.bf16.gmra.mxu1 %vm272_vm2, %v2623_v3 }
 0x149   : > { %3554 = vst [vmem:[#allocation15_spill] sm:$0xff] %v3048_v4 }
 0x14a   : > { %v3040_v21 = vpop.f32.mrf.mxu3  ;;  %v667_v61 = vpop.f32.mrf.mxu2 }
 0x14b   : > { %3553 = vst [vmem:[#allocation14_spill] sm:$0xff] %v3040_v21  ;;  %v747_v43 = vadd.f32 %v667_v61, %v478_v7 }
 0x14d   : > { %v479_v51 = vpop.f32.mrf.mxu1  ;;  %v1112_v32 = vpop.f32.mrf.mxu0 }
 0x14e   : > { %v480_v26 = vadd.f32 %v479_v51, %v2918_v2 }
 0x14f   : > { %2367 = vmatmul.msk.bf16.gmra.mxu3 %vm272_vm2, %v2812_v62 }
 0x150   : > { %2384 = vmatmul.msk.bf16.gmra.mxu0 %vm272_vm2, %v1037_v56 }
 0x152   : > { %v669_v17 = vpop.f32.mrf.mxu2  ;;  %v890_v55 = vpop.f32.mrf.mxu3 }
 0x153   : > { %v748_v37 = vadd.f32 %v669_v17, %v480_v26  ;;  %v970_v3 = vadd.f32 %v890_v55, %v747_v43  ;;  %v1039_v17 = vpop.permute.xlu1 %1038 }
 0x155   : > { %v482_v21 = vpop.f32.mrf.mxu1  ;;  %v1114_v7 = vpop.f32.mrf.mxu0  ;;  %v3050_v61 = vadd.f32 %v1112_v32, %v970_v3  ;;  %v578_v32 = vld [vmem:[%s2618_s17 + $0x1e9] sm:$0xff] }
 0x156   : > { %v483_v51 = vadd.f32 %v482_v21, %v2934_v15  ;;  %v577_v15 = vld [vmem:[%s2618_s17 + $0x1e1] sm:$0xff] }
 0x157   : > { %3555 = vst [vmem:[#allocation16_spill] sm:$0xff] %v3050_v61  ;;  %2319 = vmatmul.msk.bf16.gmra.mxu2 %vm272_vm2, %v3048_v4 }
 0x158   : > { %2302 = vmatmul.msk.bf16.gmra.mxu1 %vm272_vm2, %v2638_v12 }
 0x15a   : > { %v672_v62 = vpop.f32.mrf.mxu2  ;;  %v892_v2 = vpop.f32.mrf.mxu3 }
 0x15b   : > { %v749_v26 = vadd.f32 %v672_v62, %v483_v51  ;;  %v971_v55 = vadd.f32 %v892_v2, %v748_v37  ;;  %v3065_v51 = vpack.c.bf16 %v578_v32, %v577_v15 }
 0x15d   : > { %v484_v56 = vpop.f32.mrf.mxu1  ;;  %v1117_v43 = vpop.f32.mrf.mxu0  ;;  %v3057_v1 = vadd.f32 %v1114_v7, %v971_v55 }
 0x15e   : > { %v485_v3 = vadd.f32 %v484_v56, %v2953_v30 }
 0x15f   : > { %2368 = vmatmul.msk.bf16.gmra.mxu3 %vm272_vm2, %v2831_v11 }
 0x160   : > { %2385 = vmatmul.msk.bf16.gmra.mxu0 %vm272_vm2, %v1039_v17  ;;  %v1041_v17 = vpop.permute.xlu2 %1040 }
 0x162   : > { %v674_v21 = vpop.f32.mrf.mxu2  ;;  %v895_v6 = vpop.f32.mrf.mxu3 }
 0x163   : > { %v750_v4 = vadd.f32 %v674_v21, %v485_v3  ;;  %v972_v61 = vadd.f32 %v895_v6, %v749_v26 }
 0x165   : > { %v487_v37 = vpop.f32.mrf.mxu1  ;;  %v1119_v62 = vpop.f32.mrf.mxu0  ;;  %v3067_v7 = vadd.f32 %v1117_v43, %v972_v61  ;;  %v580_v43 = vld [vmem:[%s2618_s17 + $0x219] sm:$0xff] }
 0x166   : > { %v488_v30 = vadd.f32 %v487_v37, %v2973_v44  ;;  %v579_v44 = vld [vmem:[%s2618_s17 + $0x211] sm:$0xff] }
 0x167   : > { %2320 = vmatmul.msk.bf16.gmra.mxu2 %vm272_vm2, %v3065_v51  ;;  %v3082_v37 = vpack.c.bf16 %v580_v43, %v579_v44  ;;  %v582_v44 = vld [vmem:[%s2618_s17 + $0x249] sm:$0xff] }
 0x168   : > { %2303 = vmatmul.msk.bf16.gmra.mxu1 %vm272_vm2, %v2675_v29 }
 0x16a   : > { %v677_v11 = vpop.f32.mrf.mxu2  ;;  %v897_v2 = vpop.f32.mrf.mxu3 }
 0x16b   : > { %v751_v55 = vadd.f32 %v677_v11, %v488_v30  ;;  %v973_v26 = vadd.f32 %v897_v2, %v750_v4 }
 0x16d   : > { %v489_v56 = vpop.f32.mrf.mxu1  ;;  %v1122_v3 = vpop.f32.mrf.mxu0  ;;  %v3074_v15 = vadd.f32 %v1119_v62, %v973_v26 }
 0x16e   : > { %v490_v61 = vadd.f32 %v489_v56, %v2994_v9  ;;  %v1043_v26 = vpop.permute.xlu0 %1042 }
 0x16f   : > { %2369 = vmatmul.msk.bf16.gmra.mxu3 %vm272_vm2, %v2872_v39 }
 0x170   : > { %2386 = vmatmul.msk.bf16.gmra.mxu0 %vm272_vm2, %v1041_v17 }
 0x172   : > { %v679_v32 = vpop.f32.mrf.mxu2  ;;  %v900_v29 = vpop.f32.mrf.mxu3 }
 0x173   : > { %v752_v21 = vadd.f32 %v679_v32, %v490_v61  ;;  %v974_v6 = vadd.f32 %v900_v29, %v751_v55 }
 0x175   : > { %v492_v4 = vpop.f32.mrf.mxu1  ;;  %v1124_v30 = vpop.f32.mrf.mxu0  ;;  %v3084_v62 = vadd.f32 %v1122_v3, %v974_v6 }
 0x176   : > { %v493_v9 = vadd.f32 %v492_v4, %v3012_v25  ;;  %v581_v25 = vld [vmem:[%s2618_s17 + $0x241] sm:$0xff] }
 0x177   : > { %2321 = vmatmul.msk.bf16.gmra.mxu2 %vm272_vm2, %v3082_v37  ;;  %v3099_v6 = vpack.c.bf16 %v582_v44, %v581_v25 }
 0x178   : > { %2304 = vmatmul.msk.bf16.gmra.mxu1 %vm272_vm2, %v2700_v45 }
 0x17a   : > { %v682_v39 = vpop.f32.mrf.mxu2  ;;  %v902_v11 = vpop.f32.mrf.mxu3 }
 0x17b   : > { %v753_v2 = vadd.f32 %v682_v39, %v493_v9  ;;  %v975_v55 = vadd.f32 %v902_v11, %v752_v21 }
 0x17d   : > { %v494_v17 = vpop.f32.mrf.mxu1  ;;  %v1127_v56 = vpop.f32.mrf.mxu0  ;;  %v3091_v61 = vadd.f32 %v1124_v30, %v975_v55 }
 0x17e   : > { %v495_v3 = vadd.f32 %v494_v17, %v3031_v34 }
 0x17f   : > { %2370 = vmatmul.msk.bf16.gmra.mxu3 %vm272_vm2, %v2859_v28 }
 0x180   : > { %2387 = vmatmul.msk.bf16.gmra.mxu0 %vm272_vm2, %v1043_v26 }
 0x182   : > { %v684_v43 = vpop.f32.mrf.mxu2  ;;  %v905_v45 = vpop.f32.mrf.mxu3 }
 0x183   : > { %v754_v32 = vadd.f32 %v684_v43, %v495_v3  ;;  %v976_v29 = vadd.f32 %v905_v45, %v753_v2  ;;  %v1045_v2 = vpop.permute.xlu1 %1044  ;;  %v584_v3 = vld [vmem:[%s2618_s17 + $0x279] sm:$0xff] }
 0x185   : > { %v497_v21 = vpop.f32.mrf.mxu1  ;;  %v1129_v4 = vpop.f32.mrf.mxu0  ;;  %v3101_v30 = vadd.f32 %v1127_v56, %v976_v29  ;;  %v583_v56 = vld [vmem:[%s2618_s17 + $0x271] sm:$0xff] }
 0x186   : > { %v498_v28 = vadd.f32 %v497_v21, %v2893_v49  ;;  %v3116_v45 = vpack.c.bf16 %v584_v3, %v583_v56 }
 0x187   : > { %2322 = vmatmul.msk.bf16.gmra.mxu2 %vm272_vm2, %v3099_v6 }
 0x188   : > { %2305 = vmatmul.msk.bf16.gmra.mxu1 %vm272_vm2, %v2640_v13 }
 0x18a   : > { %v687_v34 = vpop.f32.mrf.mxu2  ;;  %v907_v9 = vpop.f32.mrf.mxu3 }
 0x18b   : > { %v755_v39 = vadd.f32 %v687_v34, %v498_v28  ;;  %v977_v11 = vadd.f32 %v907_v9, %v754_v32  ;;  %v1047_v9 = vpop.permute.xlu2 %1046 }
 0x18d   : > { %v499_v55 = vpop.f32.mrf.mxu1  ;;  %v1132_v26 = vpop.f32.mrf.mxu0  ;;  %v3108_v17 = vadd.f32 %v1129_v4, %v977_v11 }
 0x18e   : > { %v500_v13 = vadd.f32 %v499_v55, %v2901_v53  ;;  %v585_v55 = vld [vmem:[%s2618_s17 + $0x2a1] sm:$0xff] }
 0x18f   : > { %2371 = vmatmul.msk.bf16.gmra.mxu3 %vm272_vm2, %v2882_v41 }
 0x190   : > { %2388 = vmatmul.msk.bf16.gmra.mxu0 %vm272_vm2, %v1045_v2 }
 0x192   : > { %v689_v25 = vpop.f32.mrf.mxu2  ;;  %v910_v49 = vpop.f32.mrf.mxu3 }
 0x193   : > { %v756_v44 = vadd.f32 %v689_v25, %v500_v13  ;;  %v978_v43 = vadd.f32 %v910_v49, %v755_v39 }
 0x195   : > { %v502_v32 = vpop.f32.mrf.mxu1  ;;  %v1134_v29 = vpop.f32.mrf.mxu0  ;;  %v3118_v21 = vadd.f32 %v1132_v26, %v978_v43  ;;  %v586_v26 = vld [vmem:[%s2618_s17 + $0x2a9] sm:$0xff] }
 0x196   : > { %v503_v41 = vadd.f32 %v502_v32, %v2916_v0  ;;  %v3133_v25 = vpack.c.bf16 %v586_v26, %v585_v55 }
 0x197   : > { %2323 = vmatmul.msk.bf16.gmra.mxu2 %vm272_vm2, %v3116_v45 }
 0x198   : > { %2306 = vmatmul.msk.bf16.gmra.mxu1 %vm272_vm2, %v2654_v19 }
 0x19a   : > { %v692_v53 = vpop.f32.mrf.mxu2  ;;  %v912_v4 = vpop.f32.mrf.mxu3 }
 0x19b   : > { %v757_v28 = vadd.f32 %v692_v53, %v503_v41  ;;  %v979_v34 = vadd.f32 %v912_v4, %v756_v44  ;;  %v1049_v53 = vpop.permute.xlu0 %1048 }
 0x19d   : > { %v504_v39 = vpop.f32.mrf.mxu1  ;;  %v1137_v11 = vpop.f32.mrf.mxu0  ;;  %v3125_v2 = vadd.f32 %v1134_v29, %v979_v34 }
 0x19e   : > { %v505_v19 = vadd.f32 %v504_v39, %v2932_v10  ;;  %v588_v39 = vld [vmem:[%s2618_s17 + $0x2d9] sm:$0xff] }
 0x19f   : > { %2372 = vmatmul.msk.bf16.gmra.mxu3 %vm272_vm2, %v2951_v60 }
 0x1a0   : > { %2389 = vmatmul.msk.bf16.gmra.mxu0 %vm272_vm2, %v1047_v9  ;;  %v587_v9 = vld [vmem:[%s2618_s17 + $0x2d1] sm:$0xff] }
 0x1a2   : > { %v694_v56 = vpop.f32.mrf.mxu2  ;;  %v915_v0 = vpop.f32.mrf.mxu3 }
 0x1a3   : > { %v758_v3 = vadd.f32 %v694_v56, %v505_v19  ;;  %v980_v13 = vadd.f32 %v915_v0, %v757_v28  ;;  %v3150_v19 = vpack.c.bf16 %v588_v39, %v587_v9 }
 0x1a5   : > { %v507_v49 = vpop.f32.mrf.mxu1  ;;  %v1139_v44 = vpop.f32.mrf.mxu0  ;;  %v3135_v43 = vadd.f32 %v1137_v11, %v980_v13 }
 0x1a6   : > { %v508_v10 = vadd.f32 %v507_v49, %v2955_v31 }
 0x1a7   : > { %2324 = vmatmul.msk.bf16.gmra.mxu2 %vm272_vm2, %v3133_v25 }
 0x1a8   : > { %2307 = vmatmul.msk.bf16.gmra.mxu1 %vm272_vm2, %v2682_v36 }
 0x1aa   : > { %v697_v60 = vpop.f32.mrf.mxu2  ;;  %v917_v32 = vpop.f32.mrf.mxu3 }
 0x1ab   : > { %v759_v29 = vadd.f32 %v697_v60, %v508_v10  ;;  %v981_v41 = vadd.f32 %v917_v32, %v758_v3  ;;  %v1051_v10 = vpop.permute.xlu1 %1050 }
 0x1ad   : > { %v509_v4 = vpop.f32.mrf.mxu1  ;;  %v1142_v28 = vpop.f32.mrf.mxu0  ;;  %v3142_v34 = vadd.f32 %v1139_v44, %v981_v41 }
 0x1ae   : > { %v510_v36 = vadd.f32 %v509_v4, %v2975_v47 }
 0x1af   : > { %2373 = vmatmul.msk.bf16.gmra.mxu3 %vm272_vm2, %v2930_v8 }
 0x1b0   : > { %2390 = vmatmul.msk.bf16.gmra.mxu0 %vm272_vm2, %v1049_v53  ;;  %v2392_v53 = vld [vmem:[%s2618_s17 + $0x19] sm:$0xff] }
 0x1b2   : > { %v699_v11 = vpop.f32.mrf.mxu2  ;;  %v920_v31 = vpop.f32.mrf.mxu3 }
 0x1b3   : > { %v760_v55 = vadd.f32 %v699_v11, %v510_v36  ;;  %v982_v26 = vadd.f32 %v920_v31, %v759_v29 }
 0x1b5   : > { %v512_v56 = vpop.f32.mrf.mxu1  ;;  %v1144_v0 = vpop.f32.mrf.mxu0  ;;  %v3152_v3 = vadd.f32 %v1142_v28, %v982_v26 }
 0x1b6   : > { %v513_v8 = vadd.f32 %v512_v56, %v2996_v16 }
 0x1b7   : > { %2325 = vmatmul.msk.bf16.gmra.mxu2 %vm272_vm2, %v3150_v19 }
 0x1b8   : > { %2308 = vmatmul.msk.bf16.gmra.mxu1 %vm272_vm2, %v2702_v46  ;;  %v2393_v46 = vld [vmem:[%s2618_s17 + $0x21] sm:$0xff] }
 0x1b9   : > { %v1256_v39 = vpack.c.bf16 %v2393_v46, %v2392_v53 }
 0x1ba   : > { %v702_v47 = vpop.f32.mrf.mxu2  ;;  %v922_v13 = vpop.f32.mrf.mxu3 }
 0x1bb   : > { %v761_v49 = vadd.f32 %v702_v47, %v513_v8  ;;  %v983_v44 = vadd.f32 %v922_v13, %v760_v55 }
 0x1bd   : > { %v514_v60 = vpop.f32.mrf.mxu1  ;;  %v1147_v32 = vpop.f32.mrf.mxu0  ;;  %v3159_v29 = vadd.f32 %v1144_v0, %v983_v44 }
 0x1be   : > { %v515_v41 = vadd.f32 %v514_v60, %v3014_v35  ;;  %v1688_v0 = vpop.permute.xlu2 %1687 }
 0x1bf   : > { %2374 = vmatmul.msk.bf16.gmra.mxu3 %vm272_vm2, %v2971_v40 }
 0x1c0   : > { %2391 = vmatmul.msk.bf16.gmra.mxu0 %vm272_vm2, %v1051_v10 }
 0x1c2   : > { %v704_v4 = vpop.f32.mrf.mxu2  ;;  %v925_v16 = vpop.f32.mrf.mxu3 }
 0x1c3   : > { %v762_v28 = vadd.f32 %v704_v4, %v515_v41  ;;  %v984_v9 = vadd.f32 %v925_v16, %v761_v49  ;;  %v2394_v49 = vld [vmem:[%s2618_s17 + $0x49] sm:$0xff] }
 0x1c5   : > { %v517_v36 = vpop.f32.mrf.mxu1  ;;  %v1149_v11 = vpop.f32.mrf.mxu0  ;;  %v3167_v31 = vadd.f32 %v1147_v32, %v984_v9  ;;  %v2462_v9 = vld [vmem:[%s2618_s17 + $0x218] sm:$0xff] }
 0x1c6   : > { %v518_v40 = vadd.f32 %v517_v36, %v2899_v50  ;;  %v2395_v50 = vld [vmem:[%s2618_s17 + $0x51] sm:$0xff] }
 0x1c7   : > { %2474 = vmatmul.msk.bf16.vlgmr.msra.gmra.mxu2 %vm272_vm2, %v2660_v23  ;;  %v1257_v41 = vpack.c.bf16 %v2395_v50, %v2394_v49 }
 0x1c8   : > { %2425 = vmatmul.msk.bf16.vlgmr.msra.gmra.mxu1 %vm272_vm2, %v1256_v39 }
 0x1ca   : > { %v707_v35 = vpop.f32.mrf.mxu2  ;;  %v927_v55 = vpop.f32.mrf.mxu3 }
 0x1cb   : > { %v763_v26 = vadd.f32 %v707_v35, %v518_v40  ;;  %v985_v56 = vadd.f32 %v927_v55, %v762_v28  ;;  %v2461_v28 = vld [vmem:[%s2618_s17 + $0x210] sm:$0xff]  ;;  %v1690_v40 = vpop.permute.xlu0 %1689 }
 0x1cd   : > { %v519_v8 = vpop.f32.mrf.mxu1  ;;  %v1152_v47 = vpop.f32.mrf.mxu0  ;;  %v3173_v13 = vadd.f32 %v1149_v11, %v985_v56  ;;  %v3189_v11 = vpack.c.bf16 %v2462_v9, %v2461_v28  ;;  %v2397_v56 = vld [vmem:[%s2618_s17 + $0x81] sm:$0xff] }
 0x1ce   : > { %v520_v23 = vadd.f32 %v519_v8, %v2910_v58  ;;  %v1692_v9 = vpop.permute.xlu1 %1691 }
 0x1cf   : > { %2491 = vmatmul.msk.bf16.vlgmr.msra.gmra.mxu3 %vm272_vm2, %v1688_v0  ;;  %1707 = vrot.lane.b32.xlu0 %v3189_v11, %s2582_s18 }
 0x1d0   : > { %2540 = vmatmul.msk.bf16.vlgmr.msra.gmra.mxu0 %vm272_vm2, %v2840_v14 }
 0x1d2   : > { %v709_v44 = vpop.f32.mrf.mxu2  ;;  %v930_v10 = vpop.f32.mrf.mxu3 }
 0x1d3   : > { %v764_v60 = vadd.f32 %v709_v44, %v520_v23  ;;  %v986_v32 = vadd.f32 %v930_v10, %v763_v26  ;;  %v2396_v26 = vld [vmem:[%s2618_s17 + $0x79] sm:$0xff]  ;;  %v2460_v23 = vld [vmem:[%s2618_s17 + $0x1e8] sm:$0xff] }
 0x1d4   : > { %v1258_v10 = vpack.c.bf16 %v2397_v56, %v2396_v26 }
 0x1d5   : > { %v522_v53 = vpop.f32.mrf.mxu1  ;;  %v1154_v46 = vpop.f32.mrf.mxu0  ;;  %v3181_v4 = vadd.f32 %v1152_v47, %v986_v32  ;;  %v2459_v47 = vld [vmem:[%s2618_s17 + $0x1e0] sm:$0xff] }
 0x1d6   : > { %v523_v14 = vadd.f32 %v522_v53, %v2924_v27  ;;  %v3203_v44 = vpack.c.bf16 %v2460_v23, %v2459_v47 }
 0x1d7   : > { %2475 = vmatmul.msk.bf16.gmra.mxu2 %vm272_vm2, %v2696_v42 }
 0x1d8   : > { %2426 = vmatmul.msk.bf16.gmra.mxu1 %vm272_vm2, %v1257_v41  ;;  %1705 = vrot.lane.b32.xlu2 %v3203_v44, %s2582_s18 }
 0x1da   : > { %v712_v58 = vpop.f32.mrf.mxu2  ;;  %v932_v16 = vpop.f32.mrf.mxu3 }
 0x1db   : > { %v765_v39 = vadd.f32 %v712_v58, %v523_v14  ;;  %v987_v36 = vadd.f32 %v932_v16, %v764_v60  ;;  %v2464_v14 = vld [vmem:[%s2618_s17 + $0x248] sm:$0xff] }
 0x1dd   : > { %v524_v35 = vpop.f32.mrf.mxu1  ;;  %v1157_v55 = vpop.f32.mrf.mxu0  ;;  %v3193_v42 = vadd.f32 %v1154_v46, %v987_v36  ;;  %v2463_v46 = vld [vmem:[%s2618_s17 + $0x240] sm:$0xff] }
 0x1de   : > { %v525_v27 = vadd.f32 %v524_v35, %v2943_v20  ;;  %v3215_v28 = vpack.c.bf16 %v2464_v14, %v2463_v46  ;;  %v2399_v35 = vld [vmem:[%s2618_s17 + $0xb1] sm:$0xff] }
 0x1df   : > { %2492 = vmatmul.msk.bf16.gmra.mxu3 %vm272_vm2, %v1690_v40  ;;  %v2398_v40 = vld [vmem:[%s2618_s17 + $0xa9] sm:$0xff] }
 0x1e0   : > { %2541 = vmatmul.msk.bf16.gmra.mxu0 %vm272_vm2, %v2851_v24  ;;  %1709 = vrot.lane.b32.xlu1 %v3215_v28, %s2582_s18 }
 0x1e2   : > { %v714_v0 = vpop.f32.mrf.mxu2  ;;  %v935_v8 = vpop.f32.mrf.mxu3 }
 0x1e3   : > { %v766_v49 = vadd.f32 %v714_v0, %v525_v27  ;;  %v988_v50 = vadd.f32 %v935_v8, %v765_v39  ;;  %v1259_v0 = vpack.c.bf16 %v2399_v35, %v2398_v40  ;;  %v2467_v35 = vld [vmem:[%s2618_s17 + $0x2a0] sm:$0xff] }
 0x1e5   : > { %v527_v60 = vpop.f32.mrf.mxu1  ;;  %v1159_v32 = vpop.f32.mrf.mxu0  ;;  %v3207_v24 = vadd.f32 %v1157_v55, %v988_v50 }
 0x1e6   : > { %v528_v20 = vadd.f32 %v527_v60, %v2965_v18  ;;  %v1694_v60 = vpop.permute.xlu2 %1693 }
 0x1e7   : > { %2476 = vmatmul.msk.bf16.gmra.mxu2 %vm272_vm2, %v2718_v54 }
 0x1e8   : > { %2427 = vmatmul.msk.bf16.gmra.mxu1 %vm272_vm2, %v1258_v10 }
 0x1ea   : > { %v717_v41 = vpop.f32.mrf.mxu2  ;;  %v937_v53 = vpop.f32.mrf.mxu3 }
 0x1eb   : > { %v767_v58 = vadd.f32 %v717_v41, %v528_v20  ;;  %v989_v16 = vadd.f32 %v937_v53, %v766_v49  ;;  %v2400_v53 = vld [vmem:[%s2618_s17 + $0xd9] sm:$0xff] }
 0x1ed   : > { %v529_v39 = vpop.f32.mrf.mxu1  ;;  %v1162_v36 = vpop.f32.mrf.mxu0  ;;  %v3219_v54 = vadd.f32 %v1159_v32, %v989_v16 }
 0x1ee   : > { %v530_v18 = vadd.f32 %v529_v39, %v2988_v57 }
 0x1ef   : > { %2493 = vmatmul.msk.bf16.gmra.mxu3 %vm272_vm2, %v1692_v9 }
 0x1f0   : > { %2542 = vmatmul.msk.bf16.gmra.mxu0 %vm272_vm2, %v2870_v38 }
 0x1f2   : > { %v719_v55 = vpop.f32.mrf.mxu2  ;;  %v940_v27 = vpop.f32.mrf.mxu3 }
 0x1f3   : > { %v768_v26 = vadd.f32 %v719_v55, %v530_v18  ;;  %v990_v56 = vadd.f32 %v940_v27, %v767_v58  ;;  %v2468_v55 = vld [vmem:[%s2618_s17 + $0x2a8] sm:$0xff] }
 0x1f5   : > { %v532_v8 = vpop.f32.mrf.mxu1  ;;  %v1164_v47 = vpop.f32.mrf.mxu0  ;;  %v3227_v23 = vadd.f32 %v1162_v36, %v990_v56  ;;  %v3249_v56 = vpack.c.bf16 %v2468_v55, %v2467_v35 }
 0x1f6   : > { %v533_v38 = vadd.f32 %v532_v8, %v3008_v33  ;;  %v2401_v33 = vld [vmem:[%s2618_s17 + $0xe1] sm:$0xff] }
 0x1f7   : > { %2477 = vmatmul.msk.bf16.gmra.mxu2 %vm272_vm2, %v2626_v5  ;;  %v1260_v9 = vpack.c.bf16 %v2401_v33, %v2400_v53  ;;  %1713 = vrot.lane.b32.xlu0 %v3249_v56, %s2582_s18 }
 0x1f8   : > { %2428 = vmatmul.msk.bf16.gmra.mxu1 %vm272_vm2, %v1259_v0  ;;  %v1696_v0 = vpop.permute.xlu0 %1695 }
 0x1fa   : > { %v722_v57 = vpop.f32.mrf.mxu2  ;;  %v942_v49 = vpop.f32.mrf.mxu3 }
 0x1fb   : > { %v769_v50 = vadd.f32 %v722_v57, %v533_v38  ;;  %v991_v10 = vadd.f32 %v942_v49, %v768_v26  ;;  %v2402_v57 = vld [vmem:[%s2618_s17 + $0x109] sm:$0xff]  ;;  %v2403_v49 = vld [vmem:[%s2618_s17 + $0x111] sm:$0xff] }
 0x1fc   : > { %v1261_v33 = vpack.c.bf16 %v2403_v49, %v2402_v57  ;;  %v2404_v57 = vld [vmem:[%s2618_s17 + $0x139] sm:$0xff]  ;;  %v2405_v49 = vld [vmem:[%s2618_s17 + $0x141] sm:$0xff] }
 0x1fd   : > { %v534_v32 = vpop.f32.mrf.mxu1  ;;  %v1167_v20 = vpop.f32.mrf.mxu0  ;;  %v3233_v41 = vadd.f32 %v1164_v47, %v991_v10 }
 0x1fe   : > { %v535_v5 = vadd.f32 %v534_v32, %v3025_v52  ;;  %v2466_v32 = vld [vmem:[%s2618_s17 + $0x278] sm:$0xff] }
 0x1ff   : > { %2494 = vmatmul.msk.bf16.gmra.mxu3 %vm272_vm2, %v1694_v60  ;;  %v2465_v60 = vld [vmem:[%s2618_s17 + $0x270] sm:$0xff] }
 0x200   : > { %2543 = vmatmul.msk.bf16.gmra.mxu0 %vm272_vm2, %v2891_v48  ;;  %v3263_v53 = vpack.c.bf16 %v2466_v32, %v2465_v60 }
 0x202   : > { %v724_v46 = vpop.f32.mrf.mxu2  ;;  %v945_v14 = vpop.f32.mrf.mxu3  ;;  %1711 = vrot.lane.b32.xlu2 %v3263_v53, %s2582_s18 }
 0x203   : > { %v770_v58 = vadd.f32 %v724_v46, %v535_v5  ;;  %v992_v16 = vadd.f32 %v945_v14, %v769_v50 }
 0x205   : > { %v537_v39 = vpop.f32.mrf.mxu1  ;;  %v1169_v36 = vpop.f32.mrf.mxu0  ;;  %v3241_v18 = vadd.f32 %v1167_v20, %v992_v16  ;;  %v3558_v16 = vld [vmem:[#allocation6_spill] sm:$0xff] }
 0x206   : > { %v538_v48 = vadd.f32 %v537_v39, %v2912_v59  ;;  %v3556_v59 = vld [vmem:[#allocation5_spill] sm:$0xff] }
 0x207   : > { %2478 = vmatmul.msk.bf16.gmra.mxu2 %vm272_vm2, %v2658_v22 }
 0x208   : > { %2429 = vmatmul.msk.bf16.gmra.mxu1 %vm272_vm2, %v1260_v9 }
 0x20a   : > { %v727_v52 = vpop.f32.mrf.mxu2  ;;  %v947_v40 = vpop.f32.mrf.mxu3 }
 0x20b   : > { %v771_v27 = vadd.f32 %v727_v52, %v538_v48  ;;  %v993_v26 = vadd.f32 %v947_v40, %v770_v58  ;;  %v3557_v58 = vld [vmem:[#allocation3_spill] sm:$0xff]  ;;  %v2469_v48 = vld [vmem:[%s2618_s17 + $0x2d0] sm:$0xff]  ;;  %v2470_v52 = vld [vmem:[%s2618_s17 + $0x2d8] sm:$0xff] }
 0x20c   : > { %v3275_v55 = vpack.c.bf16 %v2470_v52, %v2469_v48  ;;  %v1700_v52 = vpop.permute.xlu2 %1699 }
 0x20d   : > { %v539_v8 = vpop.f32.mrf.mxu1  ;;  %v1172_v47 = vpop.f32.mrf.mxu0  ;;  %v3253_v22 = vadd.f32 %v1169_v36, %v993_v26 }
 0x20e   : > { %v540_v38 = vadd.f32 %v539_v8, %v3556_v59  ;;  %1715 = vrot.lane.b32.xlu1 %v3275_v55, %s2582_s18  ;;  %v3560_v59 = vld [vmem:[#allocation8_spill] sm:$0xff] }
 0x20f   : > { %2495 = vmatmul.msk.bf16.gmra.mxu3 %vm272_vm2, %v1696_v0 }
 0x210   : > { %2544 = vmatmul.msk.bf16.gmra.mxu0 %vm272_vm2, %v2914_v63 }
 0x212   : > { %v729_v50 = vpop.f32.mrf.mxu2  ;;  %v950_v10 = vpop.f32.mrf.mxu3 }
 0x213   : > { %v772_v20 = vadd.f32 %v729_v50, %v540_v38  ;;  %v994_v5 = vadd.f32 %v950_v10, %v771_v27  ;;  %v1698_v27 = vpop.permute.xlu1 %1697 }
 0x215   : > { %v542_v46 = vpop.f32.mrf.mxu1  ;;  %v1174_v14 = vpop.f32.mrf.mxu0  ;;  %v3267_v63 = vadd.f32 %v1172_v47, %v994_v5  ;;  %v3559_v47 = vld [vmem:[#allocation7_spill] sm:$0xff] }
 0x216   : > { %v543_v9 = vadd.f32 %v542_v46, %v3558_v16 }
 0x217   : > { %2479 = vmatmul.msk.bf16.gmra.mxu2 %vm272_vm2, %v3557_v58  ;;  %v3562_v58 = vld [vmem:[#allocation9_spill] sm:$0xff] }
 0x218   : > { %2430 = vmatmul.msk.bf16.gmra.mxu1 %vm272_vm2, %v1261_v33 }
 0x21a   : > { %v732_v39 = vpop.f32.mrf.mxu2  ;;  %v952_v36 = vpop.f32.mrf.mxu3 }
 0x21b   : > { %v773_v40 = vadd.f32 %v732_v39, %v543_v9  ;;  %v995_v35 = vadd.f32 %v952_v36, %v772_v20  ;;  %v1262_v20 = vpack.c.bf16 %v2405_v49, %v2404_v57 }
 0x21d   : > { %v544_v26 = vpop.f32.mrf.mxu1  ;;  %v1177_v0 = vpop.f32.mrf.mxu0  ;;  %v3279_v8 = vadd.f32 %v1174_v14, %v995_v35  ;;  %v3561_v14 = vld [vmem:[#allocation4_spill] sm:$0xff] }
 0x21e   : > { %v545_v38 = vadd.f32 %v544_v26, %v3560_v59  ;;  %v3563_v26 = vld [vmem:[#allocation10_spill] sm:$0xff]  ;;  %v2406_v59 = vld [vmem:[%s2618_s17 + $0x169] sm:$0xff] }
 0x21f   : > { %2496 = vmatmul.msk.bf16.gmra.mxu3 %vm272_vm2, %v1698_v27 }
 0x220   : > { %2545 = vmatmul.msk.bf16.gmra.mxu0 %vm272_vm2, %v3559_v47 }
 0x222   : > { %v734_v50 = vpop.f32.mrf.mxu2  ;;  %v955_v10 = vpop.f32.mrf.mxu3 }
 0x223   : > { %v774_v60 = vadd.f32 %v734_v50, %v545_v38  ;;  %v996_v32 = vadd.f32 %v955_v10, %v773_v40  ;;  %v2407_v38 = vld [vmem:[%s2618_s17 + $0x171] sm:$0xff] }
 0x225   : > { %v547_v5 = vpop.f32.mrf.mxu1  ;;  %v1179_v33 = vpop.f32.mrf.mxu0  ;;  %v3287_v46 = vadd.f32 %v1177_v0, %v996_v32  ;;  %v3564_v0 = vld [vmem:[#allocation11_spill] sm:$0xff]  ;;  %v1263_v32 = vpack.c.bf16 %v2407_v38, %v2406_v59  ;;  %v2408_v59 = vld [vmem:[%s2618_s17 + $0x199] sm:$0xff] }
 0x226   : > { %v548_v16 = vadd.f32 %v547_v5, %v3562_v58  ;;  %v2409_v38 = vld [vmem:[%s2618_s17 + $0x1a1] sm:$0xff] }
 0x227   : > { %2480 = vmatmul.msk.bf16.gmra.mxu2 %vm272_vm2, %v3561_v14  ;;  %v3566_v14 = vld [vmem:[#allocation12_spill] sm:$0xff] }
 0x228   : > { %2431 = vmatmul.msk.bf16.gmra.mxu1 %vm272_vm2, %v1262_v20 }
 0x22a   : > { %v737_v9 = vpop.f32.mrf.mxu2  ;;  %v957_v39 = vpop.f32.mrf.mxu3 }
 0x22b   : > { %v775_v36 = vadd.f32 %v737_v9, %v548_v16  ;;  %v997_v48 = vadd.f32 %v957_v39, %v774_v60 }
 0x22d   : > { %v549_v40 = vpop.f32.mrf.mxu1  ;;  %v1182_v35 = vpop.f32.mrf.mxu0  ;;  %v3293_v27 = vadd.f32 %v1179_v33, %v997_v48  ;;  %v3565_v33 = vld [vmem:[#allocation2_spill] sm:$0xff] }
 0x22e   : > { %v550_v47 = vadd.f32 %v549_v40, %v3564_v0  ;;  %v1702_v48 = vpop.permute.xlu0 %1701  ;;  %v3568_v0 = vld [vmem:[#allocation14_spill] sm:$0xff] }
 0x22f   : > { %2497 = vmatmul.msk.bf16.gmra.mxu3 %vm272_vm2, %v1700_v52 }
 0x230   : > { %2546 = vmatmul.msk.bf16.gmra.mxu0 %vm272_vm2, %v3563_v26 }
 0x232   : > { %v739_v57 = vpop.f32.mrf.mxu2  ;;  %v960_v49 = vpop.f32.mrf.mxu3 }
 0x233   : > { %v776_v50 = vadd.f32 %v739_v57, %v550_v47  ;;  %v998_v10 = vadd.f32 %v960_v49, %v775_v36 }
 0x235   : > { %v552_v60 = vpop.f32.mrf.mxu1  ;;  %v1184_v20 = vpop.f32.mrf.mxu0  ;;  %v3301_v5 = vadd.f32 %v1182_v35, %v998_v10  ;;  %v3567_v35 = vld [vmem:[#allocation13_spill] sm:$0xff]  ;;  %v2471_v10 = vld [vmem:[%s2618_s17 + $0x300] sm:$0xff] }
 0x236   : > { %v553_v58 = vadd.f32 %v552_v60, %v3566_v14  ;;  %v1264_v14 = vpack.c.bf16 %v2409_v38, %v2408_v59 }
 0x237   : > { %2481 = vmatmul.msk.bf16.gmra.mxu2 %vm272_vm2, %v3565_v33 }
 0x238   : > { %2432 = vmatmul.msk.bf16.gmra.mxu1 %vm272_vm2, %v1263_v32  ;;  %v2472_v32 = vld [vmem:[%s2618_s17 + $0x308] sm:$0xff] }
 0x239   : > { %v3317_v33 = vpack.c.bf16 %v2472_v32, %v2471_v10 }
 0x23a   : > { %v742_v16 = vpop.f32.mrf.mxu2  ;;  %v962_v9 = vpop.f32.mrf.mxu3 }
 0x23b   : > { %v777_v39 = vadd.f32 %v742_v16, %v553_v58  ;;  %v999_v36 = vadd.f32 %v962_v9, %v776_v50  ;;  %1717 = vrot.lane.b32.xlu2 %v3317_v33, %s2582_s18  ;;  %s3347_s18 = scalar_lea.vmem %s3533_s3, %s2558_s14 }
 0x23d   : > { %v554_v52 = vpop.f32.mrf.mxu1  ;;  %v1187_v40 = vpop.f32.mrf.mxu0  ;;  %v3307_v26 = vadd.f32 %v1184_v20, %v999_v36 }
 0x23e   : > { %v555_v47 = vadd.f32 %v554_v52, %v3568_v0 }
 0x23f   : > { %2498 = vmatmul.msk.bf16.gmra.mxu3 %vm272_vm2, %v1702_v48  ;;  %v1704_v48 = vpop.permute.xlu1 %1703 }
 0x240   : > { %2547 = vmatmul.msk.bf16.gmra.mxu0 %vm272_vm2, %v3567_v35 }
 0x242   : > { %v744_v57 = vpop.f32.mrf.mxu2  ;;  %v965_v49 = vpop.f32.mrf.mxu3 }
 0x243   : > { %v778_v60 = vadd.f32 %v744_v57, %v555_v47  ;;  %v1000_v50 = vadd.f32 %v965_v49, %v777_v39  ;;  %v3569_v47 = vld [vmem:[#allocation16_spill] sm:$0xff] }
 0x244   : > { %v2411_v57 = vld [vmem:[%s2618_s17 + $0x1d1] sm:$0xff] }
 0x245   : > { %v1189_v20 = vpop.f32.mrf.mxu0  ;;  %v1334_v58 = vpop.f32.mrf.mxu1  ;;  %v3321_v16 = vadd.f32 %v1187_v40, %v1000_v50  ;;  %v3570_v40 = vld [vmem:[#allocation15_spill] sm:$0xff] }
 0x246   : > { %v1414_v59 = vadd.f32 %v1334_v58, %v3569_v47 }
 0x247   : > { %2482 = vmatmul.msk.bf16.gmra.mxu2 %vm272_vm2, %v2638_v12  ;;  %v2410_v12 = vld [vmem:[%s2618_s17 + $0x1c9] sm:$0xff] }
 0x248   : > { %2433 = vmatmul.msk.bf16.gmra.mxu1 %vm272_vm2, %v1264_v14  ;;  %v1265_v50 = vpack.c.bf16 %v2411_v57, %v2410_v12 }
 0x24a   : > { %v967_v9 = vpop.f32.mrf.mxu3  ;;  %v1557_v36 = vpop.f32.mrf.mxu2 }
 0x24b   : > { %v1001_v39 = vadd.f32 %v967_v9, %v778_v60  ;;  %v1637_v38 = vadd.f32 %v1557_v36, %v1414_v59  ;;  %v3337_v60 = vld [vmem:[%s3532_s2] ss:$0 sm:$0xff] }
 0x24d   : > { %v1336_v52 = vpop.f32.mrf.mxu1  ;;  %v2001_v35 = vpop.f32.mrf.mxu0  ;;  %v3326_v0 = vadd.f32 %v1189_v20, %v1001_v39 }
 0x24e   : > { %v1415_v9 = vadd.f32 %v1336_v52, %v3057_v1 }
 0x24f   : > { %2499 = vmatmul.msk.bf16.gmra.mxu3 %vm272_vm2, %v1704_v48 }
 0x250   : > { %2548 = vmatmul.msk.bf16.gmra.mxu0 %vm272_vm2, %v3570_v40 }
 0x252   : > { %v1559_v49 = vpop.f32.mrf.mxu2  ;;  %v1779_v10 = vpop.f32.mrf.mxu3 }
 0x253   : > { %v1859_v32 = vadd.f32 %v1779_v10, %v1637_v38  ;;  %v1638_v36 = vadd.f32 %v1559_v49, %v1415_v9  ;;  %v2412_v10 = vld [vmem:[%s2618_s17 + $0x1f9] sm:$0xff] }
 0x255   : > { %v2081_v14 = vadd.f32 %v2001_v35, %v1859_v32  ;;  %v1339_v20 = vpop.f32.mrf.mxu1  ;;  %v2003_v58 = vpop.f32.mrf.mxu0  ;;  %v2413_v32 = vld [vmem:[%s2618_s17 + $0x201] sm:$0xff] }
 0x256   : > { %v1416_v38 = vadd.f32 %v1339_v20, %v3067_v7  ;;  %v1266_v9 = vpack.c.bf16 %v2413_v32, %v2412_v10  ;;  %v2415_v10 = vld [vmem:[%s2618_s17 + $0x231] sm:$0xff] }
 0x257   : > { %v2116_v39 = vadd.f32 %v3337_v60, %v2081_v14  ;;  %2483 = vmatmul.msk.bf16.gmra.mxu2 %vm272_vm2, %v3203_v44  ;;  %v1706_v44 = vpop.permute.xlu2 %1705 }
 0x258   : > { %2434 = vmatmul.msk.bf16.gmra.mxu1 %vm272_vm2, %v1265_v50 }
 0x259   : > { %v2148_v48 = vmax.f32 %v2116_v39, 0.0 }
 0x25a   : > { %v1562_v35 = vpop.f32.mrf.mxu2  ;;  %v1781_v1 = vpop.f32.mrf.mxu3 }
 0x25b   : > { %2181 = vst.msk [vmem:[%s3347_s18] sm:$0xff] %vm2180_vm3, %v2148_v48  ;;  %v1860_v52 = vadd.f32 %v1781_v1, %v1638_v36  ;;  %v1639_v57 = vadd.f32 %v1562_v35, %v1416_v38 }
 0x25d   : > { %v2082_v47 = vadd.f32 %v2003_v58, %v1860_v52  ;;  %v1341_v59 = vpop.f32.mrf.mxu1  ;;  %v2006_v40 = vpop.f32.mrf.mxu0 }
 0x25e   : > { %v1417_v36 = vadd.f32 %v1341_v59, %v3074_v15 }
 0x25f   : > { %v2117_v12 = vadd.f32 %v3337_v60, %v2082_v47  ;;  %2500 = vmatmul.msk.bf16.gmra.mxu3 %vm272_vm2, %v1706_v44  ;;  %v1708_v47 = vpop.permute.xlu0 %1707 }
 0x260   : > { %2549 = vmatmul.msk.bf16.gmra.mxu0 %vm272_vm2, %v3065_v51 }
 0x261   : > { %v2149_v49 = vmax.f32 %v2117_v12, 0.0 }
 0x262   : > { %v1564_v50 = vpop.f32.mrf.mxu2  ;;  %v1784_v14 = vpop.f32.mrf.mxu3 }
 0x263   : > { %2182 = vst.msk [vmem:[%s3347_s18 + $0x8] sm:$0xff] %vm2180_vm3, %v2149_v49  ;;  %v1861_v58 = vadd.f32 %v1784_v14, %v1639_v57  ;;  %v1640_v51 = vadd.f32 %v1564_v50, %v1417_v36  ;;  %v2414_v49 = vld [vmem:[%s2618_s17 + $0x229] sm:$0xff] }
 0x265   : > { %v2083_v39 = vadd.f32 %v2006_v40, %v1861_v58  ;;  %v1344_v7 = vpop.f32.mrf.mxu1  ;;  %v2008_v20 = vpop.f32.mrf.mxu0  ;;  %v1267_v58 = vpack.c.bf16 %v2415_v10, %v2414_v49 }
 0x266   : > { %v1418_v38 = vadd.f32 %v1344_v7, %v3084_v62 }
 0x267   : > { %v2118_v48 = vadd.f32 %v3337_v60, %v2083_v39  ;;  %2484 = vmatmul.msk.bf16.gmra.mxu2 %vm272_vm2, %v3189_v11 }
 0x268   : > { %2435 = vmatmul.msk.bf16.gmra.mxu1 %vm272_vm2, %v1266_v9 }
 0x269   : > { %v2150_v35 = vmax.f32 %v2118_v48, 0.0 }
 0x26a   : > { %v1567_v1 = vpop.f32.mrf.mxu2  ;;  %v1786_v52 = vpop.f32.mrf.mxu3 }
 0x26b   : > { %2183 = vst.msk [vmem:[%s3347_s18 + $0x10] sm:$0xff] %vm2180_vm3, %v2150_v35  ;;  %v1862_v44 = vadd.f32 %v1786_v52, %v1640_v51  ;;  %v1641_v12 = vadd.f32 %v1567_v1, %v1418_v38  ;;  %v1710_v1 = vpop.permute.xlu1 %1709  ;;  %v2417_v38 = vld [vmem:[%s2618_s17 + $0x261] sm:$0xff] }
 0x26d   : > { %v2084_v40 = vadd.f32 %v2008_v20, %v1862_v44  ;;  %v1346_v15 = vpop.f32.mrf.mxu1  ;;  %v2011_v59 = vpop.f32.mrf.mxu0 }
 0x26e   : > { %v1419_v7 = vadd.f32 %v1346_v15, %v3091_v61 }
 0x26f   : > { %v2119_v11 = vadd.f32 %v3337_v60, %v2084_v40  ;;  %2501 = vmatmul.msk.bf16.gmra.mxu3 %vm272_vm2, %v1708_v47 }
 0x270   : > { %2550 = vmatmul.msk.bf16.gmra.mxu0 %vm272_vm2, %v3082_v37 }
 0x271   : > { %v2151_v57 = vmax.f32 %v2119_v11, 0.0 }
 0x272   : > { %v1569_v32 = vpop.f32.mrf.mxu2  ;;  %v1789_v50 = vpop.f32.mrf.mxu3 }
 0x273   : > { %2184 = vst.msk [vmem:[%s3347_s18 + $0x18] sm:$0xff] %vm2180_vm3, %v2151_v57  ;;  %v1863_v14 = vadd.f32 %v1789_v50, %v1641_v12  ;;  %v1642_v37 = vadd.f32 %v1569_v32, %v1419_v7  ;;  %v1712_v7 = vpop.permute.xlu2 %1711 }
 0x275   : > { %v2085_v9 = vadd.f32 %v2011_v59, %v1863_v14  ;;  %v1349_v62 = vpop.f32.mrf.mxu1  ;;  %v2013_v39 = vpop.f32.mrf.mxu0  ;;  %v2416_v59 = vld [vmem:[%s2618_s17 + $0x259] sm:$0xff] }
 0x276   : > { %v1420_v47 = vadd.f32 %v1349_v62, %v3101_v30  ;;  %v1268_v49 = vpack.c.bf16 %v2417_v38, %v2416_v59 }
 0x277   : > { %v2120_v20 = vadd.f32 %v3337_v60, %v2085_v9  ;;  %2485 = vmatmul.msk.bf16.gmra.mxu2 %vm272_vm2, %v3215_v28 }
 0x278   : > { %2436 = vmatmul.msk.bf16.gmra.mxu1 %vm272_vm2, %v1267_v58 }
 0x279   : > { %v2152_v36 = vmax.f32 %v2120_v20, 0.0 }
 0x27a   : > { %v1572_v48 = vpop.f32.mrf.mxu2  ;;  %v1791_v51 = vpop.f32.mrf.mxu3 }
 0x27b   : > { %2185 = vst.msk [vmem:[%s3347_s18 + $0x20] sm:$0xff] %vm2180_vm3, %v2152_v36  ;;  %v1864_v35 = vadd.f32 %v1791_v51, %v1642_v37  ;;  %v1643_v40 = vadd.f32 %v1572_v48, %v1420_v47 }
 0x27d   : > { %v2086_v52 = vadd.f32 %v2013_v39, %v1864_v35  ;;  %v1351_v61 = vpop.f32.mrf.mxu1  ;;  %v2016_v44 = vpop.f32.mrf.mxu0  ;;  %v2418_v35 = vld [vmem:[%s2618_s17 + $0x289] sm:$0xff] }
 0x27e   : > { %v1421_v50 = vadd.f32 %v1351_v61, %v3108_v17 }
 0x27f   : > { %v2121_v28 = vadd.f32 %v3337_v60, %v2086_v52  ;;  %2502 = vmatmul.msk.bf16.gmra.mxu3 %vm272_vm2, %v1710_v1  ;;  %v2419_v1 = vld [vmem:[%s2618_s17 + $0x291] sm:$0xff] }
 0x280   : > { %2551 = vmatmul.msk.bf16.gmra.mxu0 %vm272_vm2, %v3099_v6  ;;  %v1269_v47 = vpack.c.bf16 %v2419_v1, %v2418_v35  ;;  %v1716_v1 = vpop.permute.xlu1 %1715 }
 0x281   : > { %v2153_v15 = vmax.f32 %v2121_v28, 0.0 }
 0x282   : > { %v1574_v11 = vpop.f32.mrf.mxu2  ;;  %v1794_v12 = vpop.f32.mrf.mxu3 }
 0x283   : > { %2186 = vst.msk [vmem:[%s3347_s18 + $0x28] sm:$0xff] %vm2180_vm3, %v2153_v15  ;;  %v1865_v57 = vadd.f32 %v1794_v12, %v1643_v40  ;;  %v1644_v6 = vadd.f32 %v1574_v11, %v1421_v50 }
 0x285   : > { %v2087_v10 = vadd.f32 %v2016_v44, %v1865_v57  ;;  %v1354_v30 = vpop.f32.mrf.mxu1  ;;  %v2018_v32 = vpop.f32.mrf.mxu0 }
 0x286   : > { %v1422_v36 = vadd.f32 %v1354_v30, %v3118_v21 }
 0x287   : > { %v2122_v14 = vadd.f32 %v3337_v60, %v2087_v10  ;;  %2486 = vmatmul.msk.bf16.gmra.mxu2 %vm272_vm2, %v3263_v53 }
 0x288   : > { %2437 = vmatmul.msk.bf16.gmra.mxu1 %vm272_vm2, %v1268_v49  ;;  %v1714_v49 = vpop.permute.xlu0 %1713 }
 0x289   : > { %v2154_v58 = vmax.f32 %v2122_v14, 0.0 }
 0x28a   : > { %v1577_v9 = vpop.f32.mrf.mxu2  ;;  %v1796_v62 = vpop.f32.mrf.mxu3 }
 0x28b   : > { %2187 = vst.msk [vmem:[%s3347_s18 + $0x30] sm:$0xff] %vm2180_vm3, %v2154_v58  ;;  %v1866_v39 = vadd.f32 %v1796_v62, %v1644_v6  ;;  %v1645_v48 = vadd.f32 %v1577_v9, %v1422_v36  ;;  %v2420_v6 = vld [vmem:[%s2618_s17 + $0x2b9] sm:$0xff]  ;;  %v2421_v58 = vld [vmem:[%s2618_s17 + $0x2c1] sm:$0xff] }
 0x28d   : > { %v2088_v20 = vadd.f32 %v2018_v32, %v1866_v39  ;;  %v1356_v17 = vpop.f32.mrf.mxu1  ;;  %v2021_v37 = vpop.f32.mrf.mxu0 }
 0x28e   : > { %v1423_v15 = vadd.f32 %v1356_v17, %v3125_v2 }
 0x28f   : > { %v2123_v53 = vadd.f32 %v3337_v60, %v2088_v20  ;;  %2503 = vmatmul.msk.bf16.gmra.mxu3 %vm272_vm2, %v1712_v7  ;;  %v1270_v7 = vpack.c.bf16 %v2421_v58, %v2420_v6 }
 0x290   : > { %2552 = vmatmul.msk.bf16.gmra.mxu0 %vm272_vm2, %v3116_v45 }
 0x291   : > { %v2155_v51 = vmax.f32 %v2123_v53, 0.0 }
 0x292   : > { %v1579_v52 = vpop.f32.mrf.mxu2  ;;  %v1799_v61 = vpop.f32.mrf.mxu3 }
 0x293   : > { %2188 = vst.msk [vmem:[%s3347_s18 + $0x38] sm:$0xff] %vm2180_vm3, %v2155_v51  ;;  %v1867_v44 = vadd.f32 %v1799_v61, %v1645_v48  ;;  %v1646_v45 = vadd.f32 %v1579_v52, %v1423_v15 }
 0x295   : > { %v2089_v28 = vadd.f32 %v2021_v37, %v1867_v44  ;;  %v1359_v21 = vpop.f32.mrf.mxu1  ;;  %v2023_v40 = vpop.f32.mrf.mxu0 }
 0x296   : > { %v1424_v32 = vadd.f32 %v1359_v21, %v3135_v43  ;;  %v2422_v21 = vld [vmem:[%s2618_s17 + $0x2e9] sm:$0xff] }
 0x297   : > { %v2124_v59 = vadd.f32 %v3337_v60, %v2089_v28  ;;  %2487 = vmatmul.msk.bf16.gmra.mxu2 %vm272_vm2, %v3249_v56 }
 0x298   : > { %2438 = vmatmul.msk.bf16.gmra.mxu1 %vm272_vm2, %v1269_v47 }
 0x299   : > { %v2156_v38 = vmax.f32 %v2124_v59, 0.0 }
 0x29a   : > { %v1582_v11 = vpop.f32.mrf.mxu2  ;;  %v1801_v12 = vpop.f32.mrf.mxu3 }
 0x29b   : > { %2189 = vst.msk [vmem:[%s3347_s18 + $0x40] sm:$0xff] %vm2180_vm3, %v2156_v38  ;;  %v1868_v57 = vadd.f32 %v1801_v12, %v1646_v45  ;;  %v1647_v50 = vadd.f32 %v1582_v11, %v1424_v32 }
 0x29d   : > { %v2090_v10 = vadd.f32 %v2023_v40, %v1868_v57  ;;  %v1361_v2 = vpop.f32.mrf.mxu1  ;;  %v2026_v30 = vpop.f32.mrf.mxu0  ;;  %v2423_v40 = vld [vmem:[%s2618_s17 + $0x2f1] sm:$0xff] }
 0x29e   : > { %v1425_v37 = vadd.f32 %v1361_v2, %v3142_v34  ;;  %v2537_v2 = vld [vmem:[%s2618_s17 + $0x301] sm:$0xff] }
 0x29f   : > { %v2125_v56 = vadd.f32 %v3337_v60, %v2090_v10  ;;  %2504 = vmatmul.msk.bf16.gmra.mxu3 %vm272_vm2, %v1714_v49 }
 0x2a0   : > { %2553 = vmatmul.msk.bf16.gmra.mxu0 %vm272_vm2, %v3133_v25 }
 0x2a1   : > { %v2157_v14 = vmax.f32 %v2125_v56, 0.0 }
 0x2a2   : > { %v1584_v9 = vpop.f32.mrf.mxu2  ;;  %v1804_v62 = vpop.f32.mrf.mxu3 }
 0x2a3   : > { %2190 = vst.msk [vmem:[%s3347_s18 + $0x48] sm:$0xff] %vm2180_vm3, %v2157_v14  ;;  %v1869_v39 = vadd.f32 %v1804_v62, %v1647_v50  ;;  %v1648_v25 = vadd.f32 %v1584_v9, %v1425_v37  ;;  %v1718_v14 = vpop.permute.xlu2 %1717 }
 0x2a5   : > { %v2091_v20 = vadd.f32 %v2026_v30, %v1869_v39  ;;  %v1364_v43 = vpop.f32.mrf.mxu1  ;;  %v2028_v17 = vpop.f32.mrf.mxu0  ;;  %v2538_v30 = vld [vmem:[%s2618_s17 + $0x309] sm:$0xff] }
 0x2a6   : > { %v1426_v44 = vadd.f32 %v1364_v43, %v3152_v3  ;;  %v1271_v3 = vpack.c.bf16 %v2423_v40, %v2422_v21  ;;  %v1938_v6 = vpack.c.bf16 %v2538_v30, %v2537_v2 }
 0x2a7   : > { %v2126_v36 = vadd.f32 %v3337_v60, %v2091_v20  ;;  %2488 = vmatmul.msk.bf16.gmra.mxu2 %vm272_vm2, %v3275_v55 }
 0x2a8   : > { %2439 = vmatmul.msk.bf16.gmra.mxu1 %vm272_vm2, %v1270_v7 }
 0x2a9   : > { %v2158_v53 = vmax.f32 %v2126_v36, 0.0 }
 0x2aa   : > { %v1587_v48 = vpop.f32.mrf.mxu2  ;;  %v1806_v51 = vpop.f32.mrf.mxu3 }
 0x2ab   : > { %2191 = vst.msk [vmem:[%s3347_s18 + $0x50] sm:$0xff] %vm2180_vm3, %v2158_v53  ;;  %v1870_v35 = vadd.f32 %v1806_v51, %v1648_v25  ;;  %v1649_v47 = vadd.f32 %v1587_v48, %v1426_v44 }
 0x2ad   : > { %v2092_v52 = vadd.f32 %v2028_v17, %v1870_v35  ;;  %v1366_v34 = vpop.f32.mrf.mxu1  ;;  %v2031_v61 = vpop.f32.mrf.mxu0 }
 0x2ae   : > { %v1427_v57 = vadd.f32 %v1366_v34, %v3159_v29 }
 0x2af   : > { %v2127_v55 = vadd.f32 %v3337_v60, %v2092_v52  ;;  %2505 = vmatmul.msk.bf16.gmra.mxu3 %vm272_vm2, %v1716_v1 }
 0x2b0   : > { %2554 = vmatmul.msk.bf16.gmra.mxu0 %vm272_vm2, %v3150_v19 }
 0x2b1   : > { %v2159_v28 = vmax.f32 %v2127_v55, 0.0 }
 0x2b2   : > { %v1589_v15 = vpop.f32.mrf.mxu2  ;;  %v1809_v59 = vpop.f32.mrf.mxu3 }
 0x2b3   : > { %2192 = vst.msk [vmem:[%s3347_s18 + $0x58] sm:$0xff] %vm2180_vm3, %v2159_v28  ;;  %v1871_v45 = vadd.f32 %v1809_v59, %v1649_v47  ;;  %v1650_v49 = vadd.f32 %v1589_v15, %v1427_v57 }
 0x2b5   : > { %v2093_v38 = vadd.f32 %v2031_v61, %v1871_v45  ;;  %v1369_v11 = vpop.f32.mrf.mxu1  ;;  %v2033_v12 = vpop.f32.mrf.mxu0 }
 0x2b6   : > { %v1428_v62 = vadd.f32 %v1369_v11, %v3167_v31 }
 0x2b7   : > { %v2128_v19 = vadd.f32 %v3337_v60, %v2093_v38  ;;  %2489 = vmatmul.msk.bf16.gmra.mxu2 %vm272_vm2, %v3317_v33 }
 0x2b8   : > { %2440 = vmatmul.msk.bf16.gmra.mxu1 %vm272_vm2, %v1271_v3 }
 0x2b9   : > { %v2160_v10 = vmax.f32 %v2128_v19, 0.0 }
 0x2ba   : > { %v1592_v32 = vpop.f32.mrf.mxu2  ;;  %v1811_v56 = vpop.f32.mrf.mxu3 }
 0x2bb   : > { %2193 = vst.msk [vmem:[%s3347_s18 + $0x60] sm:$0xff] %vm2180_vm3, %v2160_v10  ;;  %v1872_v50 = vadd.f32 %v1811_v56, %v1650_v49  ;;  %v1651_v39 = vadd.f32 %v1592_v32, %v1428_v62 }
 0x2bd   : > { %v2094_v29 = vadd.f32 %v2033_v12, %v1872_v50  ;;  %v1371_v58 = vpop.f32.mrf.mxu1  ;;  %v2036_v9 = vpop.f32.mrf.mxu0 }
 0x2be   : > { %v1429_v53 = vadd.f32 %v1371_v58, %v3173_v13 }
 0x2bf   : > { %v2129_v33 = vadd.f32 %v3337_v60, %v2094_v29  ;;  %2506 = vmatmul.msk.bf16.gmra.mxu3 %vm272_vm2, %v1718_v14 }
 0x2c0   : > { %2555 = vmatmul.msk.bf16.gmra.mxu0 %vm272_vm2, %v1938_v6 }
 0x2c1   : > { %v2161_v7 = vmax.f32 %v2129_v33, 0.0 }
 0x2c2   : > { %v1594_v20 = vpop.f32.mrf.mxu2  ;;  %v1814_v43 = vpop.f32.mrf.mxu3 }
 0x2c3   : > { %2194 = vst.msk [vmem:[%s3347_s18 + $0x68] sm:$0xff] %vm2180_vm3, %v2161_v7  ;;  %v1873_v17 = vadd.f32 %v1814_v43, %v1651_v39  ;;  %v1652_v48 = vadd.f32 %v1594_v20, %v1429_v53 }
 0x2c5   : > { %v2095_v37 = vadd.f32 %v2036_v9, %v1873_v17  ;;  %v1374_v36 = vpop.f32.mrf.mxu1  ;;  %v2038_v25 = vpop.f32.mrf.mxu0 }
 0x2c6   : > { %v1430_v55 = vadd.f32 %v1374_v36, %v3181_v4 }
 0x2c7   : > { %v2130_v31 = vadd.f32 %v3337_v60, %v2095_v37 }
 0x2c9   : > { %v2162_v51 = vmax.f32 %v2130_v31, 0.0 }
 0x2ca   : > { %v1597_v35 = vpop.f32.mrf.mxu2  ;;  %v1816_v1 = vpop.f32.mrf.mxu3 }
 0x2cb   : > { %2195 = vst.msk [vmem:[%s3347_s18 + $0x70] sm:$0xff] %vm2180_vm3, %v2162_v51  ;;  %v1874_v52 = vadd.f32 %v1816_v1, %v1652_v48  ;;  %v1653_v28 = vadd.f32 %v1597_v35, %v1430_v55 }
 0x2cd   : > { %v2096_v34 = vadd.f32 %v2038_v25, %v1874_v52  ;;  %v1376_v61 = vpop.f32.mrf.mxu1  ;;  %v2041_v44 = vpop.f32.mrf.mxu0 }
 0x2ce   : > { %v1431_v38 = vadd.f32 %v1376_v61, %v3193_v42 }
 0x2cf   : > { %v2131_v47 = vadd.f32 %v3337_v60, %v2096_v34 }
 0x2d1   : > { %v2163_v13 = vmax.f32 %v2131_v47, 0.0 }
 0x2d2   : > { %v1599_v21 = vpop.f32.mrf.mxu2  ;;  %v1819_v40 = vpop.f32.mrf.mxu3 }
 0x2d3   : > { %2196 = vst.msk [vmem:[%s3347_s18 + $0x78] sm:$0xff] %vm2180_vm3, %v2163_v13  ;;  %v1875_v15 = vadd.f32 %v1819_v40, %v1653_v28  ;;  %v1654_v12 = vadd.f32 %v1599_v21, %v1431_v38 }
 0x2d5   : > { %v2097_v59 = vadd.f32 %v2041_v44, %v1875_v15  ;;  %v1379_v45 = vpop.f32.mrf.mxu1  ;;  %v2043_v3 = vpop.f32.mrf.mxu0 }
 0x2d6   : > { %v1432_v32 = vadd.f32 %v1379_v45, %v3207_v24 }
 0x2d7   : > { %v2132_v11 = vadd.f32 %v3337_v60, %v2097_v59 }
 0x2d9   : > { %v2164_v4 = vmax.f32 %v2132_v11, 0.0 }
 0x2da   : > { %v1602_v57 = vpop.f32.mrf.mxu2  ;;  %v1821_v19 = vpop.f32.mrf.mxu3 }
 0x2db   : > { %2197 = vst.msk [vmem:[%s3347_s18 + $0x80] sm:$0xff] %vm2180_vm3, %v2164_v4  ;;  %v1876_v49 = vadd.f32 %v1821_v19, %v1654_v12  ;;  %v1655_v50 = vadd.f32 %v1602_v57, %v1432_v32 }
 0x2dd   : > { %v2098_v10 = vadd.f32 %v2043_v3, %v1876_v49  ;;  %v1381_v2 = vpop.f32.mrf.mxu1  ;;  %v2046_v30 = vpop.f32.mrf.mxu0 }
 0x2de   : > { %v1433_v33 = vadd.f32 %v1381_v2, %v3219_v54 }
 0x2df   : > { %v2133_v56 = vadd.f32 %v3337_v60, %v2098_v10 }
 0x2e1   : > { %v2165_v42 = vmax.f32 %v2133_v56, 0.0 }
 0x2e2   : > { %v1604_v14 = vpop.f32.mrf.mxu2  ;;  %v1824_v6 = vpop.f32.mrf.mxu3 }
 0x2e3   : > { %2198 = vst.msk [vmem:[%s3347_s18 + $0x88] sm:$0xff] %vm2180_vm3, %v2165_v42  ;;  %v1877_v29 = vadd.f32 %v1824_v6, %v1655_v50  ;;  %v1656_v7 = vadd.f32 %v1604_v14, %v1433_v33 }
 0x2e5   : > { %v2099_v58 = vadd.f32 %v2046_v30, %v1877_v29  ;;  %v1384_v9 = vpop.f32.mrf.mxu1  ;;  %v2048_v62 = vpop.f32.mrf.mxu0 }
 0x2e6   : > { %v1434_v53 = vadd.f32 %v1384_v9, %v3227_v23 }
 0x2e7   : > { %v2134_v39 = vadd.f32 %v3337_v60, %v2099_v58 }
 0x2e9   : > { %v2166_v24 = vmax.f32 %v2134_v39, 0.0 }
 0x2ea   : > { %v1607_v20 = vpop.f32.mrf.mxu2  ;;  %v1826_v43 = vpop.f32.mrf.mxu3 }
 0x2eb   : > { %2199 = vst.msk [vmem:[%s3347_s18 + $0x90] sm:$0xff] %vm2180_vm3, %v2166_v24  ;;  %v1878_v17 = vadd.f32 %v1826_v43, %v1656_v7  ;;  %v1657_v48 = vadd.f32 %v1607_v20, %v1434_v53 }
 0x2ed   : > { %v2100_v37 = vadd.f32 %v2048_v62, %v1878_v17  ;;  %v1386_v36 = vpop.f32.mrf.mxu1  ;;  %v2051_v25 = vpop.f32.mrf.mxu0 }
 0x2ee   : > { %v1435_v44 = vadd.f32 %v1386_v36, %v3233_v41 }
 0x2ef   : > { %v2135_v31 = vadd.f32 %v3337_v60, %v2100_v37 }
 0x2f1   : > { %v2167_v54 = vmax.f32 %v2135_v31, 0.0 }
 0x2f2   : > { %v1609_v51 = vpop.f32.mrf.mxu2  ;;  %v1829_v35 = vpop.f32.mrf.mxu3 }
 0x2f3   : > { %2200 = vst.msk [vmem:[%s3347_s18 + $0x98] sm:$0xff] %vm2180_vm3, %v2167_v54  ;;  %v1879_v1 = vadd.f32 %v1829_v35, %v1657_v48  ;;  %v1658_v47 = vadd.f32 %v1609_v51, %v1435_v44 }
 0x2f5   : > { %v2101_v52 = vadd.f32 %v2051_v25, %v1879_v1  ;;  %v1389_v34 = vpop.f32.mrf.mxu1  ;;  %v2053_v61 = vpop.f32.mrf.mxu0 }
 0x2f6   : > { %v1436_v45 = vadd.f32 %v1389_v34, %v3241_v18 }
 0x2f7   : > { %v2136_v55 = vadd.f32 %v3337_v60, %v2101_v52 }
 0x2f9   : > { %v2168_v23 = vmax.f32 %v2136_v55, 0.0 }
 0x2fa   : > { %v1612_v28 = vpop.f32.mrf.mxu2  ;;  %v1831_v13 = vpop.f32.mrf.mxu3 }
 0x2fb   : > { %2201 = vst.msk [vmem:[%s3347_s18 + $0xa0] sm:$0xff] %vm2180_vm3, %v2168_v23  ;;  %v1880_v21 = vadd.f32 %v1831_v13, %v1658_v47  ;;  %v1659_v38 = vadd.f32 %v1612_v28, %v1436_v45 }
 0x2fd   : > { %v2102_v40 = vadd.f32 %v2053_v61, %v1880_v21  ;;  %v1391_v15 = vpop.f32.mrf.mxu1  ;;  %v2056_v59 = vpop.f32.mrf.mxu0 }
 0x2fe   : > { %v1437_v10 = vadd.f32 %v1391_v15, %v3253_v22 }
 0x2ff   : > { %v2137_v3 = vadd.f32 %v3337_v60, %v2102_v40 }
 0x301   : > { %v2169_v41 = vmax.f32 %v2137_v3, 0.0 }
 0x302   : > { %v1614_v11 = vpop.f32.mrf.mxu2  ;;  %v1834_v12 = vpop.f32.mrf.mxu3 }
 0x303   : > { %2202 = vst.msk [vmem:[%s3347_s18 + $0xa8] sm:$0xff] %vm2180_vm3, %v2169_v41  ;;  %v1881_v4 = vadd.f32 %v1834_v12, %v1659_v38  ;;  %v1660_v30 = vadd.f32 %v1614_v11, %v1437_v10 }
 0x305   : > { %v2103_v57 = vadd.f32 %v2056_v59, %v1881_v4  ;;  %v1394_v19 = vpop.f32.mrf.mxu1  ;;  %v2058_v49 = vpop.f32.mrf.mxu0 }
 0x306   : > { %v1438_v29 = vadd.f32 %v1394_v19, %v3267_v63 }
 0x307   : > { %v2138_v2 = vadd.f32 %v3337_v60, %v2103_v57 }
 0x309   : > { %v2170_v18 = vmax.f32 %v2138_v2, 0.0 }
 0x30a   : > { %v1617_v32 = vpop.f32.mrf.mxu2  ;;  %v1836_v56 = vpop.f32.mrf.mxu3 }
 0x30b   : > { %2203 = vst.msk [vmem:[%s3347_s18 + $0xb0] sm:$0xff] %vm2180_vm3, %v2170_v18  ;;  %v1882_v50 = vadd.f32 %v1836_v56, %v1660_v30  ;;  %v1661_v9 = vadd.f32 %v1617_v32, %v1438_v29 }
 0x30d   : > { %v2104_v42 = vadd.f32 %v2058_v49, %v1882_v50  ;;  %v1396_v14 = vpop.f32.mrf.mxu1  ;;  %v2061_v6 = vpop.f32.mrf.mxu0 }
 0x30e   : > { %v1439_v43 = vadd.f32 %v1396_v14, %v3279_v8 }
 0x30f   : > { %v2139_v58 = vadd.f32 %v3337_v60, %v2104_v42 }
 0x311   : > { %v2171_v22 = vmax.f32 %v2139_v58, 0.0 }
 0x312   : > { %v1619_v62 = vpop.f32.mrf.mxu2  ;;  %v1839_v33 = vpop.f32.mrf.mxu3 }
 0x313   : > { %2204 = vst.msk [vmem:[%s3347_s18 + $0xb8] sm:$0xff] %vm2180_vm3, %v2171_v22  ;;  %v1883_v39 = vadd.f32 %v1839_v33, %v1661_v9  ;;  %v1662_v37 = vadd.f32 %v1619_v62, %v1439_v43 }
 0x315   : > { %v2105_v7 = vadd.f32 %v2061_v6, %v1883_v39  ;;  %v1399_v24 = vpop.f32.mrf.mxu1  ;;  %v2063_v20 = vpop.f32.mrf.mxu0 }
 0x316   : > { %v1440_v51 = vadd.f32 %v1399_v24, %v3287_v46 }
 0x317   : > { %v2140_v17 = vadd.f32 %v3337_v60, %v2105_v7 }
 0x319   : > { %v2172_v63 = vmax.f32 %v2140_v17, 0.0 }
 0x31a   : > { %v1622_v36 = vpop.f32.mrf.mxu2  ;;  %v1841_v25 = vpop.f32.mrf.mxu3 }
 0x31b   : > { %2205 = vst.msk [vmem:[%s3347_s18 + $0xc0] sm:$0xff] %vm2180_vm3, %v2172_v63  ;;  %v1884_v53 = vadd.f32 %v1841_v25, %v1662_v37  ;;  %v1663_v1 = vadd.f32 %v1622_v36, %v1440_v51 }
 0x31d   : > { %v2106_v31 = vadd.f32 %v2063_v20, %v1884_v53  ;;  %v1401_v48 = vpop.f32.mrf.mxu1  ;;  %v2066_v54 = vpop.f32.mrf.mxu0 }
 0x31e   : > { %v1441_v23 = vadd.f32 %v1401_v48, %v3293_v27 }
 0x31f   : > { %v2141_v35 = vadd.f32 %v3337_v60, %v2106_v31 }
 0x321   : > { %v2173_v8 = vmax.f32 %v2141_v35, 0.0 }
 0x322   : > { %v1624_v52 = vpop.f32.mrf.mxu2  ;;  %v1844_v34 = vpop.f32.mrf.mxu3 }
 0x323   : > { %2206 = vst.msk [vmem:[%s3347_s18 + $0xc8] sm:$0xff] %vm2180_vm3, %v2173_v8  ;;  %v1885_v61 = vadd.f32 %v1844_v34, %v1663_v1  ;;  %v1664_v13 = vadd.f32 %v1624_v52, %v1441_v23 }
 0x325   : > { %v2107_v44 = vadd.f32 %v2066_v54, %v1885_v61  ;;  %v2068_v55 = vpop.f32.mrf.mxu0  ;;  %v1404_v47 = vpop.f32.mrf.mxu1 }
 0x326   : > { %v1442_v3 = vadd.f32 %v1404_v47, %v3301_v5 }
 0x327   : > { %v2142_v28 = vadd.f32 %v3337_v60, %v2107_v44 }
 0x329   : > { %v2174_v46 = vmax.f32 %v2142_v28, 0.0 }
 0x32a   : > { %v1627_v21 = vpop.f32.mrf.mxu2  ;;  %v1846_v40 = vpop.f32.mrf.mxu3 }
 0x32b   : > { %2207 = vst.msk [vmem:[%s3347_s18 + $0xd0] sm:$0xff] %vm2180_vm3, %v2174_v46  ;;  %v1886_v15 = vadd.f32 %v1846_v40, %v1664_v13  ;;  %v1665_v11 = vadd.f32 %v1627_v21, %v1442_v3 }
 0x32d   : > { %v2108_v59 = vadd.f32 %v2068_v55, %v1886_v15  ;;  %v2071_v45 = vpop.f32.mrf.mxu0  ;;  %v1406_v41 = vpop.f32.mrf.mxu1 }
 0x32e   : > { %v1443_v49 = vadd.f32 %v1406_v41, %v3307_v26 }
 0x32f   : > { %v2143_v38 = vadd.f32 %v3337_v60, %v2108_v59 }
 0x331   : > { %v2175_v27 = vmax.f32 %v2143_v38, 0.0 }
 0x332   : > { %v1629_v12 = vpop.f32.mrf.mxu2  ;;  %v1849_v4 = vpop.f32.mrf.mxu3 }
 0x333   : > { %2208 = vst.msk [vmem:[%s3347_s18 + $0xd8] sm:$0xff] %vm2180_vm3, %v2175_v27  ;;  %v1887_v57 = vadd.f32 %v1849_v4, %v1665_v11  ;;  %v1666_v30 = vadd.f32 %v1629_v12, %v1443_v49 }
 0x335   : > { %v2109_v19 = vadd.f32 %v2071_v45, %v1887_v57  ;;  %v2073_v2 = vpop.f32.mrf.mxu0  ;;  %v1409_v18 = vpop.f32.mrf.mxu1 }
 0x336   : > { %v1444_v14 = vadd.f32 %v1409_v18, %v3321_v16 }
 0x337   : > { %v2144_v10 = vadd.f32 %v3337_v60, %v2109_v19 }
 0x339   : > { %v2176_v5 = vmax.f32 %v2144_v10, 0.0 }
 0x33a   : > { %v1851_v32 = vpop.f32.mrf.mxu3  ;;  %v1632_v50 = vpop.f32.mrf.mxu2 }
 0x33b   : > { %2209 = vst.msk [vmem:[%s3347_s18 + $0xe0] sm:$0xff] %vm2180_vm3, %v2176_v5  ;;  %v1888_v56 = vadd.f32 %v1851_v32, %v1666_v30  ;;  %v1667_v29 = vadd.f32 %v1632_v50, %v1444_v14 }
 0x33d   : > { %v2110_v42 = vadd.f32 %v2073_v2, %v1888_v56  ;;  %v2076_v58 = vpop.f32.mrf.mxu0  ;;  %v1411_v62 = vpop.f32.mrf.mxu1 }
 0x33e   : > { %v1445_v7 = vadd.f32 %v1411_v62, %v3326_v0 }
 0x33f   : > { %v2145_v6 = vadd.f32 %v3337_v60, %v2110_v42 }
 0x341   : > { %v2177_v26 = vmax.f32 %v2145_v6, 0.0 }
 0x342   : > { %v1854_v9 = vpop.f32.mrf.mxu3  ;;  %v1634_v39 = vpop.f32.mrf.mxu2 }
 0x343   : > { %2210 = vst.msk [vmem:[%s3347_s18 + $0xe8] sm:$0xff] %vm2180_vm3, %v2177_v26  ;;  %v1889_v22 = vadd.f32 %v1854_v9, %v1667_v29  ;;  %v1668_v20 = vadd.f32 %v1634_v39, %v1445_v7 }
 0x345   : > { %v2111_v33 = vadd.f32 %v2076_v58, %v1889_v22  ;;  %v2078_v37 = vpop.f32.mrf.mxu0 }
 0x347   : > { %v2146_v24 = vadd.f32 %v3337_v60, %v2111_v33 }
 0x349   : > { %v2178_v16 = vmax.f32 %v2146_v24, 0.0 }
 0x34a   : > { %v1856_v43 = vpop.f32.mrf.mxu3 }
 0x34b   : > { %2211 = vst.msk [vmem:[%s3347_s18 + $0xf0] sm:$0xff] %vm2180_vm3, %v2178_v16  ;;  %v1890_v17 = vadd.f32 %v1856_v43, %v1668_v20 }
 0x34d   : > { %v2112_v63 = vadd.f32 %v2078_v37, %v1890_v17 }
 0x34f   : > { %v2147_v36 = vadd.f32 %v3337_v60, %v2112_v63 }
 0x351   : > { %v2179_v25 = vmax.f32 %v2147_v36, 0.0 }
 0x353   : > { %2212 = vst.msk [vmem:[%s3347_s18 + $0xf8] sm:$0xff] %vm2180_vm3, %v2179_v25 }
 0x354 PF: > { %s13_s12 = sadd.s32 1, %s2580_s12  }
 0x355   : > { %p10_p4 = scmp.ge.s32.totalorder %s13_s12, 4  }
 0x357   :  { %12 = sbr.rel (!%p10_p4) target bundleno = 1 (0x1), region = 72 }

// kernel: net_forward.5
= control target key start
LH: loop header
LB: loop body
LE: loop exit
PB: predicated region body
PF: predicated region fallthrough
CT: control target
= control target key end

     0   :  { %s1191_s12 = smov 0   ;;  %s1498_s0 = inlined_call_operand.vmem [shape: f32[2,9,2,9,64], index: 0, kind: input, shape index: {}]   ;;  %s1499_s1 = inlined_call_operand.vmem [shape: bf16[3,3,32,64], index: 1, kind: input, shape index: {}]   ;;  %s1500_s2 = inlined_call_operand.vmem [shape: f32[1,64], index: 2, kind: input, shape index: {}]   ;;  %s1501_s3 = inlined_call_operand.vmem [shape: f32[2,64,64], index: 3, kind: output, shape index: {}]  }
   0x1 LB: > { %s944_s13 = sadd.s32 4294967295, %s1168_s12   ;;  %p948_p0 = scmp.ge.s32.totalorder %s1168_s12, 1  ;;  %s1168_s12 = sphi %s1191_s12, %s13_s12  }
   0x2   : > { %p137_p1 = scmp.lt.s32.totalorder %s1168_s12, 3 }
   0x4   : > { %p138_p2 = pnand %p948_p0, %p137_p1 }
   0x5   : > { %p161_p3 = scmp.lt.s32.totalorder (!%p138_p2), %s944_s13, 1  ;;  %s1170_s22 = smov (!%p138_p2), 96  }
   0x6   : > { %141 = sbr.rel (%p138_p2) target bundleno = 419 (0x1a3), region = 32 }
   0xb   : > { %s1503_s13 = smov (!%p161_p3, %s944_s13), 1  ;;  %v1130_v0 = vld [vmem:[%s1499_s1 + $0x18] sm:$0xff]  ;;  %v1129_v1 = vld [vmem:[%s1499_s1 + $0x10] sm:$0xff]  ;;  %v1132_v29 = vld [vmem:[%s1499_s1 + $0x28] sm:$0xff]  ;;  %vm218_vm0 = vcmask 261120   ;;  %vm880_vm1 = vcmask 523264  }
   0xc   : > { %s1151_s16 = smul.u32 288, %s1503_s13  ;;  %1145 = vmatpush.bf16.msra.mxu1 %v1130_v0  ;;  %1146 = vmatpush.bf16.msra.mxu2 %v1130_v0  ;;  %v1128_v30 = vld [vmem:[%s1499_s1 + $0x8] sm:$0xff]  ;;  %v1134_v31 = vld [vmem:[%s1499_s1 + $0x38] sm:$0xff]  ;;  %v1131_v32 = vld [vmem:[%s1499_s1 + $0x20] sm:$0xff]  ;;  %s1126_s5 = sshll.u32 %s1503_s13, 6 }
   0xd   : > { %237 = vmatpush.bf16.msra.mxu0 %v1130_v0  ;;  %1147 = vmatpush.bf16.msra.mxu3 %v1130_v0  ;;  %v1127_v33 = vld [vmem:[%s1499_s1] sm:$0xff]  ;;  %v1136_v34 = vld [vmem:[%s1499_s1 + $0x48] sm:$0xff]  ;;  %v1133_v35 = vld [vmem:[%s1499_s1 + $0x30] sm:$0xff]  ;;  %s1448_s8 = scalar_lea.vmem %s1501_s3, %s1126_s5 }
   0xe   : > { %s1211_s21 = scalar_lea.vmem %s1498_s0, %s1151_s16  ;;  %v1135_v36 = vld [vmem:[%s1499_s1 + $0x40] sm:$0xff]  ;;  %v1140_v37 = vld [vmem:[%s1499_s1 + $0x68] sm:$0xff]  ;;  %v1138_v38 = vld [vmem:[%s1499_s1 + $0x58] sm:$0xff] }
   0xf   : > { %v177_v2 = vld [vmem:[%s1211_s21 + $0x80] sm:$0xff]  ;;  %v996_v8 = vld [vmem:[%s1211_s21 + $0x10] sm:$0xff]  ;;  %v1142_v41 = vld [vmem:[%s1499_s1 + $0x78] sm:$0xff] }
  0x10   : > { %v178_v3 = vld [vmem:[%s1211_s21 + $0xa0] sm:$0xff]  ;;  %1148 = vmatpush.bf16.msra.mxu1 %v1129_v1  ;;  %1149 = vmatpush.bf16.msra.mxu2 %v1129_v1  ;;  %v997_v9 = vld [vmem:[%s1211_s21 + $0x30] sm:$0xff]  ;;  %v1144_v42 = vld [vmem:[%s1499_s1 + $0x88] sm:$0xff] }
  0x11   : > { %v175_v4 = vld [vmem:[%s1211_s21 + $0x40] sm:$0xff]  ;;  %v1216_v5 = vpack.c.bf16 %v178_v3, %v177_v2  ;;  %238 = vmatpush.bf16.msra.mxu0 %v1129_v1  ;;  %1150 = vmatpush.bf16.msra.mxu3 %v1129_v1  ;;  %v1231_v12 = vpack.c.bf16 %v997_v9, %v996_v8  ;;  %v998_v16 = vld [vmem:[%s1211_s21 + $0x50] sm:$0xff] }
  0x12   : > { %v176_v6 = vld [vmem:[%s1211_s21 + $0x60] sm:$0xff]  ;;  %v999_v17 = vld [vmem:[%s1211_s21 + $0x70] sm:$0xff] }
  0x13   : > { %v1219_v7 = vpack.c.bf16 %v176_v6, %v175_v4  ;;  %202 = vrot.lane.b32.xlu0 %v1216_v5, %s1170_s22  ;;  %v179_v10 = vld [vmem:[%s1211_s21 + $0xc0] sm:$0xff]  ;;  %479 = vrot.lane.b32.xlu2 %v1231_v12, %s1170_s22  ;;  %v1242_v19 = vpack.c.bf16 %v999_v17, %v998_v16  ;;  %v1000_v20 = vld [vmem:[%s1211_s21 + $0x90] sm:$0xff]  ;;  %v1265_v27 = vpack.c.bf16 %v177_v2, %v176_v6 }
  0x14   : > { %v1229_v11 = vld [vmem:[%s1211_s21 + $0xe0] sm:$0xff]  ;;  %v1001_v21 = vld [vmem:[%s1211_s21 + $0xb0] sm:$0xff]  ;;  %v1269_v28 = vpack.c.bf16 %v179_v10, %v178_v3  ;;  %360 = vmatpush.bf16.msrb.mxu2 %v1132_v29  ;;  %290 = vmatpush.bf16.msrb.mxu1 %v1128_v30 }
  0x15   : > { %200 = vrot.lane.b32.xlu1 %v1219_v7, %s1170_s22  ;;  %v173_v13 = vld [vmem:[%s1211_s21] sm:$0xff]  ;;  %v1238_v15 = vpack.c.bf16 %v1229_v11, %v179_v10  ;;  %v1002_v22 = vld [vmem:[%s1211_s21 + $0xd0] sm:$0xff]  ;;  %v1253_v24 = vpack.c.bf16 %v1001_v21, %v1000_v20  ;;  %439 = vmatpush.bf16.msrb.mxu3 %v1134_v31 }
  0x16   : > { %v174_v14 = vld [vmem:[%s1211_s21 + $0x20] sm:$0xff]  ;;  %v1003_v23 = vld [vmem:[%s1211_s21 + $0xf0] sm:$0xff]  ;;  %517 = vmatpush.bf16.msrb.mxu0 %v1136_v34 }
  0x17   : > { %v181_v18 = vpack.c.bf16 %v174_v14, %v173_v13  ;;  %v1255_v25 = vpack.c.bf16 %v1003_v23, %v1002_v22  ;;  %v1257_v26 = vpack.c.bf16 %v175_v4, %v174_v14  ;;  %v313_v45 = vld [vmem:[%s1211_s21 + $0x1] sm:$0xff]  ;;  %v1141_v54 = vld [vmem:[%s1499_s1 + $0x70] sm:$0xff] }
  0x18   : > { %361 = vmatpush.bf16.msrb.mxu2 %v1131_v32  ;;  %291 = vmatpush.bf16.msrb.mxu1 %v1127_v33  ;;  %v314_v46 = vld [vmem:[%s1211_s21 + $0x21] sm:$0xff]  ;;  %v1137_v55 = vld [vmem:[%s1499_s1 + $0x50] sm:$0xff] }
  0x19   : > { %440 = vmatpush.bf16.msrb.mxu3 %v1133_v35  ;;  %v1067_v47 = vld [vmem:[%s1211_s21 + $0x100] sm:$0xff]  ;;  %v321_v49 = vpack.c.bf16 %v314_v46, %v313_v45  ;;  %v1036_v3 = vld [vmem:[%s1211_s21 + $0x11] sm:$0xff] }
  0x1a   : > { %518 = vmatpush.bf16.msrb.mxu0 %v1135_v36  ;;  %v1317_v48 = vpack.c.bf16 %v1067_v47, %v1229_v11  ;;  %v1139_v50 = vld [vmem:[%s1499_s1 + $0x60] sm:$0xff]  ;;  %v1037_v4 = vld [vmem:[%s1211_s21 + $0x31] sm:$0xff] }
  0x1b   : > { %204 = vrot.lane.b32.xlu0 %v1238_v15, %s1170_s22  ;;  %481 = vrot.lane.b32.xlu2 %v1242_v19, %s1170_s22  ;;  %v315_v52 = vld [vmem:[%s1211_s21 + $0x41] sm:$0xff]  ;;  %v1038_v8 = vld [vmem:[%s1211_s21 + $0x51] sm:$0xff] }
  0x1c   : > { %v316_v53 = vld [vmem:[%s1211_s21 + $0x61] sm:$0xff]  ;;  %v1039_v9 = vld [vmem:[%s1211_s21 + $0x71] sm:$0xff] }
  0x1d   : > { %198 = vrot.lane.b32.xlu1 %v181_v18, %s1170_s22  ;;  %v322_v56 = vpack.c.bf16 %v316_v53, %v315_v52  ;;  %v1143_v57 = vld [vmem:[%s1499_s1 + $0x80] sm:$0xff]  ;;  %v557_v10 = vpack.c.bf16 %v1039_v9, %v1038_v8  ;;  %v1040_v13 = vld [vmem:[%s1211_s21 + $0x91] sm:$0xff] }
  0x1e   : > { %v317_v59 = vld [vmem:[%s1211_s21 + $0x81] sm:$0xff]  ;;  %v1041_v14 = vld [vmem:[%s1211_s21 + $0xb1] sm:$0xff] }
  0x1f   : > { %v318_v60 = vld [vmem:[%s1211_s21 + $0xa1] sm:$0xff] }
  0x20   : > { %v323_v61 = vpack.c.bf16 %v318_v60, %v317_v59  ;;  %v319_v63 = vld [vmem:[%s1211_s21 + $0xc1] sm:$0xff] }
  0x21   : > { %v320_v0 = vld [vmem:[%s1211_s21 + $0xe1] sm:$0xff]  ;;  %v793_v17 = vpack.c.bf16 %v319_v63, %v318_v60 }
  0x22   : > { %v324_v1 = vpack.c.bf16 %v320_v0, %v319_v63  ;;  %v1107_v22 = vld [vmem:[%s1211_s21 + $0x101] sm:$0xff] }
  0x23   : > { %483 = vrot.lane.b32.xlu0 %v1253_v24, %s1170_s22  ;;  %714 = vrot.lane.b32.xlu2 %v1257_v26, %s1170_s22 }
  0x25   : > { %485 = vrot.lane.b32.xlu1 %v1255_v25, %s1170_s22 }
  0x2b   : > { %716 = vrot.lane.b32.xlu0 %v1265_v27, %s1170_s22  ;;  %720 = vrot.lane.b32.xlu2 %v1317_v48, %s1170_s22 }
  0x2d   : > { %718 = vrot.lane.b32.xlu1 %v1269_v28, %s1170_s22 }
  0x6d   : > { %v480_v51 = vpop.permute.xlu2 %479 }
  0x75   : > { %v482_v58 = vpop.permute.xlu2 %481 }
  0x7d   : > { %v715_v6 = vpop.permute.xlu2 %714 }
  0x85   : > { %v203_v39 = vpop.permute.xlu0 %202 }
  0x86   : > { %966 = vmatmul.msk.bf16.vlgmr.msra.gmra.mxu2 %vm218_vm0, %v203_v39 }
  0x87   : > { %v201_v40 = vpop.permute.xlu1 %200  ;;  %674 = vmatpush.bf16.msra.mxu2 %v1140_v37 }
  0x88   : > { %965 = vmatmul.msk.bf16.vlgmr.msra.gmra.mxu1 %vm218_vm0, %v201_v40 }
  0x89   : > { %595 = vmatpush.bf16.msra.mxu1 %v1138_v38 }
  0x8b   : > { %675 = vmatpush.bf16.msra.mxu2 %v1139_v50 }
  0x8d   : > { %v205_v43 = vpop.permute.xlu0 %204  ;;  %596 = vmatpush.bf16.msra.mxu1 %v1137_v55 }
  0x8e   : > { %967 = vmatmul.msk.bf16.vlgmr.msra.gmra.mxu3 %vm218_vm0, %v205_v43 }
  0x8f   : > { %v199_v44 = vpop.permute.xlu1 %198  ;;  %752 = vmatpush.bf16.msra.mxu3 %v1142_v41 }
  0x90   : > { %964 = vmatmul.msk.bf16.vlgmr.msra.gmra.mxu0 %vm218_vm0, %v199_v44 }
  0x91   : > { %830 = vmatpush.bf16.msra.mxu0 %v1144_v42 }
  0x93   : > { %753 = vmatpush.bf16.msra.mxu3 %v1141_v54 }
  0x95   : > { %831 = vmatpush.bf16.msra.mxu0 %v1143_v57  ;;  %v484_v62 = vpop.permute.xlu0 %483 }
  0x96   : > { %992 = vmatmul.msk.bf16.vlgmr.msrb.gmra.mxu2 %vm218_vm0, %v321_v49 }
  0x97   : > { %v486_v2 = vpop.permute.xlu1 %485 }
  0x98   : > { %976 = vmatmul.msk.bf16.vlgmr.msrb.gmra.mxu1 %vm218_vm0, %v181_v18  ;;  %v1042_v18 = vld [vmem:[%s1211_s21 + $0xd1] sm:$0xff] }
  0x9d   : > { %v717_v11 = vpop.permute.xlu0 %716 }
  0x9e   : > { %1016 = vmatmul.msk.bf16.vlgmr.msrb.gmra.mxu3 %vm218_vm0, %v1231_v12  ;;  %v792_v12 = vpack.c.bf16 %v317_v59, %v316_v53 }
  0x9f   : > { %v719_v16 = vpop.permute.xlu1 %718 }
  0xa0   : > { %1032 = vmatmul.msk.bf16.vlgmr.msrb.gmra.mxu0 %vm218_vm0, %v480_v51 }
  0xa6   : > { %993 = vmatmul.msk.bf16.gmra.mxu2 %vm218_vm0, %v322_v56 }
  0xa8   : > { %977 = vmatmul.msk.bf16.gmra.mxu1 %vm218_vm0, %v1219_v7  ;;  %v791_v7 = vpack.c.bf16 %v315_v52, %v314_v46 }
  0xae   : > { %1017 = vmatmul.msk.bf16.gmra.mxu3 %vm218_vm0, %v1242_v19  ;;  %v1043_v19 = vld [vmem:[%s1211_s21 + $0xf1] sm:$0xff] }
  0xaf   : > { %v559_v20 = vpack.c.bf16 %v1043_v19, %v1042_v18 }
  0xb0   : > { %1033 = vmatmul.msk.bf16.gmra.mxu0 %vm218_vm0, %v482_v58 }
  0xb6   : > { %994 = vmatmul.msk.bf16.gmra.mxu2 %vm218_vm0, %v323_v61 }
  0xb8   : > { %978 = vmatmul.msk.bf16.gmra.mxu1 %vm218_vm0, %v1216_v5  ;;  %v556_v5 = vpack.c.bf16 %v1037_v4, %v1036_v3 }
  0xbe   : > { %1018 = vmatmul.msk.bf16.gmra.mxu3 %vm218_vm0, %v1253_v24  ;;  %v721_v24 = vpop.permute.xlu2 %720 }
  0xc0   : > { %1034 = vmatmul.msk.bf16.gmra.mxu0 %vm218_vm0, %v484_v62 }
  0xc6   : > { %995 = vmatmul.msk.bf16.gmra.mxu2 %vm218_vm0, %v324_v1 }
  0xc8   : > { %979 = vmatmul.msk.bf16.gmra.mxu1 %vm218_vm0, %v1238_v15  ;;  %v558_v15 = vpack.c.bf16 %v1041_v14, %v1040_v13 }
  0xce   : > { %1019 = vmatmul.msk.bf16.gmra.mxu3 %vm218_vm0, %v1255_v25  ;;  %v794_v25 = vpack.c.bf16 %v1107_v22, %v320_v0 }
  0xd0   : > { %1035 = vmatmul.msk.bf16.gmra.mxu0 %vm218_vm0, %v486_v2 }
  0xd6   : > { %1080 = vmatmul.msk.bf16.vlgmr.msra.gmra.mxu2 %vm218_vm0, %v1257_v26 }
  0xd8   : > { %1056 = vmatmul.msk.bf16.vlgmr.msra.gmra.mxu1 %vm218_vm0, %v556_v5 }
  0xde   : > { %1096 = vmatmul.msk.bf16.vlgmr.msra.gmra.mxu3 %vm218_vm0, %v715_v6 }
  0xe0   : > { %1120 = vmatmul.msk.bf16.vlgmr.msra.gmra.mxu0 %vm218_vm0, %v791_v7 }
  0xe6   : > { %1081 = vmatmul.msk.bf16.gmra.mxu2 %vm218_vm0, %v1265_v27 }
  0xe8   : > { %1057 = vmatmul.msk.bf16.gmra.mxu1 %vm218_vm0, %v557_v10 }
  0xee   : > { %1097 = vmatmul.msk.bf16.gmra.mxu3 %vm218_vm0, %v717_v11 }
  0xf0   : > { %1121 = vmatmul.msk.bf16.gmra.mxu0 %vm218_vm0, %v792_v12 }
  0xf6   : > { %1082 = vmatmul.msk.bf16.gmra.mxu2 %vm218_vm0, %v1269_v28 }
  0xf8   : > { %1058 = vmatmul.msk.bf16.gmra.mxu1 %vm218_vm0, %v558_v15 }
  0xfe   : > { %1098 = vmatmul.msk.bf16.gmra.mxu3 %vm218_vm0, %v719_v16  ;;  %v1440_v16 = vld [vmem:[%s1500_s2] ss:$0 sm:$0xff] }
 0x100   : > { %1122 = vmatmul.msk.bf16.gmra.mxu0 %vm218_vm0, %v793_v17 }
 0x105   : > { %v1385_v21 = vpop.f32.mrf.mxu1 }
 0x106   : > { %1083 = vmatmul.msk.bf16.gmra.mxu2 %vm218_vm0, %v1317_v48 }
 0x108   : > { %1059 = vmatmul.msk.bf16.gmra.mxu1 %vm218_vm0, %v559_v20 }
 0x109   : > { %v1391_v23 = vpop.f32.mrf.mxu2 }
 0x10d   : > { %v240_v26 = vpop.f32.mrf.mxu0  ;;  %v1393_v27 = vpop.f32.mrf.mxu1 }
 0x10e   : > { %1099 = vmatmul.msk.bf16.gmra.mxu3 %vm218_vm0, %v721_v24 }
 0x110   : > { %1123 = vmatmul.msk.bf16.gmra.mxu0 %vm218_vm0, %v794_v25 }
 0x111   : > { %v1397_v28 = vpop.f32.mrf.mxu2  ;;  %v1399_v29 = vpop.f32.mrf.mxu3 }
 0x115   : > { %v242_v30 = vpop.f32.mrf.mxu0  ;;  %v293_v31 = vpop.f32.mrf.mxu1 }
 0x116   : > { %v294_v62 = vadd.f32 %v293_v31, %v240_v26 }
 0x119   : > { %v1401_v32 = vpop.f32.mrf.mxu3  ;;  %v363_v33 = vpop.f32.mrf.mxu2 }
 0x11a   : > { %v383_v1 = vadd.f32 %v363_v33, %v294_v62 }
 0x11d   : > { %v295_v34 = vpop.f32.mrf.mxu1  ;;  %v520_v35 = vpop.f32.mrf.mxu0 }
 0x11e   : > { %v296_v5 = vadd.f32 %v295_v34, %v242_v30 }
 0x121   : > { %v365_v36 = vpop.f32.mrf.mxu2  ;;  %v442_v37 = vpop.f32.mrf.mxu3 }
 0x122   : > { %v462_v2 = vadd.f32 %v442_v37, %v383_v1  ;;  %v384_v9 = vadd.f32 %v365_v36, %v296_v5 }
 0x124   : > { %v540_v6 = vadd.f32 %v520_v35, %v462_v2 }
 0x125   : > { %v298_v38 = vpop.f32.mrf.mxu1  ;;  %v522_v39 = vpop.f32.mrf.mxu0 }
 0x126   : > { %v299_v17 = vadd.f32 %v298_v38, %v1385_v21 }
 0x129   : > { %v368_v40 = vpop.f32.mrf.mxu2  ;;  %v444_v41 = vpop.f32.mrf.mxu3 }
 0x12a   : > { %v463_v11 = vadd.f32 %v444_v41, %v384_v9  ;;  %v385_v24 = vadd.f32 %v368_v40, %v299_v17 }
 0x12c   : > { %v541_v18 = vadd.f32 %v522_v39, %v463_v11 }
 0x12d   : > { %v300_v42 = vpop.f32.mrf.mxu1  ;;  %v525_v43 = vpop.f32.mrf.mxu0 }
 0x12e   : > { %v301_v36 = vadd.f32 %v300_v42, %v1393_v27 }
 0x131   : > { %v370_v44 = vpop.f32.mrf.mxu2  ;;  %v447_v45 = vpop.f32.mrf.mxu3 }
 0x132   : > { %v464_v30 = vadd.f32 %v447_v45, %v385_v24  ;;  %v386_v41 = vadd.f32 %v370_v44, %v301_v36 }
 0x134   : > { %v542_v37 = vadd.f32 %v525_v43, %v464_v30 }
 0x135   : > { %v1403_v46 = vpop.f32.mrf.mxu1  ;;  %v1405_v47 = vpop.f32.mrf.mxu0 }
 0x136   : > { %v304_v27 = vadd.f32 %v1403_v46, %v1391_v23 }
 0x139   : > { %v1407_v48 = vpop.f32.mrf.mxu2  ;;  %v449_v49 = vpop.f32.mrf.mxu3 }
 0x13a   : > { %v465_v1 = vadd.f32 %v449_v49, %v386_v41 }
 0x13c   : > { %v543_v42 = vadd.f32 %v1405_v47, %v465_v1 }
 0x13d   : > { %v1409_v50 = vpop.f32.mrf.mxu1  ;;  %v1411_v51 = vpop.f32.mrf.mxu0 }
 0x13e   : > { %v306_v46 = vadd.f32 %v1409_v50, %v1397_v28 }
 0x141   : > { %v1413_v52 = vpop.f32.mrf.mxu2  ;;  %v1415_v53 = vpop.f32.mrf.mxu3 }
 0x142   : > { %v388_v17 = vadd.f32 %v1413_v52, %v306_v46 }
 0x145   : > { %v1417_v54 = vpop.f32.mrf.mxu1  ;;  %v1419_v55 = vpop.f32.mrf.mxu0 }
 0x146   : > { %v309_v50 = vadd.f32 %v1417_v54, %v1399_v29 }
 0x149   : > { %v1421_v56 = vpop.f32.mrf.mxu2  ;;  %v1423_v57 = vpop.f32.mrf.mxu3 }
 0x14a   : > { %v389_v30 = vadd.f32 %v1421_v56, %v309_v50 }
 0x14d   : > { %v1425_v58 = vpop.f32.mrf.mxu1  ;;  %v1427_v59 = vpop.f32.mrf.mxu0 }
 0x14e   : > { %v311_v54 = vadd.f32 %v1425_v58, %v1401_v32 }
 0x151   : > { %v1429_v60 = vpop.f32.mrf.mxu2  ;;  %v1431_v61 = vpop.f32.mrf.mxu3 }
 0x155   : > { %v1433_v63 = vpop.f32.mrf.mxu0  ;;  %v598_v0 = vpop.f32.mrf.mxu1 }
 0x156   : > { %v618_v10 = vadd.f32 %v598_v0, %v540_v6 }
 0x159   : > { %v1435_v3 = vpop.f32.mrf.mxu3  ;;  %v677_v4 = vpop.f32.mrf.mxu2 }
 0x15a   : > { %v697_v12 = vadd.f32 %v677_v4, %v618_v10 }
 0x15d   : > { %v600_v7 = vpop.f32.mrf.mxu1  ;;  %v833_v8 = vpop.f32.mrf.mxu0 }
 0x15e   : > { %v619_v25 = vadd.f32 %v600_v7, %v541_v18 }
 0x161   : > { %v679_v13 = vpop.f32.mrf.mxu2  ;;  %v755_v14 = vpop.f32.mrf.mxu3 }
 0x162   : > { %v775_v15 = vadd.f32 %v755_v14, %v697_v12  ;;  %v698_v31 = vadd.f32 %v679_v13, %v619_v25 }
 0x164   : > { %v853_v19 = vadd.f32 %v833_v8, %v775_v15  ;;  %v387_v8 = vadd.f32 %v1407_v48, %v304_v27 }
 0x165   : > { %v603_v20 = vpop.f32.mrf.mxu1  ;;  %v835_v22 = vpop.f32.mrf.mxu0 }
 0x166   : > { %v864_v26 = vadd.f32 %v1440_v16, %v853_v19  ;;  %v620_v62 = vadd.f32 %v603_v20, %v542_v37  ;;  %v466_v10 = vadd.f32 %v1415_v53, %v387_v8  ;;  %v467_v20 = vadd.f32 %v1423_v57, %v388_v17 }
 0x168   : > { %v872_v33 = vmax.f32 %v864_v26, 0.0  ;;  %v544_v47 = vadd.f32 %v1411_v51, %v466_v10  ;;  %v545_v51 = vadd.f32 %v1419_v55, %v467_v20 }
 0x169   : > { %v682_v21 = vpop.f32.mrf.mxu2  ;;  %v757_v34 = vpop.f32.mrf.mxu3 }
 0x16a   : > { %881 = vst.msk [vmem:[%s1448_s8] sm:$0xff] %vm880_vm1, %v872_v33  ;;  %v776_v35 = vadd.f32 %v757_v34, %v698_v31  ;;  %v699_v45 = vadd.f32 %v682_v21, %v620_v62  ;;  %v468_v21 = vadd.f32 %v1431_v61, %v389_v30 }
 0x16c   : > { %v854_v38 = vadd.f32 %v835_v22, %v776_v35  ;;  %v546_v55 = vadd.f32 %v1427_v59, %v468_v21 }
 0x16d   : > { %v605_v39 = vpop.f32.mrf.mxu1  ;;  %v838_v40 = vpop.f32.mrf.mxu0 }
 0x16e   : > { %v865_v0 = vadd.f32 %v1440_v16, %v854_v38  ;;  %v621_v9 = vadd.f32 %v605_v39, %v543_v42  ;;  %v390_v39 = vadd.f32 %v1429_v60, %v311_v54 }
 0x170   : > { %v873_v2 = vmax.f32 %v865_v0, 0.0  ;;  %v469_v41 = vadd.f32 %v1435_v3, %v390_v39 }
 0x171   : > { %v684_v4 = vpop.f32.mrf.mxu2  ;;  %v760_v5 = vpop.f32.mrf.mxu3 }
 0x172   : > { %882 = vst.msk [vmem:[%s1448_s8 + $0x8] sm:$0xff] %vm880_vm1, %v873_v2  ;;  %v777_v6 = vadd.f32 %v760_v5, %v699_v45  ;;  %v700_v11 = vadd.f32 %v684_v4, %v621_v9  ;;  %v547_v58 = vadd.f32 %v1433_v63, %v469_v41 }
 0x174   : > { %v855_v43 = vadd.f32 %v838_v40, %v777_v6 }
 0x175   : > { %v840_v7 = vpop.f32.mrf.mxu0  ;;  %v608_v44 = vpop.f32.mrf.mxu1 }
 0x176   : > { %v866_v49 = vadd.f32 %v1440_v16, %v855_v43  ;;  %v622_v18 = vadd.f32 %v608_v44, %v544_v47 }
 0x178   : > { %v874_v12 = vmax.f32 %v866_v49, 0.0 }
 0x179   : > { %v687_v13 = vpop.f32.mrf.mxu2  ;;  %v762_v14 = vpop.f32.mrf.mxu3 }
 0x17a   : > { %883 = vst.msk [vmem:[%s1448_s8 + $0x10] sm:$0xff] %vm880_vm1, %v874_v12  ;;  %v778_v23 = vadd.f32 %v762_v14, %v700_v11  ;;  %v701_v22 = vadd.f32 %v687_v13, %v622_v18 }
 0x17c   : > { %v856_v15 = vadd.f32 %v840_v7, %v778_v23 }
 0x17d   : > { %v843_v48 = vpop.f32.mrf.mxu0  ;;  %v610_v19 = vpop.f32.mrf.mxu1 }
 0x17e   : > { %v867_v53 = vadd.f32 %v1440_v16, %v856_v15  ;;  %v623_v31 = vadd.f32 %v610_v19, %v545_v51 }
 0x180   : > { %v875_v24 = vmax.f32 %v867_v53, 0.0 }
 0x181   : > { %v689_v25 = vpop.f32.mrf.mxu2  ;;  %v765_v26 = vpop.f32.mrf.mxu3 }
 0x182   : > { %884 = vst.msk [vmem:[%s1448_s8 + $0x18] sm:$0xff] %vm880_vm1, %v875_v24  ;;  %v779_v28 = vadd.f32 %v765_v26, %v701_v22  ;;  %v702_v34 = vadd.f32 %v689_v25, %v623_v31 }
 0x184   : > { %v857_v52 = vadd.f32 %v843_v48, %v779_v28 }
 0x185   : > { %v845_v57 = vpop.f32.mrf.mxu0  ;;  %v613_v36 = vpop.f32.mrf.mxu1 }
 0x186   : > { %v868_v33 = vadd.f32 %v1440_v16, %v857_v52  ;;  %v624_v40 = vadd.f32 %v613_v36, %v546_v55 }
 0x188   : > { %v876_v35 = vmax.f32 %v868_v33, 0.0 }
 0x189   : > { %v767_v37 = vpop.f32.mrf.mxu3  ;;  %v692_v29 = vpop.f32.mrf.mxu2 }
 0x18a   : > { %885 = vst.msk [vmem:[%s1448_s8 + $0x20] sm:$0xff] %vm880_vm1, %v876_v35  ;;  %v780_v38 = vadd.f32 %v767_v37, %v702_v34  ;;  %v703_v62 = vadd.f32 %v692_v29, %v624_v40 }
 0x18c   : > { %v858_v56 = vadd.f32 %v845_v57, %v780_v38 }
 0x18d   : > { %v848_v1 = vpop.f32.mrf.mxu0  ;;  %v615_v32 = vpop.f32.mrf.mxu1 }
 0x18e   : > { %v869_v61 = vadd.f32 %v1440_v16, %v858_v56  ;;  %v625_v60 = vadd.f32 %v615_v32, %v547_v58 }
 0x190   : > { %v877_v0 = vmax.f32 %v869_v61, 0.0 }
 0x191   : > { %v770_v45 = vpop.f32.mrf.mxu3  ;;  %v694_v4 = vpop.f32.mrf.mxu2 }
 0x192   : > { %886 = vst.msk [vmem:[%s1448_s8 + $0x28] sm:$0xff] %vm880_vm1, %v877_v0  ;;  %v781_v2 = vadd.f32 %v770_v45, %v703_v62  ;;  %v704_v6 = vadd.f32 %v694_v4, %v625_v60 }
 0x194   : > { %v859_v59 = vadd.f32 %v848_v1, %v781_v2 }
 0x195   : > { %v850_v43 = vpop.f32.mrf.mxu0 }
 0x196   : > { %v870_v5 = vadd.f32 %v1440_v16, %v859_v59 }
 0x198   : > { %v878_v27 = vmax.f32 %v870_v5, 0.0 }
 0x199   : > { %v772_v3 = vpop.f32.mrf.mxu3 }
 0x19a   : > { %887 = vst.msk [vmem:[%s1448_s8 + $0x30] sm:$0xff] %vm880_vm1, %v878_v27  ;;  %v782_v42 = vadd.f32 %v772_v3, %v704_v6 }
 0x19c   : > { %v860_v7 = vadd.f32 %v850_v43, %v782_v42 }
 0x19e   : > { %v871_v44 = vadd.f32 %v1440_v16, %v860_v7 }
 0x1a0   : > { %v879_v8 = vmax.f32 %v871_v44, 0.0 }
 0x1a2   : > { %888 = vst.msk [vmem:[%s1448_s8 + $0x38] sm:$0xff] %vm880_vm1, %v879_v8 }
 0x1a3 PF: > { %s13_s12 = sadd.s32 1, %s1168_s12  }
 0x1a4   : > { %p10_p4 = scmp.ge.s32.totalorder %s13_s12, 4  }
 0x1a6   :  { %12 = sbr.rel (!%p10_p4) target bundleno = 1 (0x1), region = 72 }

// kernel: net_forward.7
= control target key start
LH: loop header
LB: loop body
LE: loop exit
PB: predicated region body
PF: predicated region fallthrough
CT: control target
= control target key end

     0   :  { %s2553_s1 = inlined_call_operand.vmem [shape: bf16[2048,128], index: 1, kind: input, shape index: {}]   ;;  %s2554_s2 = inlined_call_operand.vmem [shape: f32[1,128], index: 2, kind: input, shape index: {}]   ;;  %s2555_s0 = inlined_call_operand.vmem [shape: f32[8,2048], index: 0, kind: input, shape index: {}]   ;;  %s2556_s4 = inlined_call_operand.vmem [shape: f32[1,128], index: 4, kind: input, shape index: {}]   ;;  %s2557_s3 = inlined_call_operand.vmem [shape: bf16[128,128], index: 3, kind: input, shape index: {}]   ;;  %s2558_s5 = inlined_call_operand.vmem [shape: f32[8,128], index: 5, kind: output, shape index: {}]  }
   0x1   :  { %v1927_v0 = vld [vmem:[%s2553_s1 + $0x38] sm:$0xff]  ;;  %v1926_v4 = vld [vmem:[%s2553_s1 + $0x30] sm:$0xff]  ;;  %v1925_v8 = vld [vmem:[%s2553_s1 + $0x28] sm:$0xff] }
   0x2   :  { %v1935_v1 = vld [vmem:[%s2553_s1 + $0x78] sm:$0xff]  ;;  %1080 = vmatpush.bf16.msra.mxu0 %v1927_v0  ;;  %v1934_v5 = vld [vmem:[%s2553_s1 + $0x70] sm:$0xff]  ;;  %v1933_v9 = vld [vmem:[%s2553_s1 + $0x68] sm:$0xff] }
   0x3   :  { %v1943_v2 = vld [vmem:[%s2553_s1 + $0xb8] sm:$0xff]  ;;  %1093 = vmatpush.bf16.msra.mxu1 %v1935_v1  ;;  %v1942_v6 = vld [vmem:[%s2553_s1 + $0xb0] sm:$0xff]  ;;  %v1941_v10 = vld [vmem:[%s2553_s1 + $0xa8] sm:$0xff] }
   0x4   :  { %v1951_v3 = vld [vmem:[%s2553_s1 + $0xf8] sm:$0xff]  ;;  %1106 = vmatpush.bf16.msra.mxu2 %v1943_v2  ;;  %v1950_v7 = vld [vmem:[%s2553_s1 + $0xf0] sm:$0xff]  ;;  %v1949_v11 = vld [vmem:[%s2553_s1 + $0xe8] sm:$0xff] }
   0x5   :  { %1119 = vmatpush.bf16.msra.mxu3 %v1951_v3  ;;  %v1924_v12 = vld [vmem:[%s2553_s1 + $0x20] sm:$0xff]  ;;  %v1923_v16 = vld [vmem:[%s2553_s1 + $0x18] sm:$0xff]  ;;  %v1922_v20 = vld [vmem:[%s2553_s1 + $0x10] sm:$0xff] }
   0x6   :  { %1081 = vmatpush.bf16.msra.mxu0 %v1926_v4  ;;  %v1932_v13 = vld [vmem:[%s2553_s1 + $0x60] sm:$0xff]  ;;  %v1931_v17 = vld [vmem:[%s2553_s1 + $0x58] sm:$0xff]  ;;  %v1930_v21 = vld [vmem:[%s2553_s1 + $0x50] sm:$0xff] }
   0x7   :  { %1094 = vmatpush.bf16.msra.mxu1 %v1934_v5  ;;  %v1940_v14 = vld [vmem:[%s2553_s1 + $0xa0] sm:$0xff]  ;;  %v1939_v18 = vld [vmem:[%s2553_s1 + $0x98] sm:$0xff]  ;;  %v1938_v22 = vld [vmem:[%s2553_s1 + $0x90] sm:$0xff] }
   0x8   :  { %1107 = vmatpush.bf16.msra.mxu2 %v1942_v6  ;;  %v1948_v15 = vld [vmem:[%s2553_s1 + $0xe0] sm:$0xff]  ;;  %v1947_v19 = vld [vmem:[%s2553_s1 + $0xd8] sm:$0xff]  ;;  %v1946_v23 = vld [vmem:[%s2553_s1 + $0xd0] sm:$0xff] }
   0x9   :  { %1120 = vmatpush.bf16.msra.mxu3 %v1950_v7  ;;  %v1921_v24 = vld [vmem:[%s2553_s1 + $0x8] sm:$0xff]  ;;  %v1920_v28 = vld [vmem:[%s2553_s1] sm:$0xff]  ;;  %v1959_v32 = vld [vmem:[%s2553_s1 + $0x138] sm:$0xff] }
   0xa   :  { %1082 = vmatpush.bf16.msra.mxu0 %v1925_v8  ;;  %v1929_v25 = vld [vmem:[%s2553_s1 + $0x48] sm:$0xff]  ;;  %v1928_v29 = vld [vmem:[%s2553_s1 + $0x40] sm:$0xff]  ;;  %v22_v33 = vld [vmem:[%s2555_s0 + $0x10] sm:$0xff] }
   0xb   :  { %1095 = vmatpush.bf16.msra.mxu1 %v1933_v9  ;;  %v1937_v26 = vld [vmem:[%s2553_s1 + $0x88] sm:$0xff]  ;;  %v1936_v30 = vld [vmem:[%s2553_s1 + $0x80] sm:$0xff]  ;;  %v1967_v35 = vld [vmem:[%s2553_s1 + $0x178] sm:$0xff]  ;;  %v38_v40 = vpack.c.bf16 %v22_v33, %v22_v33 }
   0xc   :  { %1108 = vmatpush.bf16.msra.mxu2 %v1941_v10  ;;  %v1945_v27 = vld [vmem:[%s2553_s1 + $0xc8] sm:$0xff]  ;;  %v1944_v31 = vld [vmem:[%s2553_s1 + $0xc0] sm:$0xff]  ;;  %v23_v36 = vld [vmem:[%s2555_s0 + $0x18] sm:$0xff] }
   0xd   :  { %1121 = vmatpush.bf16.msra.mxu3 %v1949_v11  ;;  %v20_v34 = vld [vmem:[%s2555_s0] sm:$0xff]  ;;  %v21_v37 = vld [vmem:[%s2555_s0 + $0x8] sm:$0xff]  ;;  %v1975_v38 = vld [vmem:[%s2553_s1 + $0x1b8] sm:$0xff]  ;;  %v39_v42 = vpack.c.bf16 %v23_v36, %v23_v36 }
   0xe   :  { %1083 = vmatpush.bf16.msra.mxu0 %v1924_v12  ;;  %v1983_v39 = vld [vmem:[%s2553_s1 + $0x1f8] sm:$0xff]  ;;  %v36_v41 = vpack.c.bf16 %v20_v34, %v20_v34  ;;  %v37_v43 = vpack.c.bf16 %v21_v37, %v21_v37  ;;  %v1958_v44 = vld [vmem:[%s2553_s1 + $0x130] sm:$0xff]  ;;  %v1957_v48 = vld [vmem:[%s2553_s1 + $0x128] sm:$0xff] }
   0xf   :  { %1096 = vmatpush.bf16.msra.mxu1 %v1932_v13  ;;  %v1966_v45 = vld [vmem:[%s2553_s1 + $0x170] sm:$0xff]  ;;  %v1965_v49 = vld [vmem:[%s2553_s1 + $0x168] sm:$0xff]  ;;  %v1956_v52 = vld [vmem:[%s2553_s1 + $0x120] sm:$0xff] }
  0x10   :  { %1109 = vmatpush.bf16.msra.mxu2 %v1940_v14  ;;  %v1974_v46 = vld [vmem:[%s2553_s1 + $0x1b0] sm:$0xff]  ;;  %v1973_v50 = vld [vmem:[%s2553_s1 + $0x1a8] sm:$0xff]  ;;  %v1964_v53 = vld [vmem:[%s2553_s1 + $0x160] sm:$0xff] }
  0x11   :  { %1122 = vmatpush.bf16.msra.mxu3 %v1948_v15  ;;  %v1982_v47 = vld [vmem:[%s2553_s1 + $0x1f0] sm:$0xff]  ;;  %v1981_v51 = vld [vmem:[%s2553_s1 + $0x1e8] sm:$0xff]  ;;  %v1972_v54 = vld [vmem:[%s2553_s1 + $0x1a0] sm:$0xff] }
  0x12   :  { %1084 = vmatpush.bf16.msra.mxu0 %v1923_v16  ;;  %v1980_v55 = vld [vmem:[%s2553_s1 + $0x1e0] sm:$0xff]  ;;  %v1955_v56 = vld [vmem:[%s2553_s1 + $0x118] sm:$0xff]  ;;  %v1954_v60 = vld [vmem:[%s2553_s1 + $0x110] sm:$0xff] }
  0x13   :  { %1097 = vmatpush.bf16.msra.mxu1 %v1931_v17  ;;  %v1963_v57 = vld [vmem:[%s2553_s1 + $0x158] sm:$0xff]  ;;  %v1962_v61 = vld [vmem:[%s2553_s1 + $0x150] sm:$0xff]  ;;  %v1953_v0 = vld [vmem:[%s2553_s1 + $0x108] sm:$0xff] }
  0x14   :  { %1110 = vmatpush.bf16.msra.mxu2 %v1939_v18  ;;  %v1971_v58 = vld [vmem:[%s2553_s1 + $0x198] sm:$0xff]  ;;  %v1970_v62 = vld [vmem:[%s2553_s1 + $0x190] sm:$0xff]  ;;  %v1961_v1 = vld [vmem:[%s2553_s1 + $0x148] sm:$0xff] }
  0x15   :  { %1123 = vmatpush.bf16.msra.mxu3 %v1947_v19  ;;  %v1979_v59 = vld [vmem:[%s2553_s1 + $0x1d8] sm:$0xff]  ;;  %v1978_v63 = vld [vmem:[%s2553_s1 + $0x1d0] sm:$0xff]  ;;  %v1969_v2 = vld [vmem:[%s2553_s1 + $0x188] sm:$0xff] }
  0x16   :  { %1085 = vmatpush.bf16.msra.mxu0 %v1922_v20  ;;  %v1977_v3 = vld [vmem:[%s2553_s1 + $0x1c8] sm:$0xff]  ;;  %v1952_v4 = vld [vmem:[%s2553_s1 + $0x100] sm:$0xff]  ;;  %v1991_v8 = vld [vmem:[%s2553_s1 + $0x238] sm:$0xff] }
  0x17   :  { %1098 = vmatpush.bf16.msra.mxu1 %v1930_v21  ;;  %v1960_v5 = vld [vmem:[%s2553_s1 + $0x140] sm:$0xff]  ;;  %v26_v9 = vld [vmem:[%s2555_s0 + $0x30] sm:$0xff]  ;;  %v1999_v11 = vld [vmem:[%s2553_s1 + $0x278] sm:$0xff] }
  0x18   :  { %1111 = vmatpush.bf16.msra.mxu2 %v1938_v22  ;;  %v1968_v6 = vld [vmem:[%s2553_s1 + $0x180] sm:$0xff]  ;;  %v27_v12 = vld [vmem:[%s2555_s0 + $0x38] sm:$0xff]  ;;  %v25_v13 = vld [vmem:[%s2555_s0 + $0x28] sm:$0xff]  ;;  %v42_v16 = vpack.c.bf16 %v26_v9, %v26_v9 }
  0x19   :  { %1124 = vmatpush.bf16.msra.mxu3 %v1946_v23  ;;  %v1976_v7 = vld [vmem:[%s2553_s1 + $0x1c0] sm:$0xff]  ;;  %v2007_v14 = vld [vmem:[%s2553_s1 + $0x2b8] sm:$0xff]  ;;  %v43_v18 = vpack.c.bf16 %v27_v12, %v27_v12  ;;  %v41_v19 = vpack.c.bf16 %v25_v13, %v25_v13  ;;  %v1990_v20 = vld [vmem:[%s2553_s1 + $0x230] sm:$0xff] }
  0x1a   :  { %1086 = vmatpush.bf16.msra.mxu0 %v1921_v24  ;;  %v24_v10 = vld [vmem:[%s2555_s0 + $0x20] sm:$0xff]  ;;  %v2015_v15 = vld [vmem:[%s2553_s1 + $0x2f8] sm:$0xff]  ;;  %v1998_v21 = vld [vmem:[%s2553_s1 + $0x270] sm:$0xff] }
  0x1b   :  { %1099 = vmatpush.bf16.msra.mxu1 %v1929_v25  ;;  %v40_v17 = vpack.c.bf16 %v24_v10, %v24_v10  ;;  %v2006_v22 = vld [vmem:[%s2553_s1 + $0x2b0] sm:$0xff]  ;;  %v1989_v24 = vld [vmem:[%s2553_s1 + $0x228] sm:$0xff]  ;;  %v1995_v33 = vld [vmem:[%s2553_s1 + $0x258] sm:$0xff] }
  0x1c   :  { %1112 = vmatpush.bf16.msra.mxu2 %v1937_v26  ;;  %v2014_v23 = vld [vmem:[%s2553_s1 + $0x2f0] sm:$0xff]  ;;  %v1997_v25 = vld [vmem:[%s2553_s1 + $0x268] sm:$0xff]  ;;  %v2003_v34 = vld [vmem:[%s2553_s1 + $0x298] sm:$0xff] }
  0x1d   :  { %1125 = vmatpush.bf16.msra.mxu3 %v1945_v27  ;;  %v2005_v26 = vld [vmem:[%s2553_s1 + $0x2a8] sm:$0xff]  ;;  %v1986_v36 = vld [vmem:[%s2553_s1 + $0x210] sm:$0xff]  ;;  %v2027_v9 = vld [vmem:[%s2553_s1 + $0x358] sm:$0xff] }
  0x1e   :  { %1087 = vmatpush.bf16.msra.mxu0 %v1920_v28  ;;  %v2013_v27 = vld [vmem:[%s2553_s1 + $0x2e8] sm:$0xff]  ;;  %v1988_v28 = vld [vmem:[%s2553_s1 + $0x220] sm:$0xff]  ;;  %v1994_v37 = vld [vmem:[%s2553_s1 + $0x250] sm:$0xff] }
  0x1f   :  { %1100 = vmatpush.bf16.msra.mxu1 %v1928_v29  ;;  %v1996_v29 = vld [vmem:[%s2553_s1 + $0x260] sm:$0xff]  ;;  %v2035_v10 = vld [vmem:[%s2553_s1 + $0x398] sm:$0xff]  ;;  %v2018_v12 = vld [vmem:[%s2553_s1 + $0x310] sm:$0xff] }
  0x20   :  { %1113 = vmatpush.bf16.msra.mxu2 %v1936_v30  ;;  %v2004_v30 = vld [vmem:[%s2553_s1 + $0x2a0] sm:$0xff]  ;;  %v2026_v13 = vld [vmem:[%s2553_s1 + $0x350] sm:$0xff] }
  0x21   :  { %1126 = vmatpush.bf16.msra.mxu3 %v1944_v31  ;;  %1088 = vmatmul.bf16.vlgmr.msra.gmra.mxu0 %v36_v41  ;;  %v2012_v31 = vld [vmem:[%s2553_s1 + $0x2e0] sm:$0xff]  ;;  %v1993_v41 = vld [vmem:[%s2553_s1 + $0x248] sm:$0xff] }
  0x22   :  { %1132 = vmatpush.bf16.msrb.mxu0 %v1959_v32  ;;  %1101 = vmatmul.bf16.vlgmr.msra.gmra.mxu1 %v37_v43  ;;  %v1987_v32 = vld [vmem:[%s2553_s1 + $0x218] sm:$0xff]  ;;  %v2009_v43 = vld [vmem:[%s2553_s1 + $0x2c8] sm:$0xff] }
  0x23   :  { %1145 = vmatpush.bf16.msrb.mxu1 %v1967_v35  ;;  %1114 = vmatmul.bf16.vlgmr.msra.gmra.mxu2 %v38_v40  ;;  %v2011_v35 = vld [vmem:[%s2553_s1 + $0x2d8] sm:$0xff]  ;;  %v1985_v40 = vld [vmem:[%s2553_s1 + $0x208] sm:$0xff] }
  0x24   :  { %1158 = vmatpush.bf16.msrb.mxu2 %v1975_v38  ;;  %1127 = vmatmul.bf16.vlgmr.msra.gmra.mxu3 %v39_v42  ;;  %v2002_v38 = vld [vmem:[%s2553_s1 + $0x290] sm:$0xff]  ;;  %v2001_v42 = vld [vmem:[%s2553_s1 + $0x288] sm:$0xff] }
  0x25   :  { %1171 = vmatpush.bf16.msrb.mxu3 %v1983_v39  ;;  %v2010_v39 = vld [vmem:[%s2553_s1 + $0x2d0] sm:$0xff] }
  0x26   :  { %1133 = vmatpush.bf16.msrb.mxu0 %v1958_v44  ;;  %v1984_v44 = vld [vmem:[%s2553_s1 + $0x200] sm:$0xff] }
  0x27   :  { %1146 = vmatpush.bf16.msrb.mxu1 %v1966_v45  ;;  %v1992_v45 = vld [vmem:[%s2553_s1 + $0x240] sm:$0xff] }
  0x28   :  { %1159 = vmatpush.bf16.msrb.mxu2 %v1974_v46  ;;  %v2000_v46 = vld [vmem:[%s2553_s1 + $0x280] sm:$0xff] }
  0x29   :  { %1172 = vmatpush.bf16.msrb.mxu3 %v1982_v47  ;;  %v2008_v47 = vld [vmem:[%s2553_s1 + $0x2c0] sm:$0xff] }
  0x2a   :  { %1134 = vmatpush.bf16.msrb.mxu0 %v1957_v48  ;;  %v2023_v48 = vld [vmem:[%s2553_s1 + $0x338] sm:$0xff] }
  0x2b   :  { %1147 = vmatpush.bf16.msrb.mxu1 %v1965_v49  ;;  %v28_v49 = vld [vmem:[%s2555_s0 + $0x40] sm:$0xff] }
  0x2c   :  { %1160 = vmatpush.bf16.msrb.mxu2 %v1973_v50  ;;  %v30_v50 = vld [vmem:[%s2555_s0 + $0x50] sm:$0xff] }
  0x2d   :  { %1173 = vmatpush.bf16.msrb.mxu3 %v1981_v51  ;;  %v2031_v51 = vld [vmem:[%s2553_s1 + $0x378] sm:$0xff] }
  0x2e   :  { %1135 = vmatpush.bf16.msrb.mxu0 %v1956_v52  ;;  %v29_v52 = vld [vmem:[%s2555_s0 + $0x48] sm:$0xff] }
  0x2f   :  { %1148 = vmatpush.bf16.msrb.mxu1 %v1964_v53  ;;  %v31_v53 = vld [vmem:[%s2555_s0 + $0x58] sm:$0xff] }
  0x30   :  { %1161 = vmatpush.bf16.msrb.mxu2 %v1972_v54  ;;  %v2039_v54 = vld [vmem:[%s2553_s1 + $0x3b8] sm:$0xff] }
  0x31   :  { %1174 = vmatpush.bf16.msrb.mxu3 %v1980_v55  ;;  %v2047_v55 = vld [vmem:[%s2553_s1 + $0x3f8] sm:$0xff] }
  0x32   :  { %1136 = vmatpush.bf16.msrb.mxu0 %v1955_v56  ;;  %v44_v56 = vpack.c.bf16 %v28_v49, %v28_v49  ;;  %v2055_v49 = vld [vmem:[%s2557_s3 + $0x38] sm:$0xff] }
  0x33   :  { %1149 = vmatpush.bf16.msrb.mxu1 %v1963_v57  ;;  %v46_v57 = vpack.c.bf16 %v30_v50, %v30_v50 }
  0x34   :  { %1162 = vmatpush.bf16.msrb.mxu2 %v1971_v58  ;;  %v45_v58 = vpack.c.bf16 %v29_v52, %v29_v52  ;;  %v2054_v52 = vld [vmem:[%s2557_s3 + $0x30] sm:$0xff] }
  0x35   :  { %1175 = vmatpush.bf16.msrb.mxu3 %v1979_v59  ;;  %v47_v59 = vpack.c.bf16 %v31_v53, %v31_v53  ;;  %v2053_v53 = vld [vmem:[%s2557_s3 + $0x28] sm:$0xff] }
  0x36   :  { %1137 = vmatpush.bf16.msrb.mxu0 %v1954_v60  ;;  %v2022_v60 = vld [vmem:[%s2553_s1 + $0x330] sm:$0xff] }
  0x37   :  { %1150 = vmatpush.bf16.msrb.mxu1 %v1962_v61  ;;  %v2030_v61 = vld [vmem:[%s2553_s1 + $0x370] sm:$0xff] }
  0x38   :  { %1163 = vmatpush.bf16.msrb.mxu2 %v1970_v62  ;;  %v2038_v62 = vld [vmem:[%s2553_s1 + $0x3b0] sm:$0xff] }
  0x39   :  { %1176 = vmatpush.bf16.msrb.mxu3 %v1978_v63  ;;  %v2046_v63 = vld [vmem:[%s2553_s1 + $0x3f0] sm:$0xff] }
  0x3a   :  { %1138 = vmatpush.bf16.msrb.mxu0 %v1953_v0  ;;  %v2021_v0 = vld [vmem:[%s2553_s1 + $0x328] sm:$0xff] }
  0x3b   :  { %1151 = vmatpush.bf16.msrb.mxu1 %v1961_v1  ;;  %v2029_v1 = vld [vmem:[%s2553_s1 + $0x368] sm:$0xff] }
  0x3c   :  { %1164 = vmatpush.bf16.msrb.mxu2 %v1969_v2  ;;  %v2037_v2 = vld [vmem:[%s2553_s1 + $0x3a8] sm:$0xff] }
  0x3d   :  { %1177 = vmatpush.bf16.msrb.mxu3 %v1977_v3  ;;  %v2045_v3 = vld [vmem:[%s2553_s1 + $0x3e8] sm:$0xff] }
  0x3e   :  { %1139 = vmatpush.bf16.msrb.mxu0 %v1952_v4  ;;  %v2020_v4 = vld [vmem:[%s2553_s1 + $0x320] sm:$0xff] }
  0x3f   :  { %1152 = vmatpush.bf16.msrb.mxu1 %v1960_v5  ;;  %v2028_v5 = vld [vmem:[%s2553_s1 + $0x360] sm:$0xff] }
  0x40   :  { %1165 = vmatpush.bf16.msrb.mxu2 %v1968_v6  ;;  %v2036_v6 = vld [vmem:[%s2553_s1 + $0x3a0] sm:$0xff] }
  0x41   :  { %1178 = vmatpush.bf16.msrb.mxu3 %v1976_v7  ;;  %1140 = vmatmul.bf16.vlgmr.msrb.gmra.mxu0 %v40_v17  ;;  %v2044_v7 = vld [vmem:[%s2553_s1 + $0x3e0] sm:$0xff]  ;;  %v2025_v17 = vld [vmem:[%s2553_s1 + $0x348] sm:$0xff] }
  0x42   :  { %1184 = vmatpush.bf16.msra.mxu0 %v1991_v8  ;;  %1153 = vmatmul.bf16.vlgmr.msrb.gmra.mxu1 %v41_v19  ;;  %v2019_v8 = vld [vmem:[%s2553_s1 + $0x318] sm:$0xff]  ;;  %v2041_v19 = vld [vmem:[%s2553_s1 + $0x3c8] sm:$0xff] }
  0x43   :  { %1197 = vmatpush.bf16.msra.mxu1 %v1999_v11  ;;  %1166 = vmatmul.bf16.vlgmr.msrb.gmra.mxu2 %v42_v16  ;;  %v2043_v11 = vld [vmem:[%s2553_s1 + $0x3d8] sm:$0xff]  ;;  %v2017_v16 = vld [vmem:[%s2553_s1 + $0x308] sm:$0xff] }
  0x44   :  { %1210 = vmatpush.bf16.msra.mxu2 %v2007_v14  ;;  %1179 = vmatmul.bf16.vlgmr.msrb.gmra.mxu3 %v43_v18  ;;  %v2034_v14 = vld [vmem:[%s2553_s1 + $0x390] sm:$0xff]  ;;  %v2033_v18 = vld [vmem:[%s2553_s1 + $0x388] sm:$0xff] }
  0x45   :  { %1223 = vmatpush.bf16.msra.mxu3 %v2015_v15  ;;  %v2042_v15 = vld [vmem:[%s2553_s1 + $0x3d0] sm:$0xff] }
  0x46   :  { %1185 = vmatpush.bf16.msra.mxu0 %v1990_v20  ;;  %v2016_v20 = vld [vmem:[%s2553_s1 + $0x300] sm:$0xff] }
  0x47   :  { %1198 = vmatpush.bf16.msra.mxu1 %v1998_v21  ;;  %v2024_v21 = vld [vmem:[%s2553_s1 + $0x340] sm:$0xff] }
  0x48   :  { %1211 = vmatpush.bf16.msra.mxu2 %v2006_v22  ;;  %v2032_v22 = vld [vmem:[%s2553_s1 + $0x380] sm:$0xff] }
  0x49   :  { %1224 = vmatpush.bf16.msra.mxu3 %v2014_v23  ;;  %v32_v23 = vld [vmem:[%s2555_s0 + $0x60] sm:$0xff] }
  0x4a   :  { %1186 = vmatpush.bf16.msra.mxu0 %v1989_v24  ;;  %v33_v24 = vld [vmem:[%s2555_s0 + $0x68] sm:$0xff] }
  0x4b   :  { %1199 = vmatpush.bf16.msra.mxu1 %v1997_v25  ;;  %v2040_v25 = vld [vmem:[%s2553_s1 + $0x3c0] sm:$0xff] }
  0x4c   :  { %1212 = vmatpush.bf16.msra.mxu2 %v2005_v26  ;;  %v34_v26 = vld [vmem:[%s2555_s0 + $0x70] sm:$0xff] }
  0x4d   :  { %1225 = vmatpush.bf16.msra.mxu3 %v2013_v27  ;;  %v35_v27 = vld [vmem:[%s2555_s0 + $0x78] sm:$0xff] }
  0x4e   :  { %1187 = vmatpush.bf16.msra.mxu0 %v1988_v28  ;;  %v48_v28 = vpack.c.bf16 %v32_v23, %v32_v23 }
  0x4f   :  { %1200 = vmatpush.bf16.msra.mxu1 %v1996_v29  ;;  %v49_v29 = vpack.c.bf16 %v33_v24, %v33_v24 }
  0x50   :  { %1213 = vmatpush.bf16.msra.mxu2 %v2004_v30  ;;  %v50_v30 = vpack.c.bf16 %v34_v26, %v34_v26 }
  0x51   :  { %1226 = vmatpush.bf16.msra.mxu3 %v2012_v31  ;;  %v51_v31 = vpack.c.bf16 %v35_v27, %v35_v27  ;;  %v2057_v27 = vld [vmem:[%s2556_s4] ss:$0 sm:$0xff] }
  0x52   :  { %1188 = vmatpush.bf16.msra.mxu0 %v1987_v32  ;;  %v2056_v32 = vld [vmem:[%s2554_s2] ss:$0 sm:$0xff] }
  0x53   :  { %1201 = vmatpush.bf16.msra.mxu1 %v1995_v33 }
  0x54   :  { %1214 = vmatpush.bf16.msra.mxu2 %v2003_v34 }
  0x55   :  { %1227 = vmatpush.bf16.msra.mxu3 %v2011_v35 }
  0x56   :  { %1189 = vmatpush.bf16.msra.mxu0 %v1986_v36 }
  0x57   :  { %1202 = vmatpush.bf16.msra.mxu1 %v1994_v37 }
  0x58   :  { %1215 = vmatpush.bf16.msra.mxu2 %v2002_v38 }
  0x59   :  { %1228 = vmatpush.bf16.msra.mxu3 %v2010_v39 }
  0x5a   :  { %1190 = vmatpush.bf16.msra.mxu0 %v1985_v40 }
  0x5b   :  { %1203 = vmatpush.bf16.msra.mxu1 %v1993_v41 }
  0x5c   :  { %1216 = vmatpush.bf16.msra.mxu2 %v2001_v42 }
  0x5d   :  { %1229 = vmatpush.bf16.msra.mxu3 %v2009_v43 }
  0x5e   :  { %1191 = vmatpush.bf16.msra.mxu0 %v1984_v44 }
  0x5f   :  { %1204 = vmatpush.bf16.msra.mxu1 %v1992_v45 }
  0x60   :  { %1217 = vmatpush.bf16.msra.mxu2 %v2000_v46 }
  0x61   :  { %1230 = vmatpush.bf16.msra.mxu3 %v2008_v47  ;;  %1192 = vmatmul.bf16.vlgmr.msra.gmra.mxu0 %v44_v56  ;;  %v2052_v56 = vld [vmem:[%s2557_s3 + $0x20] sm:$0xff] }
  0x62   :  { %1236 = vmatpush.bf16.msrb.mxu0 %v2023_v48  ;;  %1205 = vmatmul.bf16.vlgmr.msra.gmra.mxu1 %v45_v58 }
  0x63   :  { %1249 = vmatpush.bf16.msrb.mxu1 %v2031_v51  ;;  %1218 = vmatmul.bf16.vlgmr.msra.gmra.mxu2 %v46_v57  ;;  %v2051_v57 = vld [vmem:[%s2557_s3 + $0x18] sm:$0xff] }
  0x64   :  { %1262 = vmatpush.bf16.msrb.mxu2 %v2039_v54  ;;  %1231 = vmatmul.bf16.vlgmr.msra.gmra.mxu3 %v47_v59  ;;  %v2050_v59 = vld [vmem:[%s2557_s3 + $0x10] sm:$0xff] }
  0x65   :  { %1275 = vmatpush.bf16.msrb.mxu3 %v2047_v55 }
  0x66   :  { %1237 = vmatpush.bf16.msrb.mxu0 %v2022_v60 }
  0x67   :  { %1250 = vmatpush.bf16.msrb.mxu1 %v2030_v61  ;;  %v2049_v61 = vld [vmem:[%s2557_s3 + $0x8] sm:$0xff] }
  0x68   :  { %1263 = vmatpush.bf16.msrb.mxu2 %v2038_v62 }
  0x69   :  { %1276 = vmatpush.bf16.msrb.mxu3 %v2046_v63 }
  0x6a   :  { %1238 = vmatpush.bf16.msrb.mxu0 %v2021_v0 }
  0x6b   :  { %1251 = vmatpush.bf16.msrb.mxu1 %v2029_v1 }
  0x6c   :  { %1264 = vmatpush.bf16.msrb.mxu2 %v2037_v2  ;;  %v2048_v2 = vld [vmem:[%s2557_s3] sm:$0xff] }
  0x6d   :  { %1277 = vmatpush.bf16.msrb.mxu3 %v2045_v3 }
  0x6e   :  { %1239 = vmatpush.bf16.msrb.mxu0 %v2020_v4 }
  0x6f   :  { %1252 = vmatpush.bf16.msrb.mxu1 %v2028_v5 }
  0x70   :  { %1265 = vmatpush.bf16.msrb.mxu2 %v2036_v6 }
  0x71   :  { %1278 = vmatpush.bf16.msrb.mxu3 %v2044_v7 }
  0x72   :  { %1240 = vmatpush.bf16.msrb.mxu0 %v2019_v8 }
  0x73   :  { %1253 = vmatpush.bf16.msrb.mxu1 %v2027_v9 }
  0x74   :  { %1266 = vmatpush.bf16.msrb.mxu2 %v2035_v10 }
  0x75   :  { %1279 = vmatpush.bf16.msrb.mxu3 %v2043_v11 }
  0x76   :  { %1241 = vmatpush.bf16.msrb.mxu0 %v2018_v12 }
  0x77   :  { %1254 = vmatpush.bf16.msrb.mxu1 %v2026_v13 }
  0x78   :  { %1267 = vmatpush.bf16.msrb.mxu2 %v2034_v14 }
  0x79   :  { %1280 = vmatpush.bf16.msrb.mxu3 %v2042_v15 }
  0x7a   :  { %1242 = vmatpush.bf16.msrb.mxu0 %v2017_v16 }
  0x7b   :  { %1255 = vmatpush.bf16.msrb.mxu1 %v2025_v17 }
  0x7c   :  { %1268 = vmatpush.bf16.msrb.mxu2 %v2033_v18 }
  0x7d   :  { %1281 = vmatpush.bf16.msrb.mxu3 %v2041_v19 }
  0x7e   :  { %1243 = vmatpush.bf16.msrb.mxu0 %v2016_v20 }
  0x7f   :  { %1256 = vmatpush.bf16.msrb.mxu1 %v2024_v21 }
  0x80   :  { %1269 = vmatpush.bf16.msrb.mxu2 %v2032_v22 }
  0x81   :  { %1282 = vmatpush.bf16.msrb.mxu3 %v2040_v25  ;;  %1244 = vmatmul.bf16.vlgmr.msrb.gmra.mxu0 %v48_v28 }
  0x82   :  { %1257 = vmatmul.bf16.vlgmr.msrb.gmra.mxu1 %v49_v29  ;;  %1358 = vmatpush.bf16.msra.mxu0 %v2055_v49 }
  0x83   :  { %1270 = vmatmul.bf16.vlgmr.msrb.gmra.mxu2 %v50_v30 }
  0x84   :  { %1283 = vmatmul.bf16.vlgmr.msrb.gmra.mxu3 %v51_v31 }
  0x86   :  { %1359 = vmatpush.bf16.msra.mxu0 %v2054_v52 }
  0x8a   :  { %1360 = vmatpush.bf16.msra.mxu0 %v2053_v53 }
  0x8e   :  { %1361 = vmatpush.bf16.msra.mxu0 %v2052_v56 }
  0x92   :  { %1362 = vmatpush.bf16.msra.mxu0 %v2051_v57 }
  0x96   :  { %1363 = vmatpush.bf16.msra.mxu0 %v2050_v59 }
  0x9a   :  { %1364 = vmatpush.bf16.msra.mxu0 %v2049_v61 }
  0x9e   :  { %v1089_v33 = vpop.f32.mrf.mxu0  ;;  %1365 = vmatpush.bf16.msra.mxu0 %v2048_v2 }
  0x9f   :  { %v1090_v34 = vadd.f32 %v2056_v32, %v1089_v33  ;;  %v1102_v35 = vpop.f32.mrf.mxu1 }
  0xa1   :  { %v1103_v36 = vadd.f32 %v1102_v35, %v1090_v34 }
  0xa6   :  { %v1115_v37 = vpop.f32.mrf.mxu2  ;;  %v1091_v40 = vpop.f32.mrf.mxu0 }
  0xa7   :  { %v1116_v38 = vadd.f32 %v1115_v37, %v1103_v36  ;;  %v1128_v39 = vpop.f32.mrf.mxu3  ;;  %v1104_v42 = vpop.f32.mrf.mxu1 }
  0xa9   :  { %v1129_v41 = vadd.f32 %v1128_v39, %v1116_v38 }
  0xae   :  { %v1117_v43 = vpop.f32.mrf.mxu2 }
  0xaf   :  { %v1130_v44 = vpop.f32.mrf.mxu3 }
  0xbe   :  { %v1141_v45 = vpop.f32.mrf.mxu0 }
  0xbf   :  { %v1154_v46 = vpop.f32.mrf.mxu1  ;;  %v1142_v62 = vadd.f32 %v1141_v45, %v1129_v41 }
  0xc1   :  { %v1155_v3 = vadd.f32 %v1154_v46, %v1142_v62 }
  0xc6   :  { %v1167_v47 = vpop.f32.mrf.mxu2  ;;  %v1143_v50 = vpop.f32.mrf.mxu0 }
  0xc7   :  { %v1180_v48 = vpop.f32.mrf.mxu3  ;;  %v1156_v51 = vpop.f32.mrf.mxu1  ;;  %v1168_v5 = vadd.f32 %v1167_v47, %v1155_v3 }
  0xc9   :  { %v1181_v8 = vadd.f32 %v1180_v48, %v1168_v5 }
  0xce   :  { %v1169_v54 = vpop.f32.mrf.mxu2 }
  0xcf   :  { %v1182_v55 = vpop.f32.mrf.mxu3 }
  0xde   :  { %v1193_v58 = vpop.f32.mrf.mxu0 }
  0xdf   :  { %v1206_v60 = vpop.f32.mrf.mxu1  ;;  %v1194_v9 = vadd.f32 %v1193_v58, %v1181_v8 }
  0xe1   :  { %v1207_v10 = vadd.f32 %v1206_v60, %v1194_v9 }
  0xe6   :  { %v1219_v63 = vpop.f32.mrf.mxu2  ;;  %v1195_v1 = vpop.f32.mrf.mxu0 }
  0xe7   :  { %v1232_v0 = vpop.f32.mrf.mxu3  ;;  %v1208_v4 = vpop.f32.mrf.mxu1  ;;  %v1220_v11 = vadd.f32 %v1219_v63, %v1207_v10 }
  0xe9   :  { %v1233_v12 = vadd.f32 %v1232_v0, %v1220_v11 }
  0xee   :  { %v1221_v6 = vpop.f32.mrf.mxu2 }
  0xef   :  { %v1234_v7 = vpop.f32.mrf.mxu3 }
  0xfe   :  { %v1245_v13 = vpop.f32.mrf.mxu0 }
  0xff   :  { %v1258_v14 = vpop.f32.mrf.mxu1  ;;  %v1246_v15 = vadd.f32 %v1245_v13, %v1233_v12 }
 0x101   :  { %v1259_v16 = vadd.f32 %v1258_v14, %v1246_v15 }
 0x106   :  { %v1271_v17 = vpop.f32.mrf.mxu2  ;;  %v1247_v20 = vpop.f32.mrf.mxu0 }
 0x107   :  { %v1284_v18 = vpop.f32.mrf.mxu3  ;;  %v1272_v19 = vadd.f32 %v1271_v17, %v1259_v16  ;;  %v1260_v21 = vpop.f32.mrf.mxu1 }
 0x109   :  { %v1285_v22 = vadd.f32 %v1284_v18, %v1272_v19 }
 0x10b   :  { %v1288_v23 = vmax.f32 %v1285_v22, 0.0 }
 0x10d   :  { %v1289_v24 = vpack.c.bf16 %v1288_v23, %v1288_v23 }
 0x10e   :  { %v1273_v25 = vpop.f32.mrf.mxu2 }
 0x10f   :  { %v1286_v26 = vpop.f32.mrf.mxu3  ;;  %1366 = vmatmul.bf16.vlgmr.msra.gmra.mxu0 %v1289_v24 }
 0x18c   :  { %v1367_v28 = vpop.f32.mrf.mxu0 }
 0x18d   :  { %v1368_v29 = vadd.f32 %v2057_v27, %v1367_v28 }
 0x18f   :  { %1371 = vst [vmem:[%s2558_s5] sm:$0xff] %v1368_v29 }
 0x194   :  { %v1369_v30 = vpop.f32.mrf.mxu0 }

// kernel: net_forward.6
= control target key start
LH: loop header
LB: loop body
LE: loop exit
PB: predicated region body
PF: predicated region fallthrough
CT: control target
= control target key end

     0   :  { %s3185_s12 = smov 0   ;;  %s3763_s0 = inlined_call_operand.vmem [shape: f32[2,5,2,5,128], index: 0, kind: input, shape index: {}]   ;;  %s3764_s1 = inlined_call_operand.vmem [shape: bf16[3,3,64,128], index: 1, kind: input, shape index: {}]   ;;  %s3765_s2 = inlined_call_operand.vmem [shape: f32[1,128], index: 2, kind: input, shape index: {}]   ;;  %s3766_s3 = inlined_call_operand.vmem [shape: f32[2,16,128], index: 3, kind: output, shape index: {}]  }
   0x1 LB: > { %s2100_s13 = sadd.s32 4294967295, %s3162_s12   ;;  %p2104_p0 = scmp.ge.s32.totalorder %s3162_s12, 1  ;;  %s3162_s12 = sphi %s3185_s12, %s13_s12  }
   0x2   : > { %p137_p1 = scmp.lt.s32.totalorder %s3162_s12, 3 }
   0x4   : > { %p138_p2 = pnand %p2104_p0, %p137_p1 }
   0x5   : > { %p161_p3 = scmp.lt.s32.totalorder (!%p138_p2), %s2100_s13, 1  ;;  %s3164_s15 = smov (!%p138_p2), 64  }
   0x6   : > { %141 = sbr.rel (%p138_p2) target bundleno = 400 (0x190), region = 32 }
   0xb   : > { %v3012_v0 = vld [vmem:[%s3764_s1 + $0x58] sm:$0xff]  ;;  %s3768_s13 = smov (!%p161_p3, %s2100_s13), 1  ;;  %v3011_v3 = vld [vmem:[%s3764_s1 + $0x50] sm:$0xff]  ;;  %v3010_v9 = vld [vmem:[%s3764_s1 + $0x48] sm:$0xff]  ;;  %vm219_vm0 = vcmask 523264  }
   0xc   : > { %318 = vmatpush.bf16.msra.mxu2 %v3012_v0  ;;  %v3016_v1 = vld [vmem:[%s3764_s1 + $0x78] sm:$0xff]  ;;  %s3145_s22 = smul.u32 80, %s3768_s13  ;;  %v3015_v4 = vld [vmem:[%s3764_s1 + $0x70] sm:$0xff]  ;;  %v3014_v13 = vld [vmem:[%s3764_s1 + $0x68] sm:$0xff] }
   0xd   : > { %v3004_v2 = vld [vmem:[%s3764_s1 + $0x18] sm:$0xff]  ;;  %371 = vmatpush.bf16.msra.mxu3 %v3016_v1  ;;  %v3003_v5 = vld [vmem:[%s3764_s1 + $0x10] sm:$0xff]  ;;  %v3002_v14 = vld [vmem:[%s3764_s1 + $0x8] sm:$0xff] }
   0xe   : > { %267 = vmatpush.bf16.msra.mxu1 %v3004_v2  ;;  %v3008_v6 = vld [vmem:[%s3764_s1 + $0x38] sm:$0xff]  ;;  %s3220_s4 = scalar_lea.vmem %s3763_s0, %s3145_s22  ;;  %v3007_v16 = vld [vmem:[%s3764_s1 + $0x30] sm:$0xff]  ;;  %v3009_v17 = vld [vmem:[%s3764_s1 + $0x40] sm:$0xff]  ;;  %s3000_s22 = sshll.u32 %s3768_s13, 4 }
   0xf   : > { %227 = vmatpush.bf16.msra.mxu0 %v3008_v6  ;;  %v173_v7 = vld [vmem:[%s3220_s4] sm:$0xf]  ;;  %v2175_v8 = vld [vmem:[%s3220_s4 + $0x8] sm:$0xf]  ;;  %v2398_v12 = vld [vmem:[%s3220_s4 + $0x18] sm:$0xf]  ;;  %s3751_s25 = scalar_lea.vmem %s3766_s3, %s3000_s22 }
  0x10   : > { %319 = vmatpush.bf16.msra.mxu2 %v3011_v3  ;;  %v174_v10 = vpack.c.bf16 %v173_v7, %v173_v7  ;;  %v330_v11 = vpack.c.bf16 %v2175_v8, %v2175_v8  ;;  %v3234_v15 = vpack.c.bf16 %v2398_v12, %v2398_v12  ;;  %v2252_v18 = vld [vmem:[%s3220_s4 + $0x10] sm:$0xf]  ;;  %v3013_v20 = vld [vmem:[%s3764_s1 + $0x60] sm:$0xff]  ;;  %v3028_v24 = vld [vmem:[%s3764_s1 + $0xd8] sm:$0xff] }
  0x11   : > { %372 = vmatpush.bf16.msra.mxu3 %v3015_v4  ;;  %v2329_v19 = vld [vmem:[%s3220_s4 + $0x10] sm:$0xf]  ;;  %v2552_v21 = vld [vmem:[%s3220_s4 + $0x20] sm:$0xf]  ;;  %v3006_v25 = vld [vmem:[%s3764_s1 + $0x28] sm:$0xff]  ;;  %v488_v26 = vpack.c.bf16 %v2252_v18, %v2252_v18 }
  0x12   : > { %268 = vmatpush.bf16.msra.mxu1 %v3003_v5  ;;  %193 = vrot.lane.b32.xlu0 %v174_v10, %s3164_s15  ;;  %v276_v22 = vld [vmem:[%s3220_s4 + $0x1] sm:$0xf]  ;;  %v3262_v27 = vpack.c.bf16 %v2329_v19, %v2329_v19  ;;  %v3264_v28 = vpack.c.bf16 %v2552_v21, %v2552_v21  ;;  %v3032_v30 = vld [vmem:[%s3764_s1 + $0xf8] sm:$0xff]  ;;  %v3027_v32 = vld [vmem:[%s3764_s1 + $0xd0] sm:$0xff] }
  0x13   : > { %391 = vrot.lane.b32.xlu1 %v330_v11, %s3164_s15  ;;  %863 = vrot.lane.b32.xlu2 %v3234_v15, %s3164_s15  ;;  %v3001_v23 = vld [vmem:[%s3764_s1] sm:$0xff]  ;;  %v277_v29 = vpack.c.bf16 %v276_v22, %v276_v22  ;;  %v3024_v31 = vld [vmem:[%s3764_s1 + $0xb8] sm:$0xff] }
  0x14   : > { %320 = vmatpush.bf16.msra.mxu2 %v3010_v9  ;;  %228 = vmatpush.bf16.msra.mxu0 %v3007_v16  ;;  %v3005_v33 = vld [vmem:[%s3764_s1 + $0x20] sm:$0xff]  ;;  %v2621_v35 = vld [vmem:[%s3220_s4 + $0x28] sm:$0xf]  ;;  %v2775_v36 = vld [vmem:[%s3220_s4 + $0x30] sm:$0xf] }
  0x15   : > { %373 = vmatpush.bf16.msra.mxu3 %v3014_v13  ;;  %v2475_v34 = vld [vmem:[%s3220_s4 + $0x20] sm:$0xf]  ;;  %v3031_v37 = vld [vmem:[%s3764_s1 + $0xf0] sm:$0xff]  ;;  %v3297_v40 = vpack.c.bf16 %v2621_v35, %v2621_v35  ;;  %v3299_v41 = vpack.c.bf16 %v2775_v36, %v2775_v36  ;;  %v3026_v42 = vld [vmem:[%s3764_s1 + $0xc8] sm:$0xff] }
  0x16   : > { %269 = vmatpush.bf16.msra.mxu1 %v3002_v14  ;;  %v3023_v38 = vld [vmem:[%s3764_s1 + $0xb0] sm:$0xff]  ;;  %v3295_v39 = vpack.c.bf16 %v2475_v34, %v2475_v34  ;;  %v2844_v44 = vld [vmem:[%s3220_s4 + $0x38] sm:$0xf]  ;;  %v3030_v48 = vld [vmem:[%s3764_s1 + $0xe8] sm:$0xff] }
  0x17   : > { %v2698_v43 = vld [vmem:[%s3220_s4 + $0x30] sm:$0xf]  ;;  %v3314_v46 = vpack.c.bf16 %v2844_v44, %v2844_v44  ;;  %v3020_v47 = vld [vmem:[%s3764_s1 + $0x98] sm:$0xff]  ;;  %v3022_v49 = vld [vmem:[%s3764_s1 + $0xa8] sm:$0xff] }
  0x18   : > { %321 = vmatpush.bf16.msra.mxu2 %v3009_v17  ;;  %229 = vmatpush.bf16.msra.mxu0 %v3006_v25  ;;  %v3312_v45 = vpack.c.bf16 %v2698_v43, %v2698_v43  ;;  %v3025_v50 = vld [vmem:[%s3764_s1 + $0xc0] sm:$0xff]  ;;  %v3019_v51 = vld [vmem:[%s3764_s1 + $0x90] sm:$0xff]  ;;  %v3040_v53 = vld [vmem:[%s3764_s1 + $0x18] sm:$0xff] }
  0x19   : > { %374 = vmatpush.bf16.msra.mxu3 %v3013_v20  ;;  %v3029_v52 = vld [vmem:[%s3764_s1 + $0xe0] sm:$0xff]  ;;  %v3018_v55 = vld [vmem:[%s3764_s1 + $0x88] sm:$0xff]  ;;  %v3048_v56 = vld [vmem:[%s3764_s1 + $0x58] sm:$0xff] }
  0x1a   : > { %270 = vmatpush.bf16.msra.mxu1 %v3001_v23  ;;  %549 = vrot.lane.b32.xlu0 %v488_v26, %s3164_s15  ;;  %v3021_v54 = vld [vmem:[%s3764_s1 + $0xa0] sm:$0xff]  ;;  %v2226_v57 = vld [vmem:[%s3220_s4 + $0x9] sm:$0xf]  ;;  %v3044_v59 = vld [vmem:[%s3764_s1 + $0x38] sm:$0xff] }
  0x1b   : > { %669 = vrot.lane.b32.xlu1 %v3262_v27, %s3164_s15  ;;  %1134 = vrot.lane.b32.xlu2 %v3264_v28, %s3164_s15  ;;  %v435_v58 = vpack.c.bf16 %v2226_v57, %v2226_v57  ;;  %v3039_v60 = vld [vmem:[%s3764_s1 + $0x10] sm:$0xff]  ;;  %v3017_v61 = vld [vmem:[%s3764_s1 + $0x80] sm:$0xff] }
  0x1c   : > { %529 = vmatpush.bf16.msrb.mxu2 %v3028_v24  ;;  %2200 = vmatmul.msk.bf16.vlgmr.msra.gmra.mxu3 %vm219_vm0, %v330_v11  ;;  %v3047_v62 = vld [vmem:[%s3764_s1 + $0x50] sm:$0xff]  ;;  %v3038_v63 = vld [vmem:[%s3764_s1 + $0x8] sm:$0xff]  ;;  %v3037_v3 = vld [vmem:[%s3764_s1] sm:$0xff] }
  0x1d   : > { %2174 = vmatmul.msk.bf16.vlgmr.msra.gmra.mxu2 %vm219_vm0, %v277_v29  ;;  %2149 = vmatmul.msk.bf16.vlgmr.msra.gmra.mxu1 %vm219_vm0, %v174_v10  ;;  %v3043_v0 = vld [vmem:[%s3764_s1 + $0x30] sm:$0xff]  ;;  %v3046_v1 = vld [vmem:[%s3764_s1 + $0x48] sm:$0xff]  ;;  %v3045_v4 = vld [vmem:[%s3764_s1 + $0x40] sm:$0xff] }
  0x1e   : > { %582 = vmatpush.bf16.msrb.mxu3 %v3032_v30  ;;  %476 = vmatpush.bf16.msrb.mxu1 %v3024_v31  ;;  %v3042_v2 = vld [vmem:[%s3764_s1 + $0x28] sm:$0xff]  ;;  %v3060_v5 = vld [vmem:[%s3764_s1 + $0xb8] sm:$0xff]  ;;  %v3041_v6 = vld [vmem:[%s3764_s1 + $0x20] sm:$0xff] }
  0x1f   : > { %230 = vmatpush.bf16.msra.mxu0 %v3005_v33  ;;  %v2921_v7 = vld [vmem:[%s3220_s4 + $0x40] sm:$0xf]  ;;  %v3056_v8 = vld [vmem:[%s3764_s1 + $0x98] sm:$0xff]  ;;  %v3059_v9 = vld [vmem:[%s3764_s1 + $0xb0] sm:$0xff] }
  0x20   : > { %530 = vmatpush.bf16.msrb.mxu2 %v3027_v32  ;;  %v3398_v10 = vpack.c.bf16 %v2921_v7, %v2921_v7  ;;  %v3055_v11 = vld [vmem:[%s3764_s1 + $0x90] sm:$0xff]  ;;  %v3058_v12 = vld [vmem:[%s3764_s1 + $0xa8] sm:$0xff]  ;;  %v3036_v13 = vld [vmem:[%s3764_s1 + $0x118] sm:$0xff] }
  0x21   : > { %v3054_v17 = vld [vmem:[%s3764_s1 + $0x88] sm:$0xff]  ;;  %v3057_v18 = vld [vmem:[%s3764_s1 + $0xa0] sm:$0xff]  ;;  %v3035_v19 = vld [vmem:[%s3764_s1 + $0x110] sm:$0xff] }
  0x22   : > { %583 = vmatpush.bf16.msrb.mxu3 %v3031_v37  ;;  %477 = vmatpush.bf16.msrb.mxu1 %v3023_v38  ;;  %v2449_v20 = vld [vmem:[%s3220_s4 + $0x19] sm:$0xf]  ;;  %v3053_v22 = vld [vmem:[%s3764_s1 + $0x80] sm:$0xff]  ;;  %v3034_v24 = vld [vmem:[%s3764_s1 + $0x108] sm:$0xff] }
  0x23   : > { %1018 = vrot.lane.b32.xlu0 %v3295_v39, %s3164_s15  ;;  %1328 = vrot.lane.b32.xlu1 %v3297_v40, %s3164_s15  ;;  %v907_v21 = vpack.c.bf16 %v2449_v20, %v2449_v20  ;;  %v3080_v23 = vld [vmem:[%s3764_s1 + $0x38] sm:$0xff]  ;;  %v3079_v30 = vld [vmem:[%s3764_s1 + $0x30] sm:$0xff] }
  0x24   : > { %1599 = vrot.lane.b32.xlu2 %v3299_v41, %s3164_s15  ;;  %531 = vmatpush.bf16.msrb.mxu2 %v3026_v42  ;;  %v3064_v25 = vld [vmem:[%s3764_s1 + $0xd8] sm:$0xff]  ;;  %v3033_v31 = vld [vmem:[%s3764_s1 + $0x100] sm:$0xff]  ;;  %v3063_v32 = vld [vmem:[%s3764_s1 + $0xd0] sm:$0xff] }
  0x25   : > { %424 = vmatpush.bf16.msrb.mxu0 %v3020_v47  ;;  %v3072_v29 = vld [vmem:[%s3764_s1 + $0x118] sm:$0xff]  ;;  %v3071_v33 = vld [vmem:[%s3764_s1 + $0x110] sm:$0xff]  ;;  %v3078_v34 = vld [vmem:[%s3764_s1 + $0x28] sm:$0xff] }
  0x26   : > { %584 = vmatpush.bf16.msrb.mxu3 %v3030_v48  ;;  %478 = vmatpush.bf16.msrb.mxu1 %v3022_v49  ;;  %v3052_v36 = vld [vmem:[%s3764_s1 + $0x78] sm:$0xff]  ;;  %v3062_v37 = vld [vmem:[%s3764_s1 + $0xc8] sm:$0xff]  ;;  %v2372_v38 = vld [vmem:[%s3220_s4 + $0x11] sm:$0xf] }
  0x27   : > { %v3070_v42 = vld [vmem:[%s3764_s1 + $0x108] sm:$0xff]  ;;  %v3077_v43 = vld [vmem:[%s3764_s1 + $0x20] sm:$0xff]  ;;  %v3051_v44 = vld [vmem:[%s3764_s1 + $0x70] sm:$0xff] }
  0x28   : > { %532 = vmatpush.bf16.msrb.mxu2 %v3025_v50  ;;  %v3061_v47 = vld [vmem:[%s3764_s1 + $0xc0] sm:$0xff]  ;;  %v3092_v48 = vld [vmem:[%s3764_s1 + $0x98] sm:$0xff]  ;;  %v3102_v20 = vld [vmem:[%s3764_s1 + $0xe8] sm:$0xff] }
  0x29   : > { %425 = vmatpush.bf16.msrb.mxu0 %v3019_v51  ;;  %v3069_v49 = vld [vmem:[%s3764_s1 + $0x100] sm:$0xff]  ;;  %v752_v51 = vpack.c.bf16 %v2372_v38, %v2372_v38  ;;  %v3118_v38 = vld [vmem:[%s3764_s1 + $0x48] sm:$0xff] }
  0x2a   : > { %585 = vmatpush.bf16.msrb.mxu3 %v3029_v52  ;;  %479 = vmatpush.bf16.msrb.mxu1 %v3021_v54  ;;  %v3050_v52 = vld [vmem:[%s3764_s1 + $0x68] sm:$0xff]  ;;  %v3088_v54 = vld [vmem:[%s3764_s1 + $0x78] sm:$0xff]  ;;  %v3049_v57 = vld [vmem:[%s3764_s1 + $0x60] sm:$0xff] }
  0x2b   : > { %1483 = vrot.lane.b32.xlu0 %v3312_v45, %s3164_s15  ;;  %1793 = vrot.lane.b32.xlu1 %v3314_v46, %s3164_s15 }
  0x2c   : > { %742 = vmatpush.bf16.msra.mxu2 %v3040_v53  ;;  %1948 = vrot.lane.b32.xlu2 %v3398_v10, %s3164_s15  ;;  %v3076_v53 = vld [vmem:[%s3764_s1 + $0x18] sm:$0xff] }
  0x2d   : > { %2277 = vmatmul.msk.bf16.vlgmr.msrb.gmra.mxu2 %vm219_vm0, %v488_v26  ;;  %426 = vmatpush.bf16.msrb.mxu0 %v3018_v55  ;;  %v3091_v55 = vld [vmem:[%s3764_s1 + $0x90] sm:$0xff] }
  0x2e   : > { %792 = vmatpush.bf16.msra.mxu3 %v3048_v56  ;;  %2251 = vmatmul.msk.bf16.vlgmr.msrb.gmra.mxu1 %vm219_vm0, %v435_v58  ;;  %v2303_v56 = vld [vmem:[%s3220_s4 + $0x11] sm:$0xf] }
  0x2f   : > { %702 = vmatpush.bf16.msra.mxu1 %v3044_v59  ;;  %v3075_v58 = vld [vmem:[%s3764_s1 + $0x10] sm:$0xff]  ;;  %v3090_v59 = vld [vmem:[%s3764_s1 + $0x88] sm:$0xff] }
  0x30   : > { %743 = vmatpush.bf16.msra.mxu2 %v3039_v60  ;;  %v3087_v60 = vld [vmem:[%s3764_s1 + $0x70] sm:$0xff] }
  0x31   : > { %427 = vmatpush.bf16.msrb.mxu0 %v3017_v61  ;;  %v593_v61 = vpack.c.bf16 %v2303_v56, %v2303_v56  ;;  %v3127_v56 = vld [vmem:[%s3764_s1 + $0x90] sm:$0xff] }
  0x32   : > { %793 = vmatpush.bf16.msra.mxu3 %v3047_v62  ;;  %v3068_v62 = vld [vmem:[%s3764_s1 + $0xf8] sm:$0xff] }
  0x33   : > { %703 = vmatpush.bf16.msra.mxu1 %v3043_v0  ;;  %v3067_v0 = vld [vmem:[%s3764_s1 + $0xf0] sm:$0xff] }
  0x34   : > { %744 = vmatpush.bf16.msra.mxu2 %v3038_v63  ;;  %v3074_v63 = vld [vmem:[%s3764_s1 + $0x8] sm:$0xff] }
  0x36   : > { %794 = vmatpush.bf16.msra.mxu3 %v3046_v1  ;;  %v3086_v1 = vld [vmem:[%s3764_s1 + $0x68] sm:$0xff] }
  0x37   : > { %704 = vmatpush.bf16.msra.mxu1 %v3042_v2  ;;  %v3089_v2 = vld [vmem:[%s3764_s1 + $0x80] sm:$0xff] }
  0x38   : > { %745 = vmatpush.bf16.msra.mxu2 %v3037_v3  ;;  %v3073_v3 = vld [vmem:[%s3764_s1] sm:$0xff] }
  0x3a   : > { %795 = vmatpush.bf16.msra.mxu3 %v3045_v4  ;;  %v2526_v4 = vld [vmem:[%s3220_s4 + $0x21] sm:$0xf] }
  0x3b   : > { %705 = vmatpush.bf16.msra.mxu1 %v3041_v6  ;;  %v3085_v6 = vld [vmem:[%s3764_s1 + $0x60] sm:$0xff] }
  0x3c   : > { %947 = vmatpush.bf16.msrb.mxu2 %v3060_v5  ;;  %v3108_v5 = vld [vmem:[%s3764_s1 + $0x118] sm:$0xff] }
  0x3d   : > { %2371 = vmatmul.msk.bf16.vlgmr.msra.gmra.mxu2 %vm219_vm0, %v3262_v27 }
  0x3f   : > { %896 = vmatpush.bf16.msrb.mxu1 %v3056_v8  ;;  %v1062_v8 = vpack.c.bf16 %v2526_v4, %v2526_v4  ;;  %v2818_v4 = vld [vmem:[%s3220_s4 + $0x31] sm:$0xf] }
  0x40   : > { %948 = vmatpush.bf16.msrb.mxu2 %v3059_v9  ;;  %v3066_v9 = vld [vmem:[%s3764_s1 + $0xe8] sm:$0xff] }
  0x43   : > { %897 = vmatpush.bf16.msrb.mxu1 %v3055_v11  ;;  %v3096_v11 = vld [vmem:[%s3764_s1 + $0xb8] sm:$0xff] }
  0x44   : > { %949 = vmatpush.bf16.msrb.mxu2 %v3058_v12  ;;  %v3104_v12 = vld [vmem:[%s3764_s1 + $0xf8] sm:$0xff] }
  0x47   : > { %898 = vmatpush.bf16.msrb.mxu1 %v3054_v17  ;;  %v3106_v17 = vld [vmem:[%s3764_s1 + $0x108] sm:$0xff] }
  0x48   : > { %950 = vmatpush.bf16.msrb.mxu2 %v3057_v18  ;;  %v3084_v18 = vld [vmem:[%s3764_s1 + $0x58] sm:$0xff] }
  0x4b   : > { %899 = vmatpush.bf16.msrb.mxu1 %v3053_v22  ;;  %v3083_v22 = vld [vmem:[%s3764_s1 + $0x50] sm:$0xff] }
  0x4c   : > { %1167 = vmatpush.bf16.msra.mxu2 %v3080_v23  ;;  %v3093_v23 = vld [vmem:[%s3764_s1 + $0xa0] sm:$0xff] }
  0x4d   : > { %2474 = vmatmul.msk.bf16.vlgmr.msrb.gmra.mxu2 %vm219_vm0, %v907_v21  ;;  %v3105_v21 = vld [vmem:[%s3764_s1 + $0x100] sm:$0xff] }
  0x50   : > { %1168 = vmatpush.bf16.msra.mxu2 %v3079_v30  ;;  %v3120_v30 = vld [vmem:[%s3764_s1 + $0x58] sm:$0xff] }
  0x54   : > { %1169 = vmatpush.bf16.msra.mxu2 %v3078_v34 }
  0x58   : > { %1170 = vmatpush.bf16.msra.mxu2 %v3077_v43  ;;  %v3099_v43 = vld [vmem:[%s3764_s1 + $0xd0] sm:$0xff] }
  0x5c   : > { %1361 = vmatpush.bf16.msrb.mxu2 %v3092_v48  ;;  %v3117_v48 = vld [vmem:[%s3764_s1 + $0x40] sm:$0xff] }
  0x60   : > { %1362 = vmatpush.bf16.msrb.mxu2 %v3091_v55  ;;  %v2595_v55 = vld [vmem:[%s3220_s4 + $0x21] sm:$0xf] }
  0x64   : > { %1363 = vmatpush.bf16.msrb.mxu2 %v3090_v59  ;;  %v1217_v59 = vpack.c.bf16 %v2595_v55, %v2595_v55  ;;  %v3744_v55 = vld [vmem:[%s3765_s2] ss:$0 sm:$0xff] }
  0x68   : > { %1364 = vmatpush.bf16.msrb.mxu2 %v3089_v2  ;;  %v3111_v2 = vld [vmem:[%s3764_s1 + $0x10] sm:$0xff] }
  0x6d   : > { %v864_v35 = vpop.permute.xlu2 %863 }
  0x75   : > { %v1135_v50 = vpop.permute.xlu2 %1134 }
  0x76   : > { %2577 = vmatmul.msk.bf16.vlgmr.msra.gmra.mxu2 %vm219_vm0, %v1135_v50  ;;  %v3098_v50 = vld [vmem:[%s3764_s1 + $0xc8] sm:$0xff] }
  0x77   : > { %1567 = vmatpush.bf16.msra.mxu2 %v3108_v5  ;;  %v3133_v5 = vld [vmem:[%s3764_s1 + $0xc0] sm:$0xff] }
  0x84   : > { %v194_v14 = vpop.permute.xlu0 %193 }
  0x85   : > { %v392_v16 = vpop.permute.xlu1 %391  ;;  %2132 = vmatmul.msk.bf16.vlgmr.msra.gmra.mxu0 %vm219_vm0, %v194_v14  ;;  %v3065_v14 = vld [vmem:[%s3764_s1 + $0xe0] sm:$0xff] }
  0x86   : > { %634 = vmatpush.bf16.msra.mxu0 %v3036_v13  ;;  %v3107_v13 = vld [vmem:[%s3764_s1 + $0x110] sm:$0xff] }
  0x87   : > { %1568 = vmatpush.bf16.msra.mxu2 %v3107_v13  ;;  %v3109_v13 = vld [vmem:[%s3764_s1] sm:$0xff] }
  0x8a   : > { %635 = vmatpush.bf16.msra.mxu0 %v3035_v19  ;;  %v3094_v19 = vld [vmem:[%s3764_s1 + $0xa8] sm:$0xff] }
  0x8b   : > { %1569 = vmatpush.bf16.msra.mxu2 %v3106_v17  ;;  %v3142_v17 = vld [vmem:[%s3764_s1 + $0x108] sm:$0xff] }
  0x8c   : > { %v550_v26 = vpop.permute.xlu0 %549 }
  0x8d   : > { %v670_v27 = vpop.permute.xlu1 %669  ;;  %2302 = vmatmul.msk.bf16.vlgmr.msrb.gmra.mxu3 %vm219_vm0, %v550_v26  ;;  %v3124_v26 = vld [vmem:[%s3764_s1 + $0x78] sm:$0xff] }
  0x8e   : > { %2354 = vmatmul.msk.bf16.vlgmr.msra.gmra.mxu1 %vm219_vm0, %v670_v27  ;;  %636 = vmatpush.bf16.msra.mxu0 %v3034_v24  ;;  %v2749_v24 = vld [vmem:[%s3220_s4 + $0x31] sm:$0xf]  ;;  %v3082_v27 = vld [vmem:[%s3764_s1 + $0x48] sm:$0xff] }
  0x8f   : > { %999 = vmatpush.bf16.msrb.mxu3 %v3064_v25  ;;  %1102 = vmatpush.bf16.msra.mxu1 %v3072_v29  ;;  %v3101_v25 = vld [vmem:[%s3764_s1 + $0xe0] sm:$0xff]  ;;  %v3116_v29 = vld [vmem:[%s3764_s1 + $0x38] sm:$0xff] }
  0x90   : > { %1570 = vmatpush.bf16.msra.mxu2 %v3105_v21  ;;  %v3141_v21 = vld [vmem:[%s3764_s1 + $0x100] sm:$0xff] }
  0x92   : > { %637 = vmatpush.bf16.msra.mxu0 %v3033_v31  ;;  %v3123_v31 = vld [vmem:[%s3764_s1 + $0x70] sm:$0xff] }
  0x93   : > { %1000 = vmatpush.bf16.msrb.mxu3 %v3063_v32  ;;  %1103 = vmatpush.bf16.msra.mxu1 %v3071_v33  ;;  %v3081_v32 = vld [vmem:[%s3764_s1 + $0x40] sm:$0xff]  ;;  %v3122_v33 = vld [vmem:[%s3764_s1 + $0x68] sm:$0xff] }
  0x95   : > { %2225 = vmatmul.msk.bf16.vlgmr.msrb.gmra.mxu0 %vm219_vm0, %v392_v16  ;;  %v1329_v7 = vpop.permute.xlu1 %1328  ;;  %v3103_v16 = vld [vmem:[%s3764_s1 + $0xf0] sm:$0xff]  ;;  %v1019_v34 = vpop.permute.xlu0 %1018 }
  0x96   : > { %844 = vmatpush.bf16.msrb.mxu0 %v3052_v36  ;;  %2671 = vmatmul.msk.bf16.vlgmr.msrb.gmra.mxu2 %vm219_vm0, %v1329_v7  ;;  %v3114_v36 = vld [vmem:[%s3764_s1 + $0x28] sm:$0xff] }
  0x97   : > { %1001 = vmatpush.bf16.msrb.mxu3 %v3062_v37  ;;  %1104 = vmatpush.bf16.msra.mxu1 %v3070_v42  ;;  %v2672_v37 = vld [vmem:[%s3220_s4 + $0x29] sm:$0xf]  ;;  %v3121_v42 = vld [vmem:[%s3764_s1 + $0x60] sm:$0xff] }
  0x98   : > { %1774 = vmatpush.bf16.msrb.mxu2 %v3124_v26  ;;  %v3110_v7 = vld [vmem:[%s3764_s1 + $0x8] sm:$0xff]  ;;  %v2972_v26 = vld [vmem:[%s3220_s4 + $0x41] sm:$0xf] }
  0x9a   : > { %845 = vmatpush.bf16.msrb.mxu0 %v3051_v44  ;;  %v3113_v44 = vld [vmem:[%s3764_s1 + $0x20] sm:$0xff] }
  0x9b   : > { %1002 = vmatpush.bf16.msrb.mxu3 %v3061_v47  ;;  %1105 = vmatpush.bf16.msra.mxu1 %v3069_v49  ;;  %v3140_v47 = vld [vmem:[%s3764_s1 + $0xf8] sm:$0xff]  ;;  %v1372_v49 = vpack.c.bf16 %v2672_v37, %v2672_v37 }
  0x9c   : > { %1775 = vmatpush.bf16.msrb.mxu2 %v3123_v31 }
  0x9d   : > { %2397 = vmatmul.msk.bf16.vlgmr.msra.gmra.mxu3 %vm219_vm0, %v752_v51  ;;  %v3128_v51 = vld [vmem:[%s3764_s1 + $0x98] sm:$0xff] }
  0x9e   : > { %2448 = vmatmul.msk.bf16.vlgmr.msrb.gmra.mxu1 %vm219_vm0, %v864_v35  ;;  %846 = vmatpush.bf16.msrb.mxu0 %v3050_v52  ;;  %v3100_v35 = vld [vmem:[%s3764_s1 + $0xd8] sm:$0xff]  ;;  %v1484_v52 = vpop.permute.xlu0 %1483 }
  0x9f   : > { %1207 = vmatpush.bf16.msra.mxu3 %v3076_v53  ;;  %1309 = vmatpush.bf16.msrb.mxu1 %v3088_v54  ;;  %v3136_v53 = vld [vmem:[%s3764_s1 + $0xd8] sm:$0xff]  ;;  %v3139_v54 = vld [vmem:[%s3764_s1 + $0xf0] sm:$0xff] }
  0xa0   : > { %1776 = vmatpush.bf16.msrb.mxu2 %v3122_v33 }
  0xa2   : > { %847 = vmatpush.bf16.msrb.mxu0 %v3049_v57  ;;  %v3135_v57 = vld [vmem:[%s3764_s1 + $0xd0] sm:$0xff] }
  0xa3   : > { %1208 = vmatpush.bf16.msra.mxu3 %v3075_v58  ;;  %1310 = vmatpush.bf16.msrb.mxu1 %v3087_v60  ;;  %v3138_v58 = vld [vmem:[%s3764_s1 + $0xe8] sm:$0xff]  ;;  %v1600_v60 = vpop.permute.xlu2 %1599 }
  0xa4   : > { %1777 = vmatpush.bf16.msrb.mxu2 %v3121_v42 }
  0xa5   : > { %2328 = vmatmul.msk.bf16.vlgmr.msra.gmra.mxu0 %vm219_vm0, %v593_v61  ;;  %v3112_v61 = vld [vmem:[%s3764_s1 + $0x18] sm:$0xff] }
  0xa6   : > { %1051 = vmatpush.bf16.msra.mxu0 %v3068_v62  ;;  %v3126_v62 = vld [vmem:[%s3764_s1 + $0x88] sm:$0xff] }
  0xa7   : > { %1209 = vmatpush.bf16.msra.mxu3 %v3074_v63  ;;  %1311 = vmatpush.bf16.msrb.mxu1 %v3086_v1  ;;  %v3134_v63 = vld [vmem:[%s3764_s1 + $0xc8] sm:$0xff]  ;;  %v272_v1 = vpop.f32.mrf.mxu1 }
  0xaa   : > { %1052 = vmatpush.bf16.msra.mxu0 %v3067_v0  ;;  %v3137_v0 = vld [vmem:[%s3764_s1 + $0xe0] sm:$0xff] }
  0xab   : > { %1210 = vmatpush.bf16.msra.mxu3 %v3073_v3  ;;  %1312 = vmatpush.bf16.msrb.mxu1 %v3085_v6  ;;  %v3125_v3 = vld [vmem:[%s3764_s1 + $0x80] sm:$0xff]  ;;  %v1682_v6 = vpack.c.bf16 %v2818_v4, %v2818_v4 }
  0xad   : > { %2500 = vmatmul.msk.bf16.vlgmr.msrb.gmra.mxu3 %vm219_vm0, %v3295_v39  ;;  %v3095_v39 = vld [vmem:[%s3764_s1 + $0xb0] sm:$0xff] }
  0xae   : > { %2551 = vmatmul.msk.bf16.vlgmr.msra.gmra.mxu1 %vm219_vm0, %v1062_v8  ;;  %1053 = vmatpush.bf16.msra.mxu0 %v3066_v9  ;;  %v3144_v8 = vld [vmem:[%s3764_s1 + $0x118] sm:$0xff]  ;;  %v1949_v9 = vpop.permute.xlu2 %1948 }
  0xaf   : > { %1412 = vmatpush.bf16.msrb.mxu3 %v3096_v11  ;;  %1516 = vmatpush.bf16.msra.mxu1 %v3104_v12  ;;  %v323_v11 = vpop.f32.mrf.mxu2  ;;  %v376_v12 = vpop.f32.mrf.mxu3 }
  0xb2   : > { %1054 = vmatpush.bf16.msra.mxu0 %v3065_v14  ;;  %v3143_v14 = vld [vmem:[%s3764_s1 + $0x110] sm:$0xff] }
  0xb3   : > { %1413 = vmatpush.bf16.msrb.mxu3 %v3095_v39  ;;  %1517 = vmatpush.bf16.msra.mxu1 %v3103_v16  ;;  %v274_v39 = vpop.f32.mrf.mxu1  ;;  %v3132_v16 = vld [vmem:[%s3764_s1 + $0xb8] sm:$0xff] }
  0xb5   : > { %2423 = vmatmul.msk.bf16.vlgmr.msrb.gmra.mxu0 %vm219_vm0, %v3234_v15  ;;  %v1527_v15 = vpack.c.bf16 %v2749_v24, %v2749_v24  ;;  %v3129_v24 = vld [vmem:[%s3764_s1 + $0xa0] sm:$0xff] }
  0xb6   : > { %1257 = vmatpush.bf16.msrb.mxu0 %v3084_v18 }
  0xb7   : > { %1414 = vmatpush.bf16.msrb.mxu3 %v3094_v19  ;;  %1518 = vmatpush.bf16.msra.mxu1 %v3102_v20  ;;  %v325_v18 = vpop.f32.mrf.mxu2  ;;  %v378_v19 = vpop.f32.mrf.mxu3  ;;  %v3131_v20 = vld [vmem:[%s3764_s1 + $0xb0] sm:$0xff] }
  0xb8   : > { %2774 = vmatmul.msk.bf16.vlgmr.msra.gmra.mxu2 %vm219_vm0, %v1527_v15 }
  0xb9   : > { %1981 = vmatpush.bf16.msra.mxu2 %v3140_v47 }
  0xba   : > { %1258 = vmatpush.bf16.msrb.mxu0 %v3083_v22  ;;  %v1794_v22 = vpop.permute.xlu1 %1793 }
  0xbb   : > { %1415 = vmatpush.bf16.msrb.mxu3 %v3093_v23  ;;  %1519 = vmatpush.bf16.msra.mxu1 %v3101_v25  ;;  %v481_v23 = vpop.f32.mrf.mxu1 }
  0xbd   : > { %2594 = vmatmul.msk.bf16.vlgmr.msra.gmra.mxu3 %vm219_vm0, %v3264_v28  ;;  %v3115_v28 = vld [vmem:[%s3764_s1 + $0x30] sm:$0xff]  ;;  %1982 = vmatpush.bf16.msra.mxu2 %v3139_v54 }
  0xbe   : > { %2646 = vmatmul.msk.bf16.vlgmr.msrb.gmra.mxu1 %vm219_vm0, %v3297_v40  ;;  %1259 = vmatpush.bf16.msrb.mxu0 %v3082_v27  ;;  %v3119_v40 = vld [vmem:[%s3764_s1 + $0x50] sm:$0xff] }
  0xbf   : > { %1632 = vmatpush.bf16.msra.mxu3 %v3116_v29  ;;  %1722 = vmatpush.bf16.msrb.mxu1 %v3120_v30  ;;  %v534_v15 = vpop.f32.mrf.mxu2  ;;  %v1992_v29 = vpack.c.bf16 %v2972_v26, %v2972_v26  ;;  %v2895_v30 = vld [vmem:[%s3220_s4 + $0x39] sm:$0xf] }
  0xc1   : > { %1983 = vmatpush.bf16.msra.mxu2 %v3138_v58 }
  0xc2   : > { %1260 = vmatpush.bf16.msrb.mxu0 %v3081_v32  ;;  %v1837_v32 = vpack.c.bf16 %v2895_v30, %v2895_v30 }
  0xc3   : > { %1633 = vmatpush.bf16.msra.mxu3 %v3115_v28  ;;  %1723 = vmatpush.bf16.msrb.mxu1 %v3119_v40  ;;  %v483_v25 = vpop.f32.mrf.mxu1 }
  0xc5   : > { %2525 = vmatmul.msk.bf16.vlgmr.msra.gmra.mxu0 %vm219_vm0, %v1019_v34  ;;  %1984 = vmatpush.bf16.msra.mxu2 %v3137_v0 }
  0xc6   : > { %1464 = vmatpush.bf16.msra.mxu0 %v3100_v35 }
  0xc7   : > { %1634 = vmatpush.bf16.msra.mxu3 %v3114_v36  ;;  %1724 = vmatpush.bf16.msrb.mxu1 %v3118_v38  ;;  %v536_v27 = vpop.f32.mrf.mxu2 }
  0xc8   : > { %2869 = vmatmul.msk.bf16.vlgmr.msrb.gmra.mxu2 %vm219_vm0, %v3314_v46  ;;  %v3097_v46 = vld [vmem:[%s3764_s1 + $0xc0] sm:$0xff] }
  0xca   : > { %1465 = vmatpush.bf16.msra.mxu0 %v3099_v43 }
  0xcb   : > { %1635 = vmatpush.bf16.msra.mxu3 %v3113_v44  ;;  %1725 = vmatpush.bf16.msrb.mxu1 %v3117_v48 }
  0xcd   : > { %2697 = vmatmul.msk.bf16.vlgmr.msrb.gmra.mxu3 %vm219_vm0, %v1372_v49 }
  0xce   : > { %2748 = vmatmul.msk.bf16.vlgmr.msra.gmra.mxu1 %vm219_vm0, %v1484_v52  ;;  %1466 = vmatpush.bf16.msra.mxu0 %v3098_v50 }
  0xcf   : > { %1826 = vmatpush.bf16.msrb.mxu3 %v3128_v51  ;;  %1929 = vmatpush.bf16.msra.mxu1 %v3136_v53  ;;  %v747_v31 = vpop.f32.mrf.mxu2 }
  0xd2   : > { %1467 = vmatpush.bf16.msra.mxu0 %v3097_v46 }
  0xd3   : > { %1827 = vmatpush.bf16.msrb.mxu3 %v3127_v56  ;;  %1930 = vmatpush.bf16.msra.mxu1 %v3135_v57 }
  0xd5   : > { %2620 = vmatmul.msk.bf16.vlgmr.msrb.gmra.mxu0 %vm219_vm0, %v1217_v59 }
  0xd6   : > { %1672 = vmatpush.bf16.msrb.mxu0 %v3112_v61 }
  0xd7   : > { %1828 = vmatpush.bf16.msrb.mxu3 %v3126_v62  ;;  %1931 = vmatpush.bf16.msra.mxu1 %v3134_v63  ;;  %v749_v28 = vpop.f32.mrf.mxu2 }
  0xd8   : > { %2971 = vmatmul.msk.bf16.vlgmr.msra.gmra.mxu2 %vm219_vm0, %v1949_v9 }
  0xda   : > { %1673 = vmatpush.bf16.msrb.mxu0 %v3111_v2 }
  0xdb   : > { %1829 = vmatpush.bf16.msrb.mxu3 %v3125_v3  ;;  %1932 = vmatpush.bf16.msra.mxu1 %v3133_v5 }
  0xdd   : > { %2800 = vmatmul.msk.bf16.vlgmr.msra.gmra.mxu3 %vm219_vm0, %v1600_v60 }
  0xde   : > { %2843 = vmatmul.msk.bf16.vlgmr.msrb.gmra.mxu1 %vm219_vm0, %v1682_v6  ;;  %1674 = vmatpush.bf16.msrb.mxu0 %v3110_v7 }
  0xdf   : > { %2032 = vmatpush.bf16.msra.mxu3 %v3144_v8  ;;  %v952_v35 = vpop.f32.mrf.mxu2 }
  0xe2   : > { %1675 = vmatpush.bf16.msrb.mxu0 %v3109_v13 }
  0xe3   : > { %2033 = vmatpush.bf16.msra.mxu3 %v3143_v14 }
  0xe5   : > { %2723 = vmatmul.msk.bf16.vlgmr.msra.gmra.mxu0 %vm219_vm0, %v3312_v45  ;;  %v3130_v45 = vld [vmem:[%s3764_s1 + $0xa8] sm:$0xff] }
  0xe6   : > { %1877 = vmatpush.bf16.msra.mxu0 %v3132_v16 }
  0xe7   : > { %2034 = vmatpush.bf16.msra.mxu3 %v3142_v17  ;;  %v954_v44 = vpop.f32.mrf.mxu2 }
  0xea   : > { %1878 = vmatpush.bf16.msra.mxu0 %v3131_v20 }
  0xeb   : > { %2035 = vmatpush.bf16.msra.mxu3 %v3141_v21 }
  0xed   : > { %2894 = vmatmul.msk.bf16.vlgmr.msrb.gmra.mxu3 %vm219_vm0, %v1794_v22 }
  0xee   : > { %2946 = vmatmul.msk.bf16.vlgmr.msra.gmra.mxu1 %vm219_vm0, %v3398_v10  ;;  %1879 = vmatpush.bf16.msra.mxu0 %v3130_v45 }
  0xf2   : > { %1880 = vmatpush.bf16.msra.mxu0 %v3129_v24 }
  0xf5   : > { %2817 = vmatmul.msk.bf16.vlgmr.msrb.gmra.mxu0 %vm219_vm0, %v3299_v41 }
  0xf9   : > { %v1172_v52 = vpop.f32.mrf.mxu2 }
  0xfd   : > { %2997 = vmatmul.msk.bf16.vlgmr.msra.gmra.mxu3 %vm219_vm0, %v1992_v29 }
 0x101   : > { %v1174_v59 = vpop.f32.mrf.mxu2 }
 0x102   : > { %v232_v10 = vpop.f32.mrf.mxu0 }
 0x103   : > { %v273_v34 = vadd.f32 %v272_v1, %v232_v10 }
 0x105   : > { %2920 = vmatmul.msk.bf16.vlgmr.msra.gmra.mxu0 %vm219_vm0, %v1837_v32  ;;  %v327_v36 = vadd.f32 %v323_v11, %v273_v34 }
 0x107   : > { %v380_v42 = vadd.f32 %v376_v12, %v327_v36 }
 0x10a   : > { %v234_v40 = vpop.f32.mrf.mxu0 }
 0x10b   : > { %v707_v33 = vpop.f32.mrf.mxu1 }
 0x10c   : > { %v748_v1 = vadd.f32 %v747_v31, %v707_v33 }
 0x110   : > { %v587_v37 = vpop.f32.mrf.mxu3 }
 0x112   : > { %v429_v38 = vpop.f32.mrf.mxu0 }
 0x113   : > { %v709_v41 = vpop.f32.mrf.mxu1  ;;  %v433_v43 = vadd.f32 %v429_v38, %v380_v42 }
 0x115   : > { %v485_v48 = vadd.f32 %v481_v23, %v433_v43 }
 0x117   : > { %v538_v51 = vadd.f32 %v534_v15, %v485_v48 }
 0x118   : > { %v589_v47 = vpop.f32.mrf.mxu3 }
 0x119   : > { %v591_v54 = vadd.f32 %v587_v37, %v538_v51  ;;  %v1366_v0 = vpop.f32.mrf.mxu2 }
 0x11a   : > { %v431_v49 = vpop.f32.mrf.mxu0 }
 0x11b   : > { %v901_v50 = vpop.f32.mrf.mxu1 }
 0x120   : > { %v797_v53 = vpop.f32.mrf.mxu3 }
 0x121   : > { %v801_v5 = vadd.f32 %v797_v53, %v748_v1  ;;  %v1368_v7 = vpop.f32.mrf.mxu2 }
 0x122   : > { %v639_v46 = vpop.f32.mrf.mxu0 }
 0x123   : > { %v903_v56 = vpop.f32.mrf.mxu1  ;;  %v643_v57 = vadd.f32 %v639_v46, %v591_v54 }
 0x125   : > { %v647_v58 = vadd.f32 %v3744_v55, %v643_v57 }
 0x127   : > { %v648_v60 = vmax.f32 %v647_v58, 0.0 }
 0x128   : > { %v799_v61 = vpop.f32.mrf.mxu3 }
 0x129   : > { %649 = vst [vmem:[%s3751_s25] sm:$0xf] %v648_v60 }
 0x12a   : > { %v641_v62 = vpop.f32.mrf.mxu0 }
 0x12b   : > { %v1107_v63 = vpop.f32.mrf.mxu1 }
 0x130   : > { %v1004_v2 = vpop.f32.mrf.mxu3 }
 0x132   : > { %v849_v3 = vpop.f32.mrf.mxu0 }
 0x133   : > { %v1109_v4 = vpop.f32.mrf.mxu1  ;;  %v853_v6 = vadd.f32 %v849_v3, %v801_v5 }
 0x135   : > { %v905_v9 = vadd.f32 %v901_v50, %v853_v6 }
 0x137   : > { %v956_v13 = vadd.f32 %v952_v35, %v905_v9 }
 0x138   : > { %v1006_v8 = vpop.f32.mrf.mxu3 }
 0x139   : > { %v1008_v16 = vadd.f32 %v1004_v2, %v956_v13 }
 0x13a   : > { %v851_v11 = vpop.f32.mrf.mxu0 }
 0x13b   : > { %v1314_v12 = vpop.f32.mrf.mxu1  ;;  %v1572_v14 = vpop.f32.mrf.mxu2 }
 0x140   : > { %v1212_v39 = vpop.f32.mrf.mxu3 }
 0x141   : > { %v1213_v30 = vadd.f32 %v1212_v39, %v1172_v52 }
 0x142   : > { %v1056_v17 = vpop.f32.mrf.mxu0 }
 0x143   : > { %v1316_v18 = vpop.f32.mrf.mxu1  ;;  %v1060_v19 = vadd.f32 %v1056_v17, %v1008_v16  ;;  %v1574_v21 = vpop.f32.mrf.mxu2 }
 0x145   : > { %v1111_v20 = vadd.f32 %v1107_v63, %v1060_v19 }
 0x147   : > { %v1112_v22 = vadd.f32 %v3744_v55, %v1111_v20 }
 0x148   : > { %v1214_v45 = vpop.f32.mrf.mxu3 }
 0x149   : > { %v1113_v23 = vmax.f32 %v1112_v22, 0.0 }
 0x14a   : > { %v1058_v24 = vpop.f32.mrf.mxu0 }
 0x14b   : > { %v1521_v15 = vpop.f32.mrf.mxu1  ;;  %1114 = vst [vmem:[%s3751_s25 + $0x4] sm:$0xf] %v1113_v23  ;;  %v1779_v25 = vpop.f32.mrf.mxu2 }
 0x150   : > { %v1417_v26 = vpop.f32.mrf.mxu3 }
 0x152   : > { %v1262_v27 = vpop.f32.mrf.mxu0 }
 0x153   : > { %v1523_v29 = vpop.f32.mrf.mxu1  ;;  %v1266_v31 = vadd.f32 %v1262_v27, %v1213_v30  ;;  %v1781_v32 = vpop.f32.mrf.mxu2 }
 0x155   : > { %v1318_v28 = vadd.f32 %v1314_v12, %v1266_v31 }
 0x157   : > { %v1370_v34 = vadd.f32 %v1366_v0, %v1318_v28 }
 0x158   : > { %v1419_v10 = vpop.f32.mrf.mxu3 }
 0x159   : > { %v1421_v37 = vadd.f32 %v1417_v26, %v1370_v34 }
 0x15a   : > { %v1264_v40 = vpop.f32.mrf.mxu0 }
 0x15b   : > { %v1727_v33 = vpop.f32.mrf.mxu1  ;;  %v1986_v35 = vpop.f32.mrf.mxu2 }
 0x160   : > { %v1637_v36 = vpop.f32.mrf.mxu3 }
 0x162   : > { %v1469_v38 = vpop.f32.mrf.mxu0 }
 0x163   : > { %v1729_v41 = vpop.f32.mrf.mxu1  ;;  %v1473_v42 = vadd.f32 %v1469_v38, %v1421_v37  ;;  %v1988_v44 = vpop.f32.mrf.mxu2 }
 0x165   : > { %v1525_v43 = vadd.f32 %v1521_v15, %v1473_v42 }
 0x167   : > { %v1576_v47 = vadd.f32 %v1572_v14, %v1525_v43 }
 0x168   : > { %v1639_v48 = vpop.f32.mrf.mxu3 }
 0x169   : > { %v1577_v49 = vadd.f32 %v3744_v55, %v1576_v47 }
 0x16a   : > { %v1471_v50 = vpop.f32.mrf.mxu0 }
 0x16b   : > { %v1934_v51 = vpop.f32.mrf.mxu1  ;;  %v1578_v52 = vmax.f32 %v1577_v49, 0.0 }
 0x16d   : > { %1579 = vst [vmem:[%s3751_s25 + $0x8] sm:$0xf] %v1578_v52 }
 0x170   : > { %v1831_v53 = vpop.f32.mrf.mxu3 }
 0x172   : > { %v1677_v54 = vpop.f32.mrf.mxu0 }
 0x173   : > { %v1936_v46 = vpop.f32.mrf.mxu1  ;;  %v1678_v56 = vadd.f32 %v1677_v54, %v1637_v36 }
 0x175   : > { %v1731_v58 = vadd.f32 %v1727_v33, %v1678_v56 }
 0x177   : > { %v1783_v60 = vadd.f32 %v1779_v25, %v1731_v58 }
 0x178   : > { %v1833_v57 = vpop.f32.mrf.mxu3 }
 0x179   : > { %v1835_v62 = vadd.f32 %v1831_v53, %v1783_v60 }
 0x17a   : > { %v1679_v59 = vpop.f32.mrf.mxu0 }
 0x180   : > { %v2037_v61 = vpop.f32.mrf.mxu3 }
 0x182   : > { %v1882_v63 = vpop.f32.mrf.mxu0 }
 0x183   : > { %v1886_v0 = vadd.f32 %v1882_v63, %v1835_v62 }
 0x185   : > { %v1938_v1 = vadd.f32 %v1934_v51, %v1886_v0 }
 0x187   : > { %v1990_v2 = vadd.f32 %v1986_v35, %v1938_v1 }
 0x188   : > { %v2039_v3 = vpop.f32.mrf.mxu3 }
 0x189   : > { %v2041_v4 = vadd.f32 %v2037_v61, %v1990_v2 }
 0x18a   : > { %v1884_v5 = vpop.f32.mrf.mxu0 }
 0x18b   : > { %v2042_v6 = vadd.f32 %v3744_v55, %v2041_v4 }
 0x18d   : > { %v2043_v7 = vmax.f32 %v2042_v6, 0.0 }
 0x18f   : > { %2044 = vst [vmem:[%s3751_s25 + $0xc] sm:$0xf] %v2043_v7 }
 0x190 PF: > { %s13_s12 = sadd.s32 1, %s3162_s12  }
 0x191   : > { %p10_p4 = scmp.ge.s32.totalorder %s13_s12, 4  }
 0x193   :  { %12 = sbr.rel (!%p10_p4) target bundleno = 1 (0x1), region = 78 }

</bundles_post_ra>
